<compile_context>
chip_gen: v7x
topology: tpu7x:2x2x1
jax: 0.10.0
libtpu: 0.0.40
codegen_flags: <defaults>
</compile_context>

<pallas_src>
import functools

import jax
import jax.numpy as jnp
import numpy as np
from jax import lax
from jax.experimental import pallas as pl
from jax.experimental.pallas import tpu as pltpu

_MIB = 1024 * 1024


def _round_up(x, m):
    return ((x + m - 1) // m) * m


def _cdiv(a, b):
    return -(-a // b)


def _compiler_params(semantics, est_bytes):
    # per-call VMEM limit derived from block bytes; capped for v7x (64 MiB).
    lim = int(min(64 * _MIB, max(32 * _MIB, 2 * int(est_bytes))))
    return pltpu.CompilerParams(dimension_semantics=semantics,
                                vmem_limit_bytes=lim)


def _pad_rows(x, rows):
    if x.shape[1] == rows:
        return x
    return jnp.pad(x, ((0, 0), (0, rows - x.shape[1]), (0, 0)))


# -----------------------------------------------------------------------------
# 1x1 conv (+ folded BN) + PReLU as a row-tiled linear kernel
# -----------------------------------------------------------------------------
def _linear_prelu_kernel(x_ref, w_ref, shift_ref, alpha_ref, o_ref):
    y = jnp.dot(x_ref[...], w_ref[...], preferred_element_type=jnp.float32)
    y = y + shift_ref[...]
    a = alpha_ref[0]
    o_ref[...] = jnp.where(y >= 0.0, y, a * y).astype(o_ref.dtype)


def linear_prelu(x, w, shift, alpha, out_dtype=jnp.bfloat16):
    """x: (M, K) bf16, w: (K, N) bf16 (BN folded), shift: (N,) f32."""
    M, K = x.shape
    N = w.shape[1]
    if M >= 2048:
        tm = 512
    elif M >= 256:
        tm = 256
    else:
        tm = _round_up(M, 8)
    Mp = _round_up(M, tm)
    if Mp != M:
        x = jnp.pad(x, ((0, Mp - M), (0, 0)))
    est = 2 * tm * K * 2 + K * N * 2 + 3 * tm * N * 4
    out = pl.pallas_call(
        _linear_prelu_kernel,
        out_shape=jax.ShapeDtypeStruct((Mp, N), out_dtype),
        grid=(Mp // tm,),
        in_specs=[
            pl.BlockSpec((tm, K), lambda i: (i, 0)),
            pl.BlockSpec((K, N), lambda i: (0, 0)),
            pl.BlockSpec((1, N), lambda i: (0, 0)),
            pl.BlockSpec(memory_space=pltpu.MemorySpace.SMEM),
        ],
        out_specs=pl.BlockSpec((tm, N), lambda i: (i, 0)),
        compiler_params=_compiler_params(("parallel",), est),
    )(x, w, shift.reshape(1, N).astype(jnp.float32),
      jnp.asarray(alpha, jnp.float32).reshape(1))
    return out[:M] if Mp != M else out


# -----------------------------------------------------------------------------
# Row-tiled 3x3 dilated conv (+ folded BN) + PReLU, K-fused im2col matmul
# -----------------------------------------------------------------------------
def _prep_conv_input(x_nhwc, dmax, target_rows=2048):
    """Pad once with the maximum apron; flatten; cast bf16.  Reusable across
    every dilation d <= dmax."""
    B, H, W, Cin = x_nhwc.shape
    Wp = _round_up(W + 2 * dmax, 8)            # lane/sublane-friendlier rows
    left = dmax                                # valid output columns start
    apron = dmax * (Wp + 1)                    # largest |tap offset|
    kh = 2 * dmax + 1                          # halo rows per tile boundary
    t_mult = max(1, min(8, _cdiv(H, kh), max(1, target_rows // (kh * Wp))))
    TH = t_mult * kh                           # output rows per tile
    n_tiles = _cdiv(H, TH)
    Hp = n_tiles * TH
    TB = TH * Wp                               # flattened rows per tile
    HALO = kh * Wp                             # >= 2*apron, divides TB
    NTOT = (n_tiles + 1) * TB                  # divisible by TB and HALO
    xp = jnp.pad(x_nhwc.astype(jnp.bfloat16),
                 ((0, 0), (0, Hp - H), (left, Wp - left - W), (0, 0)))
    xp = xp.reshape(B, Hp * Wp, Cin)
    xp = jnp.pad(xp, ((0, 0), (apron, NTOT - Hp * Wp - apron), (0, 0)))
    geom = dict(H=H, W=W, Cin=Cin, Wp=Wp, left=left, apron=apron,
                TH=TH, TB=TB, HALO=HALO, n_tiles=n_tiles, Hp=Hp,
                t_mult=t_mult)
    return xp, geom


def _conv3x3_kernel(xm_ref, xh_ref, w_ref, shift_ref, alpha_ref, o_ref,
                    *, offs, apron, th, wp, left, w_out):
    main = xm_ref[0]                               # (TB, Cin)  bf16
    halo = xh_ref[0]                               # (HALO, Cin) bf16
    taps = []
    for off in offs:
        s = apron + off                            # static, 0 <= s <= 2*apron
        if s == 0:
            taps.append(main)
        else:
            taps.append(jnp.concatenate([main[s:, :], halo[:s, :]], axis=0))
    patch = jnp.concatenate(taps, axis=-1)         # (TB, 9*Cin) bf16 im2col
    y = jnp.dot(patch, w_ref[...], preferred_element_type=jnp.float32)
    y = y + shift_ref[...]
    a = alpha_ref[0]
    y = jnp.where(y >= 0.0, y, a * y)
    cout = o_ref.shape[-1]
    y = y.reshape(th, wp, cout)[:, left:left + w_out, :]   # valid columns only
    o_ref[0] = y.astype(o_ref.dtype)
    # TODO(synk): write branch outputs straight into column offsets of the fuse
    # input slab (input_output_aliases) so narrow-Cout stores become lane-dense.


def conv3x3_bn_prelu(xp, geom, w9, shift, alpha, dilation):
    """3x3 conv (dilation=d<=dmax, padding=d) + folded BN + PReLU.

    xp: prepped activation from _prep_conv_input (shared across dilations).
    w9: (9*Cin, Cout) bf16 (taps major, Cin minor); shift: (Cout,) f32.
    Returns (B, H, W, Cout) bf16.
    """
    B = xp.shape[0]
    Cin, Cout = geom['Cin'], w9.shape[-1]
    Wp, TH, TB, HALO = geom['Wp'], geom['TH'], geom['TB'], geom['HALO']
    n_tiles, Hp, W = geom['n_tiles'], geom['Hp'], geom['W']
    m = geom['t_mult']
    d = dilation
    offs = tuple((ky - 1) * d * Wp + (kx - 1) * d
                 for ky in range(3) for kx in range(3))
    kern = functools.partial(_conv3x3_kernel, offs=offs, apron=geom['apron'],
                             th=TH, wp=Wp, left=geom['left'], w_out=W)
    est = (2 * TB * Cin * 2 + 2 * HALO * Cin * 2 + w9.size * 2
           + TB * 9 * Cin * 2 + TB * Cout * 4 + 2 * TH * W * Cout * 2)
    out = pl.pallas_call(
        kern,
        out_shape=jax.ShapeDtypeStruct((B, Hp, W, Cout), jnp.bfloat16),
        grid=(B, n_tiles),
        in_specs=[
            pl.BlockSpec((1, TB, Cin), lambda b, i: (b, i, 0)),
            pl.BlockSpec((1, HALO, Cin), lambda b, i, _m=m: (b, (i + 1) * _m, 0)),
            pl.BlockSpec((9 * Cin, Cout), lambda b, i: (0, 0)),
            pl.BlockSpec((1, Cout), lambda b, i: (0, 0)),
            pl.BlockSpec(memory_space=pltpu.MemorySpace.SMEM),
        ],
        out_specs=pl.BlockSpec((1, TH, W, Cout), lambda b, i: (b, i, 0, 0)),
        compiler_params=_compiler_params(("parallel", "parallel"), est),
    )(xp, xp, w9, shift.reshape(1, Cout).astype(jnp.float32),
      jnp.asarray(alpha, jnp.float32).reshape(1))
    return out[:, :geom['H']]                       # (B, H, W, Cout)


# -----------------------------------------------------------------------------
# Hoisted QKV projection (once per image) + query-row-tiled self-attention
# -----------------------------------------------------------------------------
def _qkv_kernel(f_ref, wq_ref, wk_ref, wv_ref, bq_ref, bk_ref, bv_ref,
                q_ref, k_ref, v_ref):
    f = f_ref[0]                                              # (tm, C) bf16
    q_ref[0] = (jnp.dot(f, wq_ref[...], preferred_element_type=jnp.float32)
                + bq_ref[...]).astype(q_ref.dtype)
    k_ref[0] = (jnp.dot(f, wk_ref[...], preferred_element_type=jnp.float32)
                + bk_ref[...]).astype(k_ref.dtype)
    v_ref[0] = (jnp.dot(f, wv_ref[...], preferred_element_type=jnp.float32)
                + bv_ref[...]).astype(v_ref.dtype)


def qkv_project(feat, wq, bq, wk, bk, wv, bv, tm=128):
    """feat: (B, HWp, C) bf16 -> q, k: (B, HWp, cqp) f32, v: (B, HWp, C) bf16."""
    B, HWp, C = feat.shape
    cqp = wq.shape[1]
    est = (2 * tm * C * 2 + 4 * C * cqp * 2 + C * C * 2
           + 4 * tm * cqp * 4 + 2 * tm * C * 2)
    return pl.pallas_call(
        _qkv_kernel,
        out_shape=(jax.ShapeDtypeStruct((B, HWp, cqp), jnp.float32),
                   jax.ShapeDtypeStruct((B, HWp, cqp), jnp.float32),
                   jax.ShapeDtypeStruct((B, HWp, C), jnp.bfloat16)),
        grid=(B, HWp // tm),
        in_specs=[
            pl.BlockSpec((1, tm, C), lambda b, i: (b, i, 0)),
            pl.BlockSpec((C, cqp), lambda b, i: (0, 0)),
            pl.BlockSpec((C, cqp), lambda b, i: (0, 0)),
            pl.BlockSpec((C, C), lambda b, i: (0, 0)),
            pl.BlockSpec((1, cqp), lambda b, i: (0, 0)),
            pl.BlockSpec((1, cqp), lambda b, i: (0, 0)),
            pl.BlockSpec((1, C), lambda b, i: (0, 0)),
        ],
        out_specs=[pl.BlockSpec((1, tm, cqp), lambda b, i: (b, i, 0)),
                   pl.BlockSpec((1, tm, cqp), lambda b, i: (b, i, 0)),
                   pl.BlockSpec((1, tm, C), lambda b, i: (b, i, 0))],
        compiler_params=_compiler_params(("parallel", "parallel"), est),
    )(feat, wq, wk, wv, bq.reshape(1, cqp).astype(jnp.float32),
      bk.reshape(1, cqp).astype(jnp.float32),
      bv.reshape(1, C).astype(jnp.float32))


def _attention_kernel(q_ref, k_ref, v_ref, f_ref, gamma_ref, o_ref, *, hw_valid):
    q = q_ref[0]                                              # (tq, cqp) f32
    k = k_ref[0]                                              # (HWp, cqp) f32
    e = lax.dot_general(q, k, (((1,), (1,)), ((), ())),
                        preferred_element_type=jnp.float32)   # (tq, HWp)
    if hw_valid < k.shape[0]:                                 # mask padded keys
        kid = lax.broadcasted_iota(jnp.int32, e.shape, 1)
        e = jnp.where(kid < hw_valid, e, -jnp.inf)
    e = e - jnp.max(e, axis=-1, keepdims=True)
    p = jnp.exp(e)
    p = p * pl.reciprocal(jnp.sum(p, axis=-1, keepdims=True), approx=True)
    o = jnp.dot(p.astype(jnp.bfloat16), v_ref[0],
                preferred_element_type=jnp.float32)           # (tq, C)
    o_ref[0] = (gamma_ref[0] * o
                + f_ref[0].astype(jnp.float32)).astype(o_ref.dtype)
    # TODO(synk): for HW >= ~2k add KV-axis (flash-style) tiling so the
    # (tq, HW) score tile and the resident K/V blocks stay bounded on v7x.


def spatial_self_attention(q, k, v, feat, gamma, hw_valid, tq=128):
    """out = gamma * softmax(q k^T) v + feat, tiled over query rows."""
    B, HWp, C = feat.shape
    cqp = q.shape[-1]
    kern = functools.partial(_attention_kernel, hw_valid=hw_valid)
    est = (2 * tq * cqp * 4 + 2 * HWp * cqp * 4 + 2 * HWp * C * 2
           + 2 * tq * C * 2 + tq * HWp * 4 + 2 * tq * C * 2)
    return pl.pallas_call(
        kern,
        out_shape=jax.ShapeDtypeStruct((B, HWp, C), jnp.bfloat16),
        grid=(B, HWp // tq),
        in_specs=[
            pl.BlockSpec((1, tq, cqp), lambda b, i: (b, i, 0)),
            pl.BlockSpec((1, HWp, cqp), lambda b, i: (b, 0, 0)),
            pl.BlockSpec((1, HWp, C), lambda b, i: (b, 0, 0)),
            pl.BlockSpec((1, tq, C), lambda b, i: (b, i, 0)),
            pl.BlockSpec(memory_space=pltpu.MemorySpace.SMEM),
        ],
        out_specs=pl.BlockSpec((1, tq, C), lambda b, i: (b, i, 0)),
        compiler_params=_compiler_params(("parallel", "parallel"), est),
    )(q, k, v, feat, jnp.asarray(gamma, jnp.float32).reshape(1))


# -----------------------------------------------------------------------------
# Fuse: 5-way concat folded into the matmul against the column-split weight
# -----------------------------------------------------------------------------
def _fuse_kernel(c1_ref, o2_ref, o3_ref, o4_ref, c5_ref, w_ref, shift_ref,
                 alpha_ref, o_ref):
    acc = jnp.dot(c1_ref[0], w_ref[0], preferred_element_type=jnp.float32)
    acc = acc + jnp.dot(o2_ref[0], w_ref[1], preferred_element_type=jnp.float32)
    acc = acc + jnp.dot(o3_ref[0], w_ref[2], preferred_element_type=jnp.float32)
    acc = acc + jnp.dot(o4_ref[0], w_ref[3], preferred_element_type=jnp.float32)
    # conv5 is a single pooled row per batch -> (1, N), broadcast over the tile
    c5 = jnp.dot(c5_ref[0], w_ref[4], preferred_element_type=jnp.float32)
    y = acc + c5 + shift_ref[...]
    a = alpha_ref[0]
    o_ref[0] = jnp.where(y >= 0.0, y, a * y).astype(o_ref.dtype)


def fuse_concat_linear_prelu(c1, o2, o3, o4, c5, wstack, shift, alpha, tm=128):
    """Fused `fuse(cat(conv1, out2, out3, out4, broadcast(conv5)))`."""
    B, HWp, dd = c1.shape
    N = wstack.shape[-1]
    est = (8 * tm * dd * 2 + 2 * dd * 2 + wstack.size * 2
           + 2 * tm * N * 4 + tm * N * 4)
    return pl.pallas_call(
        _fuse_kernel,
        out_shape=jax.ShapeDtypeStruct((B, HWp, N), jnp.float32),
        grid=(B, HWp // tm),
        in_specs=[
            pl.BlockSpec((1, tm, dd), lambda b, i: (b, i, 0)),
            pl.BlockSpec((1, tm, dd), lambda b, i: (b, i, 0)),
            pl.BlockSpec((1, tm, dd), lambda b, i: (b, i, 0)),
            pl.BlockSpec((1, tm, dd), lambda b, i: (b, i, 0)),
            pl.BlockSpec((1, 1, dd), lambda b, i: (b, 0, 0)),
            pl.BlockSpec((5, dd, N), lambda b, i: (0, 0, 0)),
            pl.BlockSpec((1, N), lambda b, i: (0, 0)),
            pl.BlockSpec(memory_space=pltpu.MemorySpace.SMEM),
        ],
        out_specs=pl.BlockSpec((1, tm, N), lambda b, i: (b, i, 0)),
        compiler_params=_compiler_params(("parallel", "parallel"), est),
    )(c1, o2, o3, o4, c5.reshape(B, 1, dd), wstack,
      shift.reshape(1, N).astype(jnp.float32),
      jnp.asarray(alpha, jnp.float32).reshape(1))


# -----------------------------------------------------------------------------
# Host-side parameter folding (bias + BN -> weight/shift), bf16 casting
# -----------------------------------------------------------------------------
def fold_conv3x3(P, name):
    w, b = P[name + '_w'], P[name + '_b']            # (Cout, Cin, 3, 3)
    scale, shift0 = P[name + '_bn_scale'], P[name + '_bn_shift']
    cout, cin = w.shape[0], w.shape[1]
    wt = jnp.transpose(w, (2, 3, 1, 0)).reshape(9 * cin, cout)   # (tap,ci)->row
    wt = (wt * scale[None, :]).astype(jnp.bfloat16)
    return wt, (b * scale + shift0).astype(jnp.float32)


def fold_conv1x1(P, name, use_bn=True):
    w = P[name + '_w'][:, :, 0, 0].T                 # (Cin, Cout)
    b = P[name + '_b']
    if use_bn:
        scale, shift0 = P[name + '_bn_scale'], P[name + '_bn_shift']
    else:
        scale, shift0 = jnp.ones_like(b), jnp.zeros_like(b)
    wm = (w * scale[None, :]).astype(jnp.bfloat16)
    return wm, (b * scale + shift0).astype(jnp.float32)


def fold_qkv(P, i):
    wq0 = P[f'q{i}_w'][:, :, 0, 0].T                 # (C, cq)
    wk0 = P[f'k{i}_w'][:, :, 0, 0].T
    wv0 = P[f'v{i}_w'][:, :, 0, 0].T                 # (C, C)
    C, cq = wq0.shape
    cqp = _round_up(cq, 128)                         # lane-dense q/k
    wq = jnp.zeros((C, cqp), jnp.float32).at[:, :cq].set(wq0)
    wk = jnp.zeros((C, cqp), jnp.float32).at[:, :cq].set(wk0)
    bq = jnp.zeros((cqp,), jnp.float32).at[:cq].set(P[f'q{i}_b'])
    bk = jnp.zeros((cqp,), jnp.float32).at[:cq].set(P[f'k{i}_b'])
    return (wq.astype(jnp.bfloat16), bq, wk.astype(jnp.bfloat16), bk,
            wv0.astype(jnp.bfloat16), P[f'v{i}_b'].astype(jnp.float32))


def fold_fuse(P, dd):
    w = P['fuse_w'][:, :, 0, 0].T                    # (5*dd, in_dim)
    scale, shift0 = P['fuse_bn_scale'], P['fuse_bn_shift']
    w = (w * scale[None, :]).astype(jnp.bfloat16)
    wstack = w.reshape(5, dd, -1)                    # [conv1, out2, out3, out4, conv5]
    shift = (P['fuse_b'] * scale + shift0).astype(jnp.float32)
    return wstack, shift


# -----------------------------------------------------------------------------
# Full forward
# -----------------------------------------------------------------------------
def afem_forward_pallas(x_nchw, P):
    B, _, H, W = x_nchw.shape
    HW = H * W
    HWp = _round_up(HW, 128)
    x = jnp.transpose(x_nchw, (0, 2, 3, 1))                     # NHWC f32

    # down_conv (3x3, d=1) — its own bf16 aproned activation
    w_down, s_down = fold_conv3x3(P, 'down')
    xp_d, g_d = _prep_conv_input(x, 1)
    xd = conv3x3_bn_prelu(xp_d, g_d, w_down, s_down, P['down_prelu'], 1)
    in_dim = xd.shape[-1]
    dd = in_dim // 2
    xd_flat = xd.reshape(B, HW, in_dim)
    xd_flat_p = _pad_rows(xd_flat, HWp)

    # conv1 (1x1 + BN + PReLU)
    w1, s1 = fold_conv1x1(P, 'conv1')
    conv1 = linear_prelu(xd_flat_p.reshape(B * HWp, in_dim), w1, s1,
                         P['conv1_prelu']).reshape(B, HWp, dd)

    # one max-apron (d=6) bf16 activation reused by the d=2/4/6 branches
    xp_b, g_b = _prep_conv_input(xd, 6)

    def attn_branch(d, cname, i, gamma):
        wc, sc = fold_conv3x3(P, cname)
        feat = conv3x3_bn_prelu(xp_b, g_b, wc, sc, P[cname + '_prelu'], d)
        feat = _pad_rows(feat.reshape(B, HW, dd), HWp)           # (B,HWp,dd)
        wq, bq, wk, bk, wv, bv = fold_qkv(P, i)
        q, k, v = qkv_project(feat, wq, bq, wk, bk, wv, bv)      # hoisted QKV
        return spatial_self_attention(q, k, v, feat, gamma, HW)

    out2 = attn_branch(2, 'conv2', 2, P['gamma2'])
    out3 = attn_branch(4, 'conv3', 3, P['gamma3'])
    out4 = attn_branch(6, 'conv4', 4, P['gamma4'])

    # conv5: global avg pool -> 1x1 conv + PReLU (no BN); the bilinear upsample
    # of a 1x1 map == broadcast, which is folded into the fuse kernel.
    pooled = jnp.mean(xd_flat.astype(jnp.float32), axis=1)       # (B, in_dim)
    w5, s5 = fold_conv1x1(P, 'conv5', use_bn=False)
    c5 = linear_prelu(pooled.astype(jnp.bfloat16), w5, s5, P['conv5_prelu'])

    # fuse: concat fused into the matmul (column-split weight)
    wf_stack, sf = fold_fuse(P, dd)
    fused = fuse_concat_linear_prelu(conv1, out2, out3, out4, c5,
                                     wf_stack, sf, P['fuse_prelu'])
    fused = fused[:, :HW].reshape(B, H, W, in_dim)
    return jnp.transpose(fused, (0, 3, 1, 2))                    # NCHW f32


# -----------------------------------------------------------------------------
# Deterministic parameter construction (PyTorch shapes)
# -----------------------------------------------------------------------------
def make_params(key, dim, in_dim):
    down_dim = in_dim // 2
    cq = down_dim // 8
    keys = iter(jax.random.split(key, 64))
    P = {}

    def conv_w(cout, cin, k):
        fan = cin * k * k
        return (jax.random.normal(next(keys), (cout, cin, k, k), jnp.float32)
                / np.sqrt(fan))

    def bias(cout):
        return 0.05 * jax.random.normal(next(keys), (cout,), jnp.float32)

    def bn_fold(cout):
        g = 1.0 + 0.1 * jax.random.normal(next(keys), (cout,), jnp.float32)
        b = 0.05 * jax.random.normal(next(keys), (cout,), jnp.float32)
        mean = 0.05 * jax.random.normal(next(keys), (cout,), jnp.float32)
        var = 0.9 + 0.2 * jax.random.uniform(next(keys), (cout,), jnp.float32)
        scale = g / jnp.sqrt(var + 1e-5)
        shift = b - mean * scale
        return scale, shift

    def conv_bn_prelu(name, cout, cin, k):
        P[name + '_w'] = conv_w(cout, cin, k)
        P[name + '_b'] = bias(cout)
        P[name + '_bn_scale'], P[name + '_bn_shift'] = bn_fold(cout)
        P[name + '_prelu'] = 0.25

    conv_bn_prelu('down', in_dim, dim, 3)
    conv_bn_prelu('conv1', down_dim, in_dim, 1)
    for i, name in ((2, 'conv2'), (3, 'conv3'), (4, 'conv4')):
        conv_bn_prelu(name, down_dim, in_dim, 3)
        for tag, cout in (('q', cq), ('k', cq), ('v', down_dim)):
            P[f'{tag}{i}_w'] = conv_w(cout, down_dim, 1)
            P[f'{tag}{i}_b'] = bias(cout)
    # nn.Module inits gammas to 0; use small non-zero so attention contributes.
    P['gamma2'], P['gamma3'], P['gamma4'] = 0.1, 0.2, 0.3
    P['conv5_w'] = conv_w(down_dim, in_dim, 1)
    P['conv5_b'] = bias(down_dim)
    P['conv5_prelu'] = 0.25
    conv_bn_prelu('fuse', in_dim, 5 * down_dim, 1)
    return P


# -----------------------------------------------------------------------------
# Pure-JAX f32 reference (NCHW, mirrors the PyTorch forward) for validation
# -----------------------------------------------------------------------------
def afem_forward_ref(x, P):
    def conv(x, w, b, dilation=1, padding=0):
        y = jax.lax.conv_general_dilated(
            x, w, (1, 1), ((padding, padding), (padding, padding)),
            rhs_dilation=(dilation, dilation),
            dimension_numbers=('NCHW', 'OIHW', 'NCHW'))
        return y + b[None, :, None, None]

    def prelu(x, a):
        return jnp.where(x >= 0, x, a * x)

    def cbp(x, name, dilation, padding):
        y = conv(x, P[name + '_w'], P[name + '_b'], dilation, padding)
        y = (y * P[name + '_bn_scale'][None, :, None, None]
             + P[name + '_bn_shift'][None, :, None, None])
        return prelu(y, P[name + '_prelu'])

    def attn(cf, qn, kn, vn, gamma):
        B, C, H, W = cf.shape
        N = H * W
        q = conv(cf, P[qn + '_w'], P[qn + '_b']).reshape(B, -1, N)
        k = conv(cf, P[kn + '_w'], P[kn + '_b']).reshape(B, -1, N)
        v = conv(cf, P[vn + '_w'], P[vn + '_b']).reshape(B, -1, N)
        energy = jnp.einsum('bci,bcj->bij', q, k)
        att = jax.nn.softmax(energy, axis=-1)
        out = jnp.einsum('bcj,bij->bci', v, att).reshape(B, C, H, W)
        return gamma * out + cf

    xd = cbp(x, 'down', 1, 1)
    conv1 = cbp(xd, 'conv1', 1, 0)
    out2 = attn(cbp(xd, 'conv2', 2, 2), 'q2', 'k2', 'v2', P['gamma2'])
    out3 = attn(cbp(xd, 'conv3', 4, 4), 'q3', 'k3', 'v3', P['gamma3'])
    out4 = attn(cbp(xd, 'conv4', 6, 6), 'q4', 'k4', 'v4', P['gamma4'])
    pooled = jnp.mean(xd, axis=(2, 3), keepdims=True)
    c5 = prelu(conv(pooled, P['conv5_w'], P['conv5_b']), P['conv5_prelu'])
    conv5 = jnp.broadcast_to(c5, (c5.shape[0], c5.shape[1],
                                  xd.shape[2], xd.shape[3]))
    cat = jnp.concatenate([conv1, out2, out3, out4, conv5], axis=1)
    return cbp(cat, 'fuse', 1, 0)


# -----------------------------------------------------------------------------
if __name__ == "__main__":
    dim, in_dim = 4, 32          # down_dim = 16, q/k dim = 2
    B, H, W = 2, 16, 16
    key = jax.random.PRNGKey(0)
    kx, kp = jax.random.split(key)
    # round the input to bf16-representable values so the bf16 kernel path and
    # the f32 reference start from identical data
    x = jax.random.normal(kx, (B, dim, H, W), jnp.float32)
    x = x.astype(jnp.bfloat16).astype(jnp.float32)
    P = make_params(kp, dim, in_dim)

    out = afem_forward_pallas(x, P)
    out = jax.block_until_ready(out)
    assert out.shape == (B, in_dim, H, W)

    ref = afem_forward_ref(x, P)
    # kernels compute in bf16 with f32 accumulation -> looser tolerance vs f32
    np.testing.assert_allclose(np.asarray(out), np.asarray(ref),
                               rtol=4e-2, atol=4e-2)
    print("KERNEL_OK")
</pallas_src>

<mosaic_0001>
module attributes {stable_mosaic.version = 11 : i64} {
  func.func @_conv3x3_kernel(%arg0: i32, %arg1: i32, %arg2: memref<1x432x4xbf16, #tpu.memory_space<vmem>>, %arg3: memref<1x72x4xbf16, #tpu.memory_space<vmem>>, %arg4: memref<36x32xbf16, #tpu.memory_space<vmem>>, %arg5: memref<1x32xf32, #tpu.memory_space<vmem>>, %arg6: memref<1xf32, #tpu.memory_space<smem>>, %arg7: memref<1x18x16x32xbf16, #tpu.memory_space<vmem>>) attributes {dimension_semantics = [#tpu.dimension_semantics<parallel>, #tpu.dimension_semantics<parallel>], iteration_bounds = array<i64: 2, 1>, scalar_prefetch = 0 : i64, scratch_operands = 0 : i64, tpu.core_type = #tpu.core_type<tc>, window_params = [{transform_indices = @transform_0, window_bounds = array<i64: 1, 432, 4>}, {transform_indices = @transform_1, window_bounds = array<i64: 1, 72, 4>}, {pipeline_mode = #tpu.pipeline_mode<synchronous>, transform_indices = @transform_2, window_bounds = array<i64: 36, 32>}, {pipeline_mode = #tpu.pipeline_mode<synchronous>, transform_indices = @transform_3, window_bounds = array<i64: 1, 32>}, {transform_indices = @transform_4, window_bounds = array<i64: 1>}, {transform_indices = @transform_5, window_bounds = array<i64: 1, 18, 16, 32>}]} {
    %c0 = arith.constant 0 : index
    %c0_0 = arith.constant 0 : index
    %c0_1 = arith.constant 0 : index
    %0 = vector.load %arg2[%c0, %c0_0, %c0_1] : memref<1x432x4xbf16, #tpu.memory_space<vmem>>, vector<1x432x4xbf16>
    %1 = vector.shape_cast %0 : vector<1x432x4xbf16> to vector<432x4xbf16>
    %c0_2 = arith.constant 0 : index
    %c0_3 = arith.constant 0 : index
    %c0_4 = arith.constant 0 : index
    %2 = vector.load %arg3[%c0_2, %c0_3, %c0_4] : memref<1x72x4xbf16, #tpu.memory_space<vmem>>, vector<1x72x4xbf16>
    %3 = vector.shape_cast %2 : vector<1x72x4xbf16> to vector<72x4xbf16>
    %4 = vector.extract_strided_slice %1 {offsets = [1, 0], sizes = [431, 4], strides = [1, 1]} : vector<432x4xbf16> to vector<431x4xbf16>
    %5 = vector.extract_strided_slice %3 {offsets = [0, 0], sizes = [1, 4], strides = [1, 1]} : vector<72x4xbf16> to vector<1x4xbf16>
    %6 = tpu.concatenate %4, %5 in 0 : vector<431x4xbf16>, vector<1x4xbf16> -> vector<432x4xbf16>
    %7 = vector.extract_strided_slice %1 {offsets = [2, 0], sizes = [430, 4], strides = [1, 1]} : vector<432x4xbf16> to vector<430x4xbf16>
    %8 = vector.extract_strided_slice %3 {offsets = [0, 0], sizes = [2, 4], strides = [1, 1]} : vector<72x4xbf16> to vector<2x4xbf16>
    %9 = tpu.concatenate %7, %8 in 0 : vector<430x4xbf16>, vector<2x4xbf16> -> vector<432x4xbf16>
    %10 = vector.extract_strided_slice %1 {offsets = [24, 0], sizes = [408, 4], strides = [1, 1]} : vector<432x4xbf16> to vector<408x4xbf16>
    %11 = vector.extract_strided_slice %3 {offsets = [0, 0], sizes = [24, 4], strides = [1, 1]} : vector<72x4xbf16> to vector<24x4xbf16>
    %12 = tpu.concatenate %10, %11 in 0 : vector<408x4xbf16>, vector<24x4xbf16> -> vector<432x4xbf16>
    %13 = vector.extract_strided_slice %1 {offsets = [25, 0], sizes = [407, 4], strides = [1, 1]} : vector<432x4xbf16> to vector<407x4xbf16>
    %14 = vector.extract_strided_slice %3 {offsets = [0, 0], sizes = [25, 4], strides = [1, 1]} : vector<72x4xbf16> to vector<25x4xbf16>
    %15 = tpu.concatenate %13, %14 in 0 : vector<407x4xbf16>, vector<25x4xbf16> -> vector<432x4xbf16>
    %16 = vector.extract_strided_slice %1 {offsets = [26, 0], sizes = [406, 4], strides = [1, 1]} : vector<432x4xbf16> to vector<406x4xbf16>
    %17 = vector.extract_strided_slice %3 {offsets = [0, 0], sizes = [26, 4], strides = [1, 1]} : vector<72x4xbf16> to vector<26x4xbf16>
    %18 = tpu.concatenate %16, %17 in 0 : vector<406x4xbf16>, vector<26x4xbf16> -> vector<432x4xbf16>
    %19 = vector.extract_strided_slice %1 {offsets = [48, 0], sizes = [384, 4], strides = [1, 1]} : vector<432x4xbf16> to vector<384x4xbf16>
    %20 = vector.extract_strided_slice %3 {offsets = [0, 0], sizes = [48, 4], strides = [1, 1]} : vector<72x4xbf16> to vector<48x4xbf16>
    %21 = tpu.concatenate %19, %20 in 0 : vector<384x4xbf16>, vector<48x4xbf16> -> vector<432x4xbf16>
    %22 = vector.extract_strided_slice %1 {offsets = [49, 0], sizes = [383, 4], strides = [1, 1]} : vector<432x4xbf16> to vector<383x4xbf16>
    %23 = vector.extract_strided_slice %3 {offsets = [0, 0], sizes = [49, 4], strides = [1, 1]} : vector<72x4xbf16> to vector<49x4xbf16>
    %24 = tpu.concatenate %22, %23 in 0 : vector<383x4xbf16>, vector<49x4xbf16> -> vector<432x4xbf16>
    %25 = vector.extract_strided_slice %1 {offsets = [50, 0], sizes = [382, 4], strides = [1, 1]} : vector<432x4xbf16> to vector<382x4xbf16>
    %26 = vector.extract_strided_slice %3 {offsets = [0, 0], sizes = [50, 4], strides = [1, 1]} : vector<72x4xbf16> to vector<50x4xbf16>
    %27 = tpu.concatenate %25, %26 in 0 : vector<382x4xbf16>, vector<50x4xbf16> -> vector<432x4xbf16>
    %28 = tpu.concatenate %1, %6, %9, %12, %15, %18, %21, %24, %27 in 1 : vector<432x4xbf16>, vector<432x4xbf16>, vector<432x4xbf16>, vector<432x4xbf16>, vector<432x4xbf16>, vector<432x4xbf16>, vector<432x4xbf16>, vector<432x4xbf16>, vector<432x4xbf16> -> vector<432x36xbf16>
    %c0_5 = arith.constant 0 : index
    %c0_6 = arith.constant 0 : index
    %29 = vector.load %arg4[%c0_5, %c0_6] : memref<36x32xbf16, #tpu.memory_space<vmem>>, vector<36x32xbf16>
    %cst = arith.constant dense<0.000000e+00> : vector<432x32xf32>
    %30 = tpu.matmul %28, %29, %cst {dimension_numbers = #tpu.dot_dimension_numbers<[1], [0], [0], [1], [0, 0, 1, 1], [], []>} : vector<432x36xbf16>, vector<36x32xbf16>, vector<432x32xf32> -> vector<432x32xf32>
    %c0_7 = arith.constant 0 : index
    %c0_8 = arith.constant 0 : index
    %31 = vector.load %arg5[%c0_7, %c0_8] : memref<1x32xf32, #tpu.memory_space<vmem>>, vector<1x32xf32>
    %32 = vector.broadcast %31 : vector<1x32xf32> to vector<432x32xf32>
    %33 = arith.addf %30, %32 : vector<432x32xf32>
    %c0_9 = arith.constant 0 : index
    %34 = memref.load %arg6[%c0_9] : memref<1xf32, #tpu.memory_space<smem>>
    %cst_10 = arith.constant 0.000000e+00 : f32
    %35 = vector.broadcast %cst_10 : f32 to vector<432x32xf32>
    %36 = arith.cmpf oge, %33, %35 : vector<432x32xf32>
    %37 = vector.broadcast %34 : f32 to vector<432x32xf32>
    %38 = arith.mulf %37, %33 : vector<432x32xf32>
    %39 = arith.select %36, %33, %38 : vector<432x32xi1>, vector<432x32xf32>
    %40 = vector.shape_cast %39 : vector<432x32xf32> to vector<18x24x32xf32>
    %41 = vector.extract_strided_slice %40 {offsets = [0, 1, 0], sizes = [18, 16, 32], strides = [1, 1, 1]} : vector<18x24x32xf32> to vector<18x16x32xf32>
    %42 = arith.truncf %41 : vector<18x16x32xf32> to vector<18x16x32xbf16>
    %c0_11 = arith.constant 0 : index
    %c0_12 = arith.constant 0 : index
    %c0_13 = arith.constant 0 : index
    %c0_14 = arith.constant 0 : index
    %43 = vector.load %arg7[%c0_11, %c0_12, %c0_13, %c0_14] : memref<1x18x16x32xbf16, #tpu.memory_space<vmem>>, vector<1x18x16x32xbf16>
    %44 = vector.shape_cast %43 : vector<1x18x16x32xbf16> to vector<18x16x32xbf16>
    %45 = vector.shape_cast %42 : vector<18x16x32xbf16> to vector<1x18x16x32xbf16>
    tpu.vector_store %arg7[%c0_11, %c0_12, %c0_13, %c0_14], %45 {strides = array<i32>} : memref<1x18x16x32xbf16, #tpu.memory_space<vmem>>, vector<1x18x16x32xbf16>,
    return
  }
  func.func @transform_0(%arg0: i32, %arg1: i32) -> (i32, i32, i32) {
    %c0_i32 = arith.constant 0 : i32
    %c0_i32_0 = arith.constant 0 : i32
    return %arg0, %arg1, %c0_i32 : i32, i32, i32
  }
  func.func @transform_1(%arg0: i32, %arg1: i32) -> (i32, i32, i32) {
    %c1_i32 = arith.constant 1 : i32
    %0 = arith.addi %arg1, %c1_i32 : i32
    %c6_i32 = arith.constant 6 : i32
    %1 = arith.muli %0, %c6_i32 : i32
    %c0_i32 = arith.constant 0 : i32
    %c0_i32_0 = arith.constant 0 : i32
    return %arg0, %1, %c0_i32 : i32, i32, i32
  }
  func.func @transform_2(%arg0: i32, %arg1: i32) -> (i32, i32) {
    %c0_i32 = arith.constant 0 : i32
    %c0_i32_0 = arith.constant 0 : i32
    %c0_i32_1 = arith.constant 0 : i32
    return %c0_i32, %c0_i32_0 : i32, i32
  }
  func.func @transform_3(%arg0: i32, %arg1: i32) -> (i32, i32) {
    %c0_i32 = arith.constant 0 : i32
    %c0_i32_0 = arith.constant 0 : i32
    %c0_i32_1 = arith.constant 0 : i32
    return %c0_i32, %c0_i32_0 : i32, i32
  }
  func.func @transform_4(%arg0: i32, %arg1: i32) -> i32 {
    %c0_i32 = arith.constant 0 : i32
    %c0_i32_0 = arith.constant 0 : i32
    return %c0_i32 : i32
  }
  func.func @transform_5(%arg0: i32, %arg1: i32) -> (i32, i32, i32, i32) {
    %c0_i32 = arith.constant 0 : i32
    %c0_i32_0 = arith.constant 0 : i32
    %c0_i32_1 = arith.constant 0 : i32
    return %arg0, %arg1, %c0_i32, %c0_i32_0 : i32, i32, i32, i32
  }
}

</mosaic_0001>

<bundles_post_ra>
// kernel: tpu_custom_call.1
= control target key start
LH: loop header
LB: loop body
LE: loop exit
PB: predicated region body
PF: predicated region fallthrough
CT: control target
= control target key end

     0   :  { %s6228_s0 = inlined_call_operand.vmem [shape: bf16[2,864,4], index: 0, kind: input, shape index: {}]   ;;  %s6229_s1 = inlined_call_operand.vmem [shape: bf16[2,864,4], index: 1, kind: input, shape index: {}]   ;;  %s6230_s2 = inlined_call_operand.vmem [shape: bf16[36,32], index: 2, kind: input, shape index: {}]   ;;  %s6231_s3 = inlined_call_operand.vmem [shape: f32[1,32], index: 3, kind: input, shape index: {}]   ;;  %s6232_s4 = inlined_call_operand.<no memory space> [shape: f32[1], index: 4, kind: input, shape index: {}]   ;;  %s6233_s5 = inlined_call_operand.hbm [shape: bf16[2,18,16,32], index: 5, kind: output, shape index: {}]  }
   0x1   :  { %10 = sst [smem:[#allocation2]] %s6232_s4 }
   0x2   :  { %11 = vsyncpa [#allocation4], 0 }
   0x3   :  { %13 = vsyncpa [#allocation4 + $0x1], 0  ;;  %s3959_s20 = smov 0   ;;  %s3961_s21 = smov 0  }
   0x4   :  { %s3963_s22 = smov 0   ;;  %s3965_s23 = smov 0  }
   0x5   :  { %s3967_s24 = smov 0   ;;  %s3969_s25 = smov 0  }
   0x6 LB: > { %s3331_s4 = sadd.s32 4294967295, %s3912_s25   ;;  %s3332_s26 = sadd.s32 4294967294, %s3912_s25   ;;  %s3912_s25 = sphi %s3969_s25, %s19_s25   ;;  %s3908_s24 = sphi %s3967_s24, %s6383_s24   ;;  %s3904_s23 = sphi %s3965_s23, %s6382_s23   ;;  %s3900_s22 = sphi %s3963_s22, %s6381_s22   ;;  %s3896_s21 = sphi %s3961_s21, %s6380_s21   ;;  %s3892_s20 = sphi %s3959_s20, %s6379_s20  }
   0x7   : > { %s31_s27 = sadd.s32 1, %s3908_s24  ;;  %s163_s28 = sadd.s32 1, %s3900_s22 }
   0x8   : > { %p33_p0 = scmp.ge.s32.totalorder %s31_s27, 2  ;;  %p173_p1 = scmp.ne.s32.totalorder %s3900_s22, %s3896_s21 }
   0x9   : > { %p174_p2 = scmp.eq.s32.totalorder %s3331_s4, 1  ;;  %p179_p3 = scmp.ne.s32.totalorder %s3896_s21, %s3892_s20 }
   0xa   : > { %s6385_s27 = smov (%p33_p0, %s31_s27), 0  ;;  %p180_p5 = scmp.eq.s32.totalorder %s3332_s26, 1 }
   0xb   : > { %p3999_p4 = por %p174_p2, %p173_p1  ;;  %s158_s30 = ssub.s32 %s3908_s24, %s6385_s27 }
   0xc   : > { %p3335_p6 = scmp.ge.s32.totalorder %s3912_s25, 1  ;;  %p161_p7 = scmp.eq.s32.totalorder %s158_s30, 0 }
   0xd   : > { %p4006_p8 = por %p180_p5, %p179_p3  ;;  %p237_p9 = scmp.lt.s32.totalorder %s3912_s25, 3 }
   0xe   : > { %s4012_s7 = scalar_select %p161_p7, %s3900_s22, %s163_s28  }
   0xf   : > { %p238_p10 = pnand %p3335_p6, %p237_p9 }
  0x11   : > { %241 = sbr.rel (%p238_p10) target bundleno = 830 (0x33e), region = 40 }
  0x18   : > { %p281_p11 = scmp.lt.s32.totalorder %s3904_s23, 1  ;;  %vm502_vm0 = vsmask.f32 7424  ;;  %s3914_s13 = smov 4   ;;  %vm730_vm1 = vcmask 1046528   ;;  %vm2113_vm2 = vcmask 1041408  }
  0x19   : > { %s3915_s14 = smov 12   ;;  %s3916_s15 = smov 8   ;;  %vm6270_vm3 = vmmov 0   ;;  %vm1591_vm4 = vcmask 31744   ;;  %vm1646_vm5 = vcmask 64512   ;;  %vm1701_vm6 = vcmask 97280  }
  0x1a   : > { %s4016_s8 = scalar_select %p281_p11, %s3904_s23, 1  ;;  %vm1756_vm7 = vcmask 130048   ;;  %vm1811_vm8 = vcmask 162816   ;;  %vm1866_vm9 = vcmask 195584   ;;  %vm1921_vm10 = vcmask 228352  }
  0x1b   : > { %s3917_s16 = smov 20   ;;  %s3918_s17 = smov 16   ;;  %vm6274_vm11 = vcmask 261120   ;;  %vm6272_vm12 = vcmask 293888   ;;  %vm727_vm13 = vcmask 1047552   ;;  %vm820_vm15 = vcmask 1043456  }
  0x1c   : > { %s3692_s9 = smul.u32 432, %s4016_s8  ;;  %s3919_s18 = smov 28   ;;  %vm5398_vm14 = vmand %vm727_vm13, %vm502_vm0  ;;  %vm1034_vm13 = vsmask.f32 3328 }
  0x1d   : > { %s3920_s19 = smov 24   ;;  %s3921_s4 = smov 32  }
  0x1e   : > { %s4024_s12 = scalar_lea.vmem %s6228_s0, %s3692_s9  ;;  %s3486_s28 = sadd.s32 216, %s3692_s9 }
  0x1f   : > { %v4027_v0 = vld [vmem:[%s4024_s12 + $0x10] sm:$0xf]  ;;  %v4030_v1 = vld [vmem:[%s4024_s12 + $0x14] sm:$0xf]  ;;  %v4033_v2 = vld [vmem:[%s4024_s12 + $0x18] sm:$0xf]  ;;  %s4889_s11 = scalar_lea.vmem %s6229_s1, %s3486_s28 }
  0x20   : > { %v4036_v3 = vld [vmem:[%s4024_s12 + $0x1c] sm:$0xf]  ;;  %v4040_v4 = vcombine.low %v4027_v0, %v4030_v1  ;;  %v308_v6 = vld [vmem:[%s4024_s12 + $0x8] sm:$0xf]  ;;  %v4048_v7 = vld [vmem:[%s4024_s12 + $0xc] sm:$0xf] }
  0x21   : > { %v4044_v5 = vcombine.low %v4033_v2, %v4036_v3  ;;  %v4051_v8 = vld [vmem:[%s4024_s12] sm:$0xff]   ;;  %v4056_v11 = vcombine.low %v308_v6, %v4048_v7  ;;  %v4072_v18 = vld [vmem:[%s4024_s12 + $0x28] sm:$0xf]  ;;  %v4078_v23 = vld [vmem:[%s4024_s12 + $0x2c] sm:$0xf]  ;;  %s2366_s8 = sld [smem:[#allocation2]] }
  0x22   : > { %v519_v9 = vshll.u32 %v4040_v4, 16  ;;  %v523_v10 = vshrl.u32 %v4040_v4, 16  ;;  %v4059_v12 = vld [vmem:[%s4024_s12 + $0x20] sm:$0xf]  ;;  %v4062_v13 = vld [vmem:[%s4024_s12 + $0x24] sm:$0xf]  ;;  %v4086_v28 = vcombine.low %v4072_v18, %v4078_v23 }
  0x23   : > { %v527_v14 = vshll.u32 %v4044_v5, 16  ;;  %v504_v15 = vshrl.u32 %v4051_v8, 16  ;;  %v506_v16 = vshll.u32 %v4051_v8, 16  ;;  %v4069_v17 = vcombine.low %v4059_v12, %v4062_v13  ;;  %v4082_v27 = vld [vmem:[%s4024_s12 + $0x30] sm:$0xf] }
  0x24   : > { %v521_v19 = vrot.slane %v519_v9, 1  ;;  %v511_v20 = vshll.u32 %v4056_v11, 16  ;;  %v531_v21 = vshrl.u32 %v4044_v5, 16  ;;  %v515_v22 = vshrl.u32 %v4056_v11, 16  ;;  %v4089_v31 = vld [vmem:[%s4024_s12 + $0x34] sm:$0xf] }
  0x25   : > { %6277 = vst [vmem:[#allocation6_spill] sm:$0xff] %v4069_v17  ;;  %v529_v24 = vrot.slane %v527_v14, 1  ;;  %v508_v25 = vrot.slane %v506_v16, 1  ;;  %v535_v26 = vshll.u32 %v4069_v17, 16  ;;  %v539_v32 = vshrl.u32 %v4069_v17, 16 }
  0x26   : > { %v525_v29 = vor.u32 %v523_v10, %v521_v19  ;;  %v513_v30 = vrot.slane %v511_v20, 1  ;;  %v4093_v33 = vld [vmem:[%s4024_s12 + $0x38] sm:$0xf]  ;;  %v4097_v37 = vcombine.low %v4082_v27, %v4089_v31  ;;  %v4100_v38 = vld [vmem:[%s4024_s12 + $0x3c] sm:$0xf]  ;;  %v543_v42 = vshll.u32 %v4086_v28, 16 }
  0x27   : > { %v509_v34 = vor.u32 %v508_v25, %v504_v15  ;;  %v533_v35 = vor.u32 %v531_v21, %v529_v24  ;;  %v537_v36 = vrot.slane %v535_v26, 1  ;;  %v4103_v39 = vld [vmem:[%s4024_s12 + $0x40] sm:$0xf]  ;;  %v547_v43 = vshrl.u32 %v4086_v28, 16  ;;  %v4109_v44 = vld [vmem:[%s4024_s12 + $0x44] sm:$0xf] }
  0x28   : > { %6278 = vst [vmem:[#allocation7_spill] sm:$0xff] %v4097_v37  ;;  %v530_v40 = vsel %vm502_vm0, %v525_v29, %v529_v24  ;;  %v517_v41 = vor.u32 %v515_v22, %v513_v30  ;;  %v4112_v45 = vld [vmem:[%s4024_s12 + $0x48] sm:$0xf]  ;;  %v551_v48 = vshll.u32 %v4097_v37, 16  ;;  %v325_v50 = vld [vmem:[%s4024_s12 + $0x4c] sm:$0xf]  ;;  %v4126_v54 = vcombine.low %v4093_v33, %v4100_v38 }
  0x29   : > { %1157 = vrot.lane.b32.xlu1 %v530_v40, %s3914_s13  ;;  %v514_v46 = vsel %vm502_vm0, %v509_v34, %v513_v30  ;;  %v4117_v47 = vsel %vm502_vm0, %v533_v35, %v537_v36  ;;  %v541_v49 = vor.u32 %v539_v32, %v537_v36  ;;  %v326_v51 = vld [vmem:[%s4024_s12 + $0x50] sm:$0xf]  ;;  %v545_v53 = vrot.slane %v543_v42, 1  ;;  %v327_v56 = vld [vmem:[%s4024_s12 + $0x54] sm:$0xf] }
  0x2a   : > { %1153 = vrot.lane.b32.xlu0 %v514_v46, %s3914_s13  ;;  %v522_v52 = vsel %vm502_vm0, %v517_v41, %v521_v19  ;;  %6279 = vst [vmem:[#allocation8_spill] sm:$0xff] %v4126_v54  ;;  %v4130_v55 = vcombine.low %v4103_v39, %v4109_v44  ;;  %v553_v57 = vrot.slane %v551_v48, 1  ;;  %v555_v58 = vshrl.u32 %v4097_v37, 16  ;;  %v328_v61 = vld [vmem:[%s4024_s12 + $0x58] sm:$0xf] }
  0x2b   : > { %v4135_v59 = vcombine.low %v4112_v45, %v325_v50  ;;  %v4137_v60 = vcombine.low %v326_v51, %v327_v56  ;;  %v329_v62 = vld [vmem:[%s4024_s12 + $0x5c] sm:$0xf]  ;;  %v549_v63 = vor.u32 %v547_v43, %v545_v53  ;;  %v4142_v6 = vsel %vm502_vm0, %v541_v49, %v545_v53  ;;  %v330_v14 = vld [vmem:[%s4024_s12 + $0x60] sm:$0xf]  ;;  %v331_v15 = vld [vmem:[%s4024_s12 + $0x64] sm:$0xf] }
  0x2c   : > { %v559_v9 = vshll.u32 %v4126_v54, 16  ;;  %v563_v10 = vshrl.u32 %v4126_v54, 16  ;;  %v567_v16 = vshll.u32 %v4130_v55, 16  ;;  %v557_v19 = vor.u32 %v555_v58, %v553_v57  ;;  %v332_v35 = vld [vmem:[%s4024_s12 + $0x68] sm:$0xf] }
  0x2d   : > { %1159 = vrot.lane.b32.xlu1 %v4117_v47, %s3914_s13  ;;  %v575_v20 = vshll.u32 %v4135_v59, 16  ;;  %v579_v21 = vshrl.u32 %v4135_v59, 16  ;;  %v4155_v22 = vsel %vm502_vm0, %v549_v63, %v553_v57  ;;  %v583_v25 = vshll.u32 %v4137_v60, 16  ;;  %v333_v36 = vld [vmem:[%s4024_s12 + $0x6c] sm:$0xf] }
  0x2e   : > { %1155 = vrot.lane.b32.xlu0 %v522_v52, %s3914_s13  ;;  %v561_v24 = vrot.slane %v559_v9, 1  ;;  %v571_v26 = vshrl.u32 %v4130_v55, 16  ;;  %v569_v29 = vrot.slane %v567_v16, 1  ;;  %v4159_v32 = vcombine.low %v328_v61, %v329_v62  ;;  %v334_v41 = vld [vmem:[%s4024_s12 + $0x70] sm:$0xf] }
  0x2f   : > { %v577_v30 = vrot.slane %v575_v20, 1  ;;  %v4161_v34 = vcombine.low %v330_v14, %v331_v15  ;;  %v335_v42 = vld [vmem:[%s4024_s12 + $0x74] sm:$0xf]  ;;  %v585_v46 = vrot.slane %v583_v25, 1  ;;  %v4180_v53 = vcombine.low %v332_v35, %v333_v36  ;;  %v336_v56 = vld [vmem:[%s4024_s12 + $0x78] sm:$0xf] }
  0x30   : > { %v565_v40 = vor.u32 %v563_v10, %v561_v24  ;;  %v4170_v43 = vsel %vm502_vm0, %v557_v19, %v561_v24  ;;  %v591_v48 = vshll.u32 %v4159_v32, 16  ;;  %v595_v49 = vshrl.u32 %v4159_v32, 16  ;;  %v4184_v57 = vld [vmem:[%s4024_s12 + $0x7c] sm:$0xf]  ;;  %v4190_v9 = vld [vmem:[%s4024_s12 + $0x80] sm:$0xf] }
  0x31   : > { %6280 = vst [vmem:[#allocation9_spill] sm:$0xff] %v4161_v34  ;;  %1163 = vrot.lane.b32.xlu1 %v4155_v22, %s3914_s13  ;;  %v581_v51 = vor.u32 %v579_v21, %v577_v30  ;;  %v599_v52 = vshll.u32 %v4161_v34, 16  ;;  %6281 = vst [vmem:[#allocation10_spill] sm:$0xff] %v4180_v53  ;;  %v573_v58 = vor.u32 %v571_v26, %v569_v29  ;;  %v587_v62 = vshrl.u32 %v4137_v60, 16  ;;  %v4193_v10 = vld [vmem:[%s4024_s12 + $0x84] sm:$0xf] }
  0x32   : > { %1161 = vrot.lane.b32.xlu0 %v4142_v6, %s3914_s13  ;;  %v4177_v50 = vsel %vm502_vm0, %v565_v40, %v569_v29  ;;  %v593_v61 = vrot.slane %v591_v48, 1  ;;  %v4187_v63 = vcombine.low %v334_v41, %v335_v42  ;;  %v607_v14 = vshll.u32 %v4180_v53, 16 }
  0x33   : > { %v601_v16 = vrot.slane %v599_v52, 1  ;;  %v4200_v20 = vcombine.low %v336_v56, %v4184_v57  ;;  %v4205_v21 = vsel %vm502_vm0, %v581_v51, %v585_v46  ;;  %v611_v25 = vshrl.u32 %v4180_v53, 16 }
  0x34   : > { %v597_v15 = vor.u32 %v595_v49, %v593_v61  ;;  %v615_v19 = vshll.u32 %v4187_v63, 16  ;;  %v609_v24 = vrot.slane %v607_v14, 1  ;;  %v4210_v26 = vcombine.low %v4190_v9, %v4193_v10 }
  0x35   : > { %1167 = vrot.lane.b32.xlu1 %v4177_v50, %s3914_s13  ;;  %v4213_v29 = vsel %vm502_vm0, %v573_v58, %v577_v30  ;;  %v589_v35 = vor.u32 %v587_v62, %v585_v46  ;;  %v603_v36 = vshrl.u32 %v4161_v34, 16  ;;  %v623_v40 = vshll.u32 %v4200_v20, 16 }
  0x36   : > { %1165 = vrot.lane.b32.xlu0 %v4170_v43, %s3914_s13  ;;  %v4220_v41 = vsel %vm502_vm0, %v597_v15, %v601_v16  ;;  %v617_v42 = vrot.slane %v615_v19, 1  ;;  %v613_v48 = vor.u32 %v611_v25, %v609_v24  ;;  %v627_v30 = vshrl.u32 %v4200_v20, 16 }
  0x37   : > { %6282 = vst [vmem:[#allocation11_spill] sm:$0xff] %v4220_v41  ;;  %v625_v49 = vrot.slane %v623_v40, 1  ;;  %v631_v46 = vshll.u32 %v4210_v26, 16  ;;  %v4227_v51 = vsel %vm502_vm0, %v589_v35, %v593_v61  ;;  %v605_v52 = vor.u32 %v603_v36, %v601_v16 }
  0x38   : > { %v619_v56 = vshrl.u32 %v4187_v63, 16  ;;  %v3366_v58 = vcombine.low %v4048_v7, %v4027_v0  ;;  %v4237_v62 = vsel %vm502_vm0, %v613_v48, %v617_v42  ;;  %v4246_v19 = vcombine.low %v4030_v1, %v4033_v2 }
  0x39   : > { %1171 = vrot.lane.b32.xlu1 %v4205_v21, %s3914_s13  ;;  %6283 = vst [vmem:[#allocation12_spill] sm:$0xff] %v4237_v62  ;;  %v629_v14 = vor.u32 %v627_v30, %v625_v49  ;;  %v4239_v15 = vrot.slane %v631_v46, 1  ;;  %v4242_v61 = vsel %vm502_vm0, %v605_v52, %v609_v24  ;;  %v731_v25 = vrot.slane %v4051_v8, 1 }
  0x3a   : > { %1169 = vrot.lane.b32.xlu0 %v4213_v29, %s3914_s13  ;;  %6284 = vst [vmem:[#allocation13_spill] sm:$0xff] %v4242_v61  ;;  %v621_v16 = vor.u32 %v619_v56, %v617_v42  ;;  %v826_v0 = vshll.u32 %v3366_v58, 16  ;;  %v732_v24 = vrot.slane %v4056_v11, 1  ;;  %v824_v1 = vshrl.u32 %v3366_v58, 16 }
  0x3b   : > { %v4254_v7 = vsel %vm502_vm0, %v629_v14, %v4239_v15  ;;  %v831_v36 = vshll.u32 %v4246_v19, 16  ;;  %v1056_v40 = vrot.slane %v3366_v58, 1  ;;  %v6240_v42 = vrot.slane %v4246_v19, 1 }
  0x3c   : > { %6285 = vst [vmem:[#allocation14_spill] sm:$0xff] %v4254_v7  ;;  %v4259_v35 = vsel %vm502_vm0, %v621_v16, %v625_v49  ;;  %v828_v2 = vrot.slane %v826_v0, 1  ;;  %v733_v48 = vsel %vm730_vm1, %v731_v25, %v732_v24  ;;  %v4270_v49 = vcombine.low %v4062_v13, %v4072_v18 }
  0x3d   : > { %1175 = vrot.lane.b32.xlu1 %v4220_v41, %s3914_s13  ;;  %6286 = vst [vmem:[#allocation15_spill] sm:$0xff] %v4259_v35  ;;  %v833_v46 = vrot.slane %v831_v36, 1  ;;  %v1058_v52 = vsel %vm730_vm1, %v1056_v40, %v6240_v42  ;;  %v6235_v13 = vrot.slane %v4040_v4, 1  ;;  %v4284_v18 = vcombine.low %v4184_v57, %v4190_v9 }
  0x3e   : > { %1173 = vrot.lane.b32.xlu0 %v4227_v51, %s3914_s13  ;;  %v829_v30 = vor.u32 %v828_v2, %v824_v1  ;;  %v847_v14 = vshll.u32 %v4270_v49, 16  ;;  %v4292_v16 = vcombine.low %v4078_v23, %v4082_v27  ;;  %v6236_v0 = vrot.slane %v4044_v5, 1  ;;  %v340_v1 = vld [vmem:[%s4024_s12 + $0x88] sm:$0xf] }
  0x3f   : > { %6287 = vst [vmem:[#allocation16_spill] sm:$0xff] %v4284_v18  ;;  %v6237_v25 = vrot.slane %v4069_v17, 1  ;;  %v851_v36 = vshrl.u32 %v4270_v49, 16  ;;  %v6234_v57 = vrot.slane %v4270_v49, 1  ;;  %v6238_v23 = vrot.slane %v4187_v63, 1 }
  0x40   : > { %v834_v56 = vsel %vm502_vm0, %v829_v30, %v833_v46  ;;  %v4297_v2 = vrot.slane %v847_v14, 1  ;;  %v855_v9 = vshll.u32 %v4292_v16, 16  ;;  %v6239_v27 = vrot.slane %v4200_v20, 1 }
  0x41   : > { %1179 = vrot.lane.b32.xlu1 %v4237_v62, %s3914_s13  ;;  %v935_v30 = vshll.u32 %v4284_v18, 16  ;;  %v6291_v62 = vrot.slane %v4246_v19, 1  ;;  %v6297_v41 = vrot.slane %v4200_v20, 1 }
  0x42   : > { %1177 = vrot.lane.b32.xlu0 %v4242_v61, %s3914_s13  ;;  %v853_v40 = vor.u32 %v851_v36, %v4297_v2  ;;  %v4336_v36 = vcombine.low %v4089_v31, %v4093_v33  ;;  %v859_v33 = vshrl.u32 %v4292_v16, 16 }
  0x45   : > { %1183 = vrot.lane.b32.xlu1 %v4254_v7, %s3914_s13 }
  0x46   : > { %1181 = vrot.lane.b32.xlu0 %v4259_v35, %s3914_s13 }
  0x49   : > { %1263 = vrot.lane.b32.xlu1 %v3366_v58, %s3915_s14  ;;  %v4288_v58 = vcombine.low %v4036_v3, %v4059_v12  ;;  %v1063_v3 = vrot.slane %v4292_v16, 1  ;;  %v735_v12 = vsel %vm730_vm1, %v732_v24, %v6235_v13 }
  0x4a   : > { %1208 = vrot.lane.b32.xlu0 %v733_v48, %s3916_s15  ;;  %v4314_v48 = vcombine.low %v4193_v10, %v340_v1 }
  0x4b   : > { %v4320_v24 = vsel %vm730_vm1, %v6234_v57, %v1063_v3  ;;  %v839_v10 = vshll.u32 %v4288_v58, 16  ;;  %v939_v57 = vshrl.u32 %v4284_v18, 16 }
  0x4c   : > { %v943_v31 = vshll.u32 %v4314_v48, 16 }
  0x4d   : > { %1373 = vrot.lane.b32.xlu1 %v1058_v52, %s3917_s16  ;;  %v4327_v52 = vsel %vm730_vm1, %v6236_v0, %v6237_v25  ;;  %v4354_v0 = vrot.slane %v839_v10, 1  ;;  %v4357_v25 = vld [vmem:[%s4024_s12 + $0x8c] sm:$0xf] }
  0x4e   : > { %1318 = vrot.lane.b32.xlu0 %v834_v56, %s3918_s17  ;;  %v835_v56 = vshrl.u32 %v4246_v19, 16  ;;  %v4374_v10 = vcombine.low %v340_v1, %v4357_v25  ;;  %v3795_v1 = vld [vmem:[%s6230_s2 + $0x8] sm:$0xff]  }
  0x50   : > { %v837_v13 = vor.u32 %v835_v56, %v833_v46  ;;  %v4371_v56 = vrot.slane %v943_v31, 1 }
  0x51   : > { %1482 = vrot.lane.b32.xlu1 %v4117_v47, %s3919_s18  ;;  %v857_v47 = vrot.slane %v855_v9, 1  ;;  %v4344_v9 = vsel %vm730_vm1, %v6238_v23, %v6239_v27  ;;  %v1065_v23 = vrot.slane %v4336_v36, 1 }
  0x52   : > { %1427 = vrot.lane.b32.xlu0 %v4044_v5, %s3920_s19  ;;  %6288 = vst [vmem:[#allocation17_spill] sm:$0xff] %v4344_v9 }
  0x53   : > { %v4332_v14 = vsel %vm502_vm0, %v853_v40, %v857_v47  ;;  %v4349_v40 = vrot.slane %v935_v30, 1  ;;  %v3794_v30 = vld [vmem:[%s6230_s2] sm:$0xff]   ;;  %v861_v27 = vor.u32 %v859_v33, %v857_v47  ;;  %v4366_v7 = vsel %vm730_vm1, %v1063_v3, %v1065_v23 }
  0x54   : > { %v6249_v47 = vmov 0.0   ;;  %v842_v3 = vsel %vm502_vm0, %v837_v13, %v4354_v0 }
  0x55   : > { %1210 = vrot.lane.b32.xlu1 %v735_v12, %s3916_s15  ;;  %6289 = vst [vmem:[#allocation18_spill] sm:$0xff] %v4349_v40  ;;  %v863_v12 = vshll.u32 %v4336_v36, 16  ;;  %v941_v46 = vor.u32 %v939_v57, %v4349_v40  ;;  %3571 = vmatprep.subr.bf16.mxu0 %v6249_v47  ;;  %v3797_v57 = vld [vmem:[%s6230_s2 + $0x10] ss:$0 sps:$4 sm:$0x33]   ;;  %v6290_v40 = vrot.slane %v4288_v58, 1 }
  0x56   : > { %1537 = vrot.lane.b32.xlu0 %v4327_v52, %s3921_s4  ;;  %3572 = vmatpush3.bf16.msra.mxu0 %v3794_v30 }
  0x57   : > { %v865_v42 = vrot.slane %v863_v12, 1  ;;  %v342_v12 = vld [vmem:[%s4024_s12 + $0x90] sm:$0xf]  ;;  %3685 = vmatprep.subr.bf16.mxu1 %v6249_v47  ;;  %3573 = vmatprep.subr.bf16.mxu0 %v6249_v47  ;;  %v946_v31 = vsel %vm502_vm0, %v941_v46, %v4371_v56  ;;  %v1060_v13 = vsel %vm730_vm1, %v6291_v62, %v6290_v40  ;;  %v2115_v46 = vsel %vm2113_vm2, %v3797_v57, 0 }
  0x58   : > { %3688 = vmatpush3.bf16.msra.mxu1 %v3794_v30  ;;  %v639_v30 = vshll.u32 %v4374_v10, 16  ;;  %3577 = vmatprep.mubr.msk.bf16.mxu0 %vm6270_vm3, %v6249_v47  ;;  %v6293_v62 = vrot.slane %v4284_v18, 1 }
  0x59   : > { %1236 = vrot.lane.b32.xlu1 %v4344_v9, %s3916_s15  ;;  %v4377_v35 = vsel %vm502_vm0, %v861_v27, %v865_v42  ;;  %v4385_v9 = vld [vmem:[%s4024_s12 + $0x94] sm:$0xf]  ;;  %3686 = vmatprep.subr.bf16.mxu1 %v6249_v47  ;;  %v867_v27 = vshrl.u32 %v4336_v36, 16 }
  0x5a   : > { %1265 = vrot.lane.b32.xlu0 %v4246_v19, %s3915_s14  ;;  %v4404_v33 = vcombine.low %v342_v12, %v4385_v9  ;;  %3574 = vmatpush3.bf16.msra.mxu0 %v3795_v1  ;;  %v6292_v19 = vrot.slane %v4314_v48, 1 }
  0x5b   : > { %3575 = vmatprep.subr.bf16.mxu0 %v6249_v47  ;;  %v869_v57 = vor.u32 %v867_v27, %v865_v42  ;;  %3633 = vmatprep.mubr.msk.bf16.mxu1 %vm6270_vm3, %v6249_v47  ;;  %v740_v27 = vrot.slane %v4086_v28, 1 }
  0x5c   : > { %3689 = vmatpush3.bf16.msra.mxu1 %v3795_v1  ;;  %v1086_v40 = vsel %vm730_vm1, %v6293_v62, %v6292_v19  ;;  %v647_v1 = vshll.u32 %v4404_v33, 16  ;;  %v6294_v62 = vrot.slane %v4069_v17, 1 }
  0x5d   : > { %1291 = vrot.lane.b32.xlu1 %v4284_v18, %s3915_s14  ;;  %3687 = vmatprep.subr.bf16.mxu1 %v6249_v47  ;;  %v843_v18 = vshrl.u32 %v4288_v58, 16 }
  0x5e   : > { %1320 = vrot.lane.b32.xlu0 %v842_v3, %s3918_s17  ;;  %v4416_v3 = vcombine.low %v4100_v38, %v4103_v39  ;;  %v4430_v38 = vrot.slane %v639_v30, 1  ;;  %v643_v39 = vshrl.u32 %v4374_v10, 16  ;;  %3576 = vmatpush3.bf16.msra.mxu0 %v2115_v46  ;;  %v649_v42 = vrot.slane %v647_v1, 1 }
  0x60   : > { %v871_v61 = vshll.u32 %v4416_v3, 16  ;;  %v1067_v53 = vrot.slane %v4416_v3, 1  ;;  %3690 = vmatpush3.bf16.msra.mxu1 %v2115_v46  ;;  %v645_v30 = vor.u32 %v643_v39, %v4430_v38  ;;  %v766_v46 = vrot.slane %v4404_v33, 1 }
  0x61   : > { %1346 = vrot.lane.b32.xlu1 %v946_v31, %s3918_s17  ;;  %v4463_v39 = vcombine.low %v4109_v44, %v4112_v45  ;;  %v762_v44 = vrot.slane %v4210_v26, 1  ;;  %v6295_v45 = vrot.slane %v4044_v5, 1 }
  0x62   : > { %1375 = vrot.lane.b32.xlu0 %v1060_v13, %s3917_s16  ;;  %v873_v31 = vrot.slane %v871_v61, 1  ;;  %v4437_v19 = vsel %vm730_vm1, %v1065_v23, %v1067_v53  ;;  %v4452_v61 = vsel %vm502_vm0, %v645_v30, %v649_v42  ;;  %v6252_v23 = vrot.slane %v4374_v10, 1 }
  0x63   : > { %v879_v1 = vshll.u32 %v4463_v39, 16 }
  0x64   : > { %v4441_v13 = vsel %vm502_vm0, %v869_v57, %v873_v31  ;;  %v4470_v57 = vcombine.low %v4357_v25, %v342_v12  ;;  %v4477_v30 = vsel %vm730_vm1, %v6252_v23, %v766_v46 }
  0x65   : > { %1401 = vrot.lane.b32.xlu1 %v1086_v40, %s3917_s16  ;;  %v4459_v40 = vsel %vm730_vm1, %v6294_v62, %v740_v27  ;;  %v6296_v62 = vrot.slane %v4040_v4, 1  ;;  %v4486_v12 = vrot.slane %v879_v1, 1  ;;  %v845_v1 = vor.u32 %v843_v18, %v4354_v0  ;;  %v344_v18 = vld [vmem:[%s4024_s12 + $0x98] sm:$0xf]  ;;  %v4518_v0 = vld [vmem:[%s4024_s12 + $0x9c] sm:$0xf] }
  0x66   : > { %1429 = vrot.lane.b32.xlu0 %v4069_v17, %s3920_s19 }
  0x67   : > { %v737_v47 = vsel %vm730_vm1, %v6296_v62, %v6295_v45  ;;  %v4498_v45 = vsel %vm730_vm1, %v6297_v41, %v762_v44  ;;  %v6256_v62 = vrot.slane %v4463_v39, 1  ;;  %v850_v34 = vsel %vm502_vm0, %v845_v1, %v4297_v2 }
  0x68   : > { %6298 = vst [vmem:[#allocation19_spill] sm:$0xff] %v4498_v45  ;;  %v651_v1 = vshrl.u32 %v4404_v33, 16 }
  0x69   : > { %1455 = vrot.lane.b32.xlu1 %v4374_v10, %s3920_s19 }
  0x6a   : > { %1484 = vrot.lane.b32.xlu0 %v4142_v6, %s3919_s18  ;;  %v875_v6 = vshrl.u32 %v4416_v3, 16 }
  0x6c   : > { %v877_v25 = vor.u32 %v875_v6, %v873_v31  ;;  %v947_v31 = vshrl.u32 %v4314_v48, 16  ;;  %v951_v6 = vshll.u32 %v4470_v57, 16 }
  0x6d   : > { %1510 = vrot.lane.b32.xlu1 %v4452_v61, %s3919_s18 }
  0x6e   : > { %1539 = vrot.lane.b32.xlu0 %v4459_v40, %s3921_s4  ;;  %v4492_v23 = vsel %vm502_vm0, %v877_v25, %v4486_v12  ;;  %v949_v41 = vor.u32 %v947_v31, %v4371_v56  ;;  %v953_v25 = vrot.slane %v951_v6, 1  ;;  %v6300_v56 = vrot.slane %v4270_v49, 1 }
  0x6f   : > { %v6301_v31 = vrot.slane %v4288_v58, 1  ;;  %v6302_v6 = vrot.slane %v4314_v48, 1 }
  0x71   : > { %1565 = vrot.lane.b32.xlu1 %v4477_v30, %s3921_s4  ;;  %v1062_v2 = vsel %vm730_vm1, %v6301_v31, %v6300_v56  ;;  %v742_v56 = vrot.slane %v4097_v37, 1 }
  0x72   : > { %1212 = vrot.lane.b32.xlu0 %v737_v47, %s3916_s15  ;;  %v4509_v47 = vsel %vm730_vm1, %v1067_v53, %v6256_v62  ;;  %v954_v53 = vsel %vm502_vm0, %v949_v41, %v953_v25  ;;  %v1087_v62 = vrot.slane %v4470_v57, 1 }
  0x73   : > { %v4553_v31 = vsel %vm730_vm1, %v740_v27, %v742_v56 }
  0x75   : > { %1238 = vrot.lane.b32.xlu1 %v4498_v45, %s3916_s15  ;;  %v4526_v45 = vcombine.low %v344_v18, %v4518_v0 }
  0x76   : > { %1267 = vrot.lane.b32.xlu0 %v4288_v58, %s3915_s14  ;;  %v653_v58 = vor.u32 %v651_v1, %v649_v42 }
  0x77   : > { %6299 = vst [vmem:[#allocation20_spill] sm:$0xff] %v4526_v45  ;;  %v655_v41 = vshll.u32 %v4526_v45, 16 }
  0x79   : > { %1293 = vrot.lane.b32.xlu1 %v4314_v48, %s3915_s14  ;;  %v657_v17 = vrot.slane %v655_v41, 1 }
  0x7a   : > { %1322 = vrot.lane.b32.xlu0 %v850_v34, %s3918_s17  ;;  %v1088_v34 = vsel %vm730_vm1, %v6302_v6, %v1087_v62  ;;  %v4573_v6 = vcombine.low %v4385_v9, %v344_v18  ;;  %v4592_v18 = vld [vmem:[%s4024_s12 + $0xa4] sm:$0xf] }
  0x7b   : > { %v4549_v48 = vsel %vm502_vm0, %v653_v58, %v657_v17 }
  0x7d   : > { %1348 = vrot.lane.b32.xlu1 %v954_v53, %s3918_s17  ;;  %v768_v53 = vrot.slane %v4526_v45, 1 }
  0x7e   : > { %1377 = vrot.lane.b32.xlu0 %v1062_v2, %s3917_s16  ;;  %v635_v2 = vshrl.u32 %v4210_v26, 16 }
  0x7f   : > { %v4561_v42 = vsel %vm730_vm1, %v766_v46, %v768_v53 }
  0x81   : > { %1403 = vrot.lane.b32.xlu1 %v1088_v34, %s3917_s16  ;;  %v959_v34 = vshll.u32 %v4573_v6, 16 }
  0x82   : > { %1431 = vrot.lane.b32.xlu0 %v4086_v28, %s3920_s19 }
  0x85   : > { %1457 = vrot.lane.b32.xlu1 %v4404_v33, %s3920_s19 }
  0x86   : > { %1486 = vrot.lane.b32.xlu0 %v4155_v22, %s3919_s18  ;;  %v637_v22 = vor.u32 %v635_v2, %v4239_v15  ;;  %v6304_v15 = vrot.slane %v4374_v10, 1  ;;  %v659_v2 = vshrl.u32 %v4526_v45, 16 }
  0x88   : > { %v4570_v27 = vsel %vm502_vm0, %v637_v22, %v4430_v38  ;;  %v4582_v46 = vsel %vm730_vm1, %v762_v44, %v6304_v15  ;;  %v346_v38 = vld [vmem:[%s4024_s12 + $0xa0] sm:$0xf] }
  0x89   : > { %1512 = vrot.lane.b32.xlu1 %v4549_v48, %s3919_s18  ;;  %6303 = vst [vmem:[#allocation21_spill] sm:$0xff] %v4570_v27  ;;  %6305 = vst [vmem:[#allocation22_spill] sm:$0xff] %v4582_v46  ;;  %v4603_v41 = vcombine.low %v346_v38, %v4592_v18 }
  0x8a   : > { %1541 = vrot.lane.b32.xlu0 %v4553_v31, %s3921_s4 }
  0x8b   : > { %6306 = vst [vmem:[#allocation23_spill] sm:$0xff] %v4603_v41  ;;  %v663_v22 = vshll.u32 %v4603_v41, 16 }
  0x8d   : > { %1567 = vrot.lane.b32.xlu1 %v4561_v42, %s3921_s4 }
  0x8e   : > { %1214 = vrot.lane.b32.xlu0 %v4327_v52, %s3916_s15  ;;  %v955_v52 = vshrl.u32 %v4470_v57, 16 }
  0x90   : > { %v957_v9 = vor.u32 %v955_v52, %v953_v25 }
  0x91   : > { %1269 = vrot.lane.b32.xlu1 %v4270_v49, %s3915_s14  ;;  %v961_v49 = vrot.slane %v959_v34, 1 }
  0x92   : > { %1185 = vrot.lane.b32.xlu0 %v4570_v27, %s3914_s13  ;;  %v348_v27 = vld [vmem:[%s4024_s12 + $0xa8] sm:$0xf] }
  0x93   : > { %v962_v1 = vsel %vm502_vm0, %v957_v9, %v961_v49  ;;  %v661_v9 = vor.u32 %v659_v2, %v657_v17  ;;  %v4645_v17 = vcombine.low %v4518_v0, %v346_v38 }
  0x95   : > { %1324 = vrot.lane.b32.xlu1 %v4332_v14, %s3918_s17  ;;  %v1089_v14 = vrot.slane %v4573_v6, 1  ;;  %v967_v0 = vshll.u32 %v4645_v17, 16 }
  0x96   : > { %1240 = vrot.lane.b32.xlu0 %v4582_v46, %s3916_s15 }
  0x99   : > { %1379 = vrot.lane.b32.xlu1 %v4320_v24, %s3917_s16  ;;  %v6259_v24 = vrot.slane %v4126_v54, 1 }
  0x9a   : > { %1295 = vrot.lane.b32.xlu0 %v4470_v57, %s3915_s14  ;;  %v1090_v57 = vsel %vm730_vm1, %v1087_v62, %v1089_v14  ;;  %v665_v62 = vrot.slane %v663_v22, 1 }
  0x9b   : > { %v4598_v44 = vpop.permute.xlu1 %1157  ;;  %v4622_v52 = vsel %vm730_vm1, %v742_v56, %v6259_v24  ;;  %v6261_v56 = vrot.slane %v4603_v41, 1 }
  0x9c   : > { %v1154_v25 = vpop.permute.xlu0 %1153 }
  0x9d   : > { %1433 = vrot.lane.b32.xlu1 %v4097_v37, %s3920_s19  ;;  %v4652_v22 = vsel %vm730_vm1, %v768_v53, %v6261_v56  ;;  %v4670_v56 = vrot.slane %v967_v0, 1 }
  0x9e   : > { %1350 = vrot.lane.b32.xlu0 %v962_v1, %s3918_s17 }
  0x9f   : > { %v4609_v58 = vpop.permute.xlu1 %1159 }
  0xa0   : > { %v4614_v15 = vpop.permute.xlu0 %1155 }
  0xa1   : > { %1488 = vrot.lane.b32.xlu1 %v4170_v43, %s3919_s18 }
  0xa2   : > { %1405 = vrot.lane.b32.xlu0 %v1090_v57, %s3917_s16  ;;  %v4635_v57 = vsel %vm502_vm0, %v661_v9, %v665_v62 }
  0xa3   : > { %v4624_v34 = vpop.permute.xlu1 %1163 }
  0xa4   : > { %v4626_v1 = vpop.permute.xlu0 %1161 }
  0xa5   : > { %1543 = vrot.lane.b32.xlu1 %v4622_v52, %s3921_s4 }
  0xa6   : > { %1459 = vrot.lane.b32.xlu0 %v4526_v45, %s3920_s19 }
  0xa7   : > { %v4632_v43 = vpop.permute.xlu1 %1167 }
  0xa8   : > { %6307 = vst [vmem:[#allocation24_spill] sm:$0xff] %v4632_v43  ;;  %v4638_v24 = vpop.permute.xlu0 %1165 }
  0xa9   : > { %6308 = vst [vmem:[#allocation25_spill] sm:$0xff] %v4638_v24  ;;  %1216 = vrot.lane.b32.xlu1 %v4459_v40, %s3916_s15  ;;  %v963_v40 = vshrl.u32 %v4573_v6, 16 }
  0xaa   : > { %1514 = vrot.lane.b32.xlu0 %v4635_v57, %s3919_s18 }
  0xab   : > { %v4647_v2 = vpop.permute.xlu1 %1171  ;;  %v965_v53 = vor.u32 %v963_v40, %v961_v49 }
  0xac   : > { %6309 = vst [vmem:[#allocation26_spill] sm:$0xff] %v4647_v2  ;;  %v4654_v9 = vpop.permute.xlu0 %1169  ;;  %v4676_v2 = vld [vmem:[%s4024_s12 + $0xac] sm:$0xf] }
  0xad   : > { %6310 = vst [vmem:[#allocation27_spill] sm:$0xff] %v4654_v9  ;;  %1187 = vrot.lane.b32.xlu1 %v4452_v61, %s3914_s13  ;;  %v4688_v49 = vcombine.low %v348_v27, %v4676_v2 }
  0xae   : > { %1569 = vrot.lane.b32.xlu0 %v4652_v22, %s3921_s4 }
  0xaf   : > { %v4662_v38 = vpop.permute.xlu1 %1175 }
  0xb0   : > { %6311 = vst [vmem:[#allocation28_spill] sm:$0xff] %v4662_v38  ;;  %v4664_v46 = vpop.permute.xlu0 %1173 }
  0xb1   : > { %6312 = vst [vmem:[#allocation29_spill] sm:$0xff] %v4664_v46  ;;  %1242 = vrot.lane.b32.xlu1 %v4477_v30, %s3916_s15  ;;  %v970_v30 = vsel %vm502_vm0, %v965_v53, %v4670_v56  ;;  %v671_v53 = vshll.u32 %v4688_v49, 16 }
  0xb2   : > { %1271 = vrot.lane.b32.xlu0 %v4292_v16, %s3915_s14  ;;  %v6263_v16 = vrot.slane %v4645_v17, 1 }
  0xb3   : > { %v4672_v61 = vpop.permute.xlu1 %1179 }
  0xb4   : > { %6313 = vst [vmem:[#allocation30_spill] sm:$0xff] %v4672_v61  ;;  %v4678_v9 = vpop.permute.xlu0 %1177 }
  0xb5   : > { %6314 = vst [vmem:[#allocation31_spill] sm:$0xff] %v4678_v9  ;;  %1297 = vrot.lane.b32.xlu1 %v4573_v6, %s3915_s14  ;;  %v667_v6 = vshrl.u32 %v4603_v41, 16  ;;  %v1593_v9 = vsel %vm1591_vm4, %v4051_v8, %v1154_v25 }
  0xb6   : > { %1326 = vrot.lane.b32.xlu0 %v4377_v35, %s3918_s17  ;;  %v1092_v35 = vsel %vm730_vm1, %v1089_v14, %v6263_v16  ;;  %v4708_v14 = vrot.slane %v671_v53, 1  ;;  %v6266_v16 = vrot.slane %v4130_v55, 1 }
  0xb7   : > { %v4690_v40 = vpop.permute.xlu1 %1183 }
  0xb8   : > { %v4692_v0 = vpop.permute.xlu0 %1181 }
  0xb9   : > { %1352 = vrot.lane.b32.xlu1 %v970_v30, %s3918_s17 }
  0xba   : > { %1381 = vrot.lane.b32.xlu0 %v4366_v7, %s3917_s16  ;;  %v669_v7 = vor.u32 %v667_v6, %v665_v62  ;;  %v6265_v62 = vrot.slane %v4688_v49, 1 }
  0xbb   : > { %v1264_v61 = vpop.permute.xlu1 %1263 }
  0xbc   : > { %v1209_v38 = vpop.permute.xlu0 %1208  ;;  %v4719_v25 = vsel %vm502_vm0, %v669_v7, %v4708_v14 }
  0xbd   : > { %v1648_v46 = vsel %vm1646_vm5, %v1593_v9, %v1209_v38  ;;  %1407 = vrot.lane.b32.xlu1 %v1092_v35, %s3917_s16 }
  0xbe   : > { %1435 = vrot.lane.b32.xlu0 %v4126_v54, %s3920_s19  ;;  %v1703_v43 = vsel %vm1701_vm6, %v1648_v46, %v1264_v61  ;;  %v6315_v46 = vrot.slane %v4126_v54, 1  ;;  %v6316_v61 = vrot.slane %v4603_v41, 1  ;;  %v675_v54 = vshrl.u32 %v4688_v49, 16 }
  0xbf   : > { %v1374_v30 = vpop.permute.xlu1 %1373 }
  0xc0   : > { %v1319_v45 = vpop.permute.xlu0 %1318  ;;  %v4740_v35 = vsel %vm730_vm1, %v6316_v61, %v6265_v62 }
  0xc1   : > { %v1758_v8 = vsel %vm1756_vm7, %v1703_v43, %v1319_v45  ;;  %1461 = vrot.lane.b32.xlu1 %v4603_v41, %s3920_s19  ;;  %v4727_v45 = vsel %vm730_vm1, %v6315_v46, %v6266_v16  ;;  %v4750_v46 = vcombine.low %v4592_v18, %v348_v27  ;;  %v6318_v16 = vrot.slane %v4645_v17, 1 }
  0xc2   : > { %1490 = vrot.lane.b32.xlu0 %v4177_v50, %s3919_s18  ;;  %v1813_v43 = vsel %vm1811_vm8, %v1758_v8, %v1374_v30 }
  0xc3   : > { %v1483_v9 = vpop.permute.xlu1 %1482 }
  0xc4   : > { %v1428_v38 = vpop.permute.xlu0 %1427 }
  0xc5   : > { %v1868_v50 = vsel %vm1866_vm9, %v1813_v43, %v1428_v38  ;;  %1516 = vrot.lane.b32.xlu1 %v4719_v25, %s3919_s18  ;;  %v6317_v43 = vmov 0.0  }
  0xc6   : > { %1545 = vrot.lane.b32.xlu0 %v4727_v45, %s3921_s4  ;;  %v1923_v53 = vsel %vm1921_vm10, %v1868_v50, %v1483_v9  ;;  %v975_v50 = vshll.u32 %v4750_v46, 16 }
  0xc7   : > { %v1211_v6 = vpop.permute.xlu1 %1210 }
  0xc8   : > { %v1538_v7 = vpop.permute.xlu0 %1537 }
  0xc9   : > { %v1978_v30 = vsel %vm6274_vm11, %v1923_v53, %v1538_v7  ;;  %1571 = vrot.lane.b32.xlu1 %v4740_v35, %s3921_s4  ;;  %v4765_v53 = vrot.slane %v975_v50, 1  ;;  %v350_v7 = vld [vmem:[%s4024_s12 + $0xb0] sm:$0xf]  ;;  %v748_v50 = vrot.slane %v4135_v59, 1 }
  0xca   : > { %1218 = vrot.lane.b32.xlu0 %v4553_v31, %s3916_s15  ;;  %3578 = vmatmul.mubr.msk.bf16.vlgmr.msra.gmra.mrb[0].mxu0 %vm6272_vm12, %v1978_v30  ;;  %v971_v31 = vshrl.u32 %v4645_v17, 16 }
  0xcb   : > { %v1237_v8 = vpop.permute.xlu1 %1236  ;;  %3581 = vmatprep.mubr.msk.bf16.mxu0 %vm6270_vm3, %v6317_v43 }
  0xcc   : > { %v1266_v9 = vpop.permute.xlu0 %1265  ;;  %v973_v18 = vor.u32 %v971_v31, %v4670_v56 }
  0xcd   : > { %1273 = vrot.lane.b32.xlu1 %v4336_v36, %s3915_s14 }
  0xce   : > { %1189 = vrot.lane.b32.xlu0 %v4549_v48, %s3914_s13  ;;  %v4769_v48 = vld [vmem:[%s4024_s12 + $0xb4] sm:$0xf] }
  0xcf   : > { %v1292_v38 = vpop.permute.xlu1 %1291  ;;  %v4779_v56 = vcombine.low %v350_v7, %v4769_v48 }
  0xd0   : > { %v1321_v61 = vpop.permute.xlu0 %1320 }
  0xd1   : > { %1328 = vrot.lane.b32.xlu1 %v4441_v13, %s3918_s17  ;;  %v978_v13 = vsel %vm502_vm0, %v973_v18, %v4765_v53  ;;  %v679_v37 = vshll.u32 %v4779_v56, 16 }
  0xd2   : > { %1244 = vrot.lane.b32.xlu0 %v4561_v42, %s3916_s15  ;;  %v1093_v42 = vrot.slane %v4750_v46, 1 }
  0xd3   : > { %v1347_v27 = vpop.permute.xlu1 %1346 }
  0xd4   : > { %v1376_v36 = vpop.permute.xlu0 %1375  ;;  %v1094_v41 = vsel %vm730_vm1, %v6318_v16, %v1093_v42 }
  0xd5   : > { %1383 = vrot.lane.b32.xlu1 %v4437_v19, %s3917_s16  ;;  %v1595_v19 = vsel %vm1591_vm4, %v4056_v11, %v4614_v15  ;;  %v1621_v15 = vsel %vm1591_vm4, %v4187_v63, %v4692_v0 }
  0xd6   : > { %1299 = vrot.lane.b32.xlu0 %v4645_v17, %s3915_s14  ;;  %v1650_v62 = vsel %vm1646_vm5, %v1595_v19, %v1211_v6  ;;  %v1676_v17 = vsel %vm1646_vm5, %v1621_v15, %v1237_v8 }
  0xd7   : > { %v1402_v30 = vpop.permute.xlu1 %1401  ;;  %v1705_v24 = vsel %vm1701_vm6, %v1650_v62, %v1266_v9  ;;  %v6319_v62 = vrot.slane %v4130_v55, 1  ;;  %v1731_v0 = vsel %vm1701_vm6, %v1676_v17, %v1292_v38 }
  0xd8   : > { %v1430_v31 = vpop.permute.xlu0 %1429  ;;  %v1760_v6 = vsel %vm1756_vm7, %v1705_v24, %v1321_v61  ;;  %v1786_v8 = vsel %vm1756_vm7, %v1731_v0, %v1347_v27  ;;  %v774_v27 = vrot.slane %v4779_v56, 1 }
  0xd9   : > { %1437 = vrot.lane.b32.xlu1 %v4130_v55, %s3920_s19  ;;  %v1815_v16 = vsel %vm1811_vm8, %v1760_v6, %v1376_v36  ;;  %v4811_v9 = vsel %vm730_vm1, %v6319_v62, %v748_v50  ;;  %v1841_v19 = vsel %vm1811_vm8, %v1786_v8, %v1402_v30  ;;  %v6320_v6 = vrot.slane %v4688_v49, 1 }
  0xda   : > { %1354 = vrot.lane.b32.xlu0 %v978_v13, %s3918_s17  ;;  %v1870_v24 = vsel %vm1866_vm9, %v1815_v16, %v1430_v31  ;;  %v4816_v13 = vrot.slane %v679_v37, 1 }
  0xdb   : > { %v1456_v18 = vpop.permute.xlu1 %1455 }
  0xdc   : > { %v1485_v11 = vpop.permute.xlu0 %1484  ;;  %v1896_v38 = vsel %vm1866_vm9, %v1841_v19, %v1456_v18  ;;  %v4843_v18 = vcombine.low %v4676_v2, %v350_v7  ;;  %v979_v2 = vshrl.u32 %v4750_v46, 16 }
  0xdd   : > { %1492 = vrot.lane.b32.xlu1 %v4213_v29, %s3919_s18  ;;  %v677_v29 = vor.u32 %v675_v54, %v4708_v14 }
  0xde   : > { %1409 = vrot.lane.b32.xlu0 %v1094_v41, %s3917_s16  ;;  %v1925_v41 = vsel %vm1921_vm10, %v1870_v24, %v1485_v11  ;;  %v983_v7 = vshll.u32 %v4843_v18, 16  ;;  %v981_v0 = vor.u32 %v979_v2, %v4765_v53 }
  0xdf   : > { %v1511_v61 = vpop.permute.xlu1 %1510  ;;  %v4831_v14 = vsel %vm502_vm0, %v677_v29, %v4816_v13  ;;  %v4871_v29 = vld [vmem:[%s4024_s12 + $0xbc] sm:$0xf] }
  0xe0   : > { %v1540_v36 = vpop.permute.xlu0 %1539  ;;  %v1951_v37 = vsel %vm1921_vm10, %v1896_v38, %v1511_v61  ;;  %v4865_v24 = vrot.slane %v983_v7, 1  ;;  %v4868_v61 = vld [vmem:[%s4024_s12 + $0xb8] sm:$0xf]  ;;  %v750_v7 = vrot.slane %v4137_v60, 1 }
  0xe1   : > { %v1980_v15 = vsel %vm6274_vm11, %v1925_v41, %v1540_v36  ;;  %1547 = vrot.lane.b32.xlu1 %v4811_v9, %s3921_s4  ;;  %v4884_v53 = vcombine.low %v4868_v61, %v4871_v29 }
  0xe2   : > { %1463 = vrot.lane.b32.xlu0 %v4688_v49, %s3920_s19  ;;  %3582 = vmatmul.mubr.msk.bf16.gmra.mrb[4].mxu0 %vm6272_vm12, %v1980_v15  ;;  %v683_v15 = vshrl.u32 %v4779_v56, 16 }
  0xe3   : > { %v1566_v54 = vpop.permute.xlu1 %1565  ;;  %3585 = vmatprep.mubr.msk.bf16.mxu0 %vm6270_vm3, %v6317_v43  ;;  %v687_v38 = vshll.u32 %v4884_v53, 16 }
  0xe4   : > { %v2006_v30 = vsel %vm6274_vm11, %v1951_v37, %v1566_v54  ;;  %v1213_v31 = vpop.permute.xlu0 %1212 }
  0xe5   : > { %1220 = vrot.lane.b32.xlu1 %v4622_v52, %s3916_s15  ;;  %3634 = vmatmul.mubr.msk.bf16.vlgmr.msra.gmra.mrb[0].mxu1 %vm6272_vm12, %v2006_v30  ;;  %v4852_v52 = vsel %vm730_vm1, %v6320_v6, %v774_v27 }
  0xe6   : > { %1518 = vrot.lane.b32.xlu0 %v4831_v14, %s3919_s18  ;;  %3637 = vmatprep.mubr.msk.bf16.mxu1 %vm6270_vm3, %v6317_v43 }
  0xe7   : > { %v1239_v11 = vpop.permute.xlu1 %1238 }
  0xe8   : > { %v1268_v17 = vpop.permute.xlu0 %1267 }
  0xe9   : > { %1191 = vrot.lane.b32.xlu1 %v4635_v57, %s3914_s13 }
  0xea   : > { %1573 = vrot.lane.b32.xlu0 %v4852_v52, %s3921_s4 }
  0xeb   : > { %v1294_v16 = vpop.permute.xlu1 %1293 }
  0xec   : > { %v1323_v62 = vpop.permute.xlu0 %1322 }
  0xed   : > { %1246 = vrot.lane.b32.xlu1 %v4652_v22, %s3916_s15  ;;  %v1095_v22 = vrot.slane %v4843_v18, 1 }
  0xee   : > { %1275 = vrot.lane.b32.xlu0 %v4416_v3, %s3915_s14  ;;  %v986_v3 = vsel %vm502_vm0, %v981_v0, %v4865_v24 }
  0xef   : > { %v1349_v57 = vpop.permute.xlu1 %1348  ;;  %v1096_v19 = vsel %vm730_vm1, %v1093_v42, %v1095_v22  ;;  %v685_v42 = vor.u32 %v683_v15, %v4816_v13 }
  0xf0   : > { %v1378_v8 = vpop.permute.xlu0 %1377 }
  0xf1   : > { %1301 = vrot.lane.b32.xlu1 %v4750_v46, %s3915_s14 }
  0xf2   : > { %1330 = vrot.lane.b32.xlu0 %v4492_v23, %s3918_s17  ;;  %v1597_v23 = vsel %vm1591_vm4, %v4040_v4, %v4598_v44  ;;  %v1623_v4 = vsel %vm1591_vm4, %v4200_v20, %v4690_v40 }
  0xf3   : > { %v1404_v41 = vpop.permute.xlu1 %1403  ;;  %v1652_v37 = vsel %vm1646_vm5, %v1597_v23, %v1213_v31  ;;  %v1678_v44 = vsel %vm1646_vm5, %v1623_v4, %v1239_v11  ;;  %v4916_v31 = vrot.slane %v687_v38, 1 }
  0xf4   : > { %v1432_v36 = vpop.permute.xlu0 %1431  ;;  %v1707_v30 = vsel %vm1701_vm6, %v1652_v37, %v1268_v17  ;;  %v1733_v17 = vsel %vm1701_vm6, %v1678_v44, %v1294_v16 }
  0xf5   : > { %1356 = vrot.lane.b32.xlu1 %v986_v3, %s3918_s17  ;;  %v1788_v11 = vsel %vm1756_vm7, %v1733_v17, %v1349_v57  ;;  %v4933_v57 = vsel %vm502_vm0, %v685_v42, %v4916_v31  ;;  %v776_v3 = vrot.slane %v4884_v53, 1 }
  0xf6   : > { %1385 = vrot.lane.b32.xlu0 %v4509_v47, %s3917_s16  ;;  %v1762_v47 = vsel %vm1756_vm7, %v1707_v30, %v1323_v62 }
  0xf7   : > { %v1458_v54 = vpop.permute.xlu1 %1457  ;;  %v1817_v46 = vsel %vm1811_vm8, %v1762_v47, %v1378_v8  ;;  %v1843_v8 = vsel %vm1811_vm8, %v1788_v11, %v1404_v41  ;;  %v3822_v41 = vld [vmem:[%s4024_s12 + $0x50] sm:$0xf] }
  0xf8   : > { %v1487_v6 = vpop.permute.xlu0 %1486  ;;  %v1872_v40 = vsel %vm1866_vm9, %v1817_v46, %v1432_v36  ;;  %v1898_v16 = vsel %vm1866_vm9, %v1843_v8, %v1458_v54  ;;  %v3821_v36 = vld [vmem:[%s4024_s12 + $0x4c] sm:$0xf]  ;;  %v883_v54 = vshrl.u32 %v4463_v39, 16  ;;  %v4976_v46 = vcombine.low %v4769_v48, %v4868_v61 }
  0xf9   : > { %1411 = vrot.lane.b32.xlu1 %v1096_v19, %s3917_s16  ;;  %v1927_v62 = vsel %vm1921_vm10, %v1872_v40, %v1487_v6  ;;  %v4938_v23 = vcombine.low %v3821_v36, %v3822_v41  ;;  %v987_v40 = vshrl.u32 %v4843_v18, 16  ;;  %v1599_v36 = vsel %vm1591_vm4, %v4044_v5, %v4609_v58 }
  0xfa   : > { %1439 = vrot.lane.b32.xlu0 %v4135_v59, %s3920_s19  ;;  %v885_v47 = vor.u32 %v883_v54, %v4486_v12  ;;  %v991_v48 = vshll.u32 %v4976_v46, 16  ;;  %v752_v54 = vrot.slane %v4159_v32, 1 }
  0xfb   : > { %v1513_v2 = vpop.permute.xlu1 %1512  ;;  %v887_v30 = vshll.u32 %v4938_v23, 16  ;;  %v1071_v12 = vrot.slane %v4938_v23, 1 }
  0xfc   : > { %v1542_v0 = vpop.permute.xlu0 %1541  ;;  %v1953_v19 = vsel %vm1921_vm10, %v1898_v16, %v1513_v2  ;;  %v5000_v16 = vld [vmem:[%s4024_s12 + $0xc4] sm:$0xf] }
  0xfd   : > { %v1982_v13 = vsel %vm6274_vm11, %v1927_v62, %v1542_v0  ;;  %1465 = vrot.lane.b32.xlu1 %v4779_v56, %s3920_s19  ;;  %v4972_v44 = vrot.slane %v887_v30, 1  ;;  %v989_v62 = vor.u32 %v987_v40, %v4865_v24  ;;  %v4996_v0 = vrot.slane %v991_v48, 1 }
  0xfe   : > { %1494 = vrot.lane.b32.xlu0 %v4205_v21, %s3919_s18  ;;  %3586 = vmatmul.mubr.msk.bf16.gmra.mrb[8].mxu0 %vm6272_vm12, %v1982_v13  ;;  %v4946_v21 = vsel %vm730_vm1, %v748_v50, %v750_v7  ;;  %v4961_v50 = vsel %vm730_vm1, %v774_v27, %v776_v3  ;;  %v354_v13 = vld [vmem:[%s4024_s12 + $0xc0] sm:$0xf] }
  0xff   : > { %v1568_v15 = vpop.permute.xlu1 %1567  ;;  %3589 = vmatprep.mubr.msk.bf16.mxu0 %vm6270_vm3, %v6317_v43  ;;  %v994_v41 = vsel %vm502_vm0, %v989_v62, %v4996_v0 }
 0x100   : > { %v2008_v38 = vsel %vm6274_vm11, %v1953_v19, %v1568_v15  ;;  %v1215_v37 = vpop.permute.xlu0 %1214  ;;  %v1097_v19 = vrot.slane %v4976_v46, 1  ;;  %v5014_v15 = vcombine.low %v354_v13, %v5000_v16 }
 0x101   : > { %1520 = vrot.lane.b32.xlu1 %v4933_v57, %s3919_s18  ;;  %3638 = vmatmul.mubr.msk.bf16.gmra.mrb[4].mxu1 %vm6272_vm12, %v2008_v38 }
 0x102   : > { %1549 = vrot.lane.b32.xlu0 %v4946_v21, %s3921_s4  ;;  %3641 = vmatprep.mubr.msk.bf16.mxu1 %vm6270_vm3, %v6317_v43 }
 0x103   : > { %v1270_v6 = vpop.permute.xlu1 %1269 }
 0x104   : > { %v1186_v4 = vpop.permute.xlu0 %1185 }
 0x105   : > { %1575 = vrot.lane.b32.xlu1 %v4961_v50, %s3921_s4  ;;  %v1625_v48 = vsel %vm1591_vm4, %v4210_v26, %v1186_v4 }
 0x106   : > { %1222 = vrot.lane.b32.xlu0 %v4727_v45, %s3916_s15  ;;  %v890_v45 = vsel %vm502_vm0, %v885_v47, %v4972_v44  ;;  %v1098_v47 = vsel %vm730_vm1, %v1095_v22, %v1097_v19 }
 0x107   : > { %v1325_v27 = vpop.permute.xlu1 %1324 }
 0x108   : > { %v1241_v42 = vpop.permute.xlu0 %1240 }
 0x109   : > { %1277 = vrot.lane.b32.xlu1 %v4463_v39, %s3915_s14 }
 0x10a   : > { %1193 = vrot.lane.b32.xlu0 %v4719_v25, %s3914_s13  ;;  %v6321_v25 = vrot.slane %v4463_v39, 1 }
 0x10b   : > { %v1380_v17 = vpop.permute.xlu1 %1379 }
 0x10c   : > { %v1296_v61 = vpop.permute.xlu0 %1295  ;;  %v1072_v2 = vsel %vm730_vm1, %v6321_v25, %v1071_v12 }
 0x10d   : > { %1332 = vrot.lane.b32.xlu1 %v890_v45, %s3918_s17  ;;  %v695_v45 = vshll.u32 %v5014_v15, 16 }
 0x10e   : > { %1248 = vrot.lane.b32.xlu0 %v4740_v35, %s3916_s15  ;;  %v1654_v35 = vsel %vm1646_vm5, %v1599_v36, %v1215_v37 }
 0x10f   : > { %v1434_v11 = vpop.permute.xlu1 %1433  ;;  %v1709_v39 = vsel %vm1701_vm6, %v1654_v35, %v1270_v6  ;;  %v5049_v4 = vrot.slane %v695_v45, 1  ;;  %v3823_v35 = vld [vmem:[%s4024_s12 + $0x54] sm:$0xf] }
 0x110   : > { %v1351_v8 = vpop.permute.xlu0 %1350  ;;  %v1764_v5 = vsel %vm1756_vm7, %v1709_v39, %v1325_v27  ;;  %v691_v27 = vshrl.u32 %v4884_v53, 16  ;;  %v3824_v39 = vld [vmem:[%s4024_s12 + $0x58] sm:$0xf] }
 0x111   : > { %1387 = vrot.lane.b32.xlu1 %v1072_v2, %s3917_s16  ;;  %v1819_v38 = vsel %vm1811_vm8, %v1764_v5, %v1380_v17 }
 0x112   : > { %1303 = vrot.lane.b32.xlu0 %v4843_v18, %s3915_s14  ;;  %v1874_v37 = vsel %vm1866_vm9, %v1819_v38, %v1434_v11  ;;  %v5043_v18 = vsel %vm730_vm1, %v750_v7, %v752_v54  ;;  %v693_v25 = vor.u32 %v691_v27, %v4916_v31 }
 0x113   : > { %v1489_v24 = vpop.permute.xlu1 %1488 }
 0x114   : > { %v1406_v58 = vpop.permute.xlu0 %1405  ;;  %v1929_v30 = vsel %vm1921_vm10, %v1874_v37, %v1489_v24  ;;  %v5061_v31 = vsel %vm502_vm0, %v693_v25, %v5049_v4  ;;  %v5112_v25 = vld [vmem:[%s4024_s12 + $0xcc] sm:$0xf] }
 0x115   : > { %1441 = vrot.lane.b32.xlu1 %v4137_v60, %s3920_s19 }
 0x116   : > { %1358 = vrot.lane.b32.xlu0 %v994_v41, %s3918_s17 }
 0x117   : > { %v1544_v6 = vpop.permute.xlu1 %1543 }
 0x118   : > { %v1984_v17 = vsel %vm6274_vm11, %v1929_v30, %v1544_v6  ;;  %v1460_v40 = vpop.permute.xlu0 %1459  ;;  %v891_v30 = vshrl.u32 %v4938_v23, 16 }
 0x119   : > { %1496 = vrot.lane.b32.xlu1 %v4227_v51, %s3919_s18  ;;  %3590 = vmatmul.mubr.msk.bf16.gmra.mrb[12].mxu0 %vm6272_vm12, %v1984_v17  ;;  %v1680_v51 = vsel %vm1646_vm5, %v1625_v48, %v1241_v42 }
 0x11a   : > { %1413 = vrot.lane.b32.xlu0 %v1098_v47, %s3917_s16  ;;  %3593 = vmatprep.mubr.msk.bf16.mxu0 %vm6270_vm3, %v6317_v43  ;;  %v1735_v2 = vsel %vm1701_vm6, %v1680_v51, %v1296_v61  ;;  %v778_v61 = vrot.slane %v5014_v15, 1  ;;  %v893_v47 = vor.u32 %v891_v30, %v4972_v44  ;;  %v5109_v44 = vld [vmem:[%s4024_s12 + $0xc8] sm:$0xf] }
 0x11b   : > { %v1217_v22 = vpop.permute.xlu1 %1216  ;;  %v1790_v62 = vsel %vm1756_vm7, %v1735_v2, %v1351_v8  ;;  %v5066_v8 = vcombine.low %v3823_v35, %v3824_v39  ;;  %v6322_v35 = vld [vmem:[#allocation6_spill] sm:$0xff] }
 0x11c   : > { %v1515_v11 = vpop.permute.xlu0 %1514  ;;  %v1845_v7 = vsel %vm1811_vm8, %v1790_v62, %v1406_v58  ;;  %v5076_v58 = vcombine.low %v4871_v29, %v354_v13  ;;  %v5083_v37 = vsel %vm730_vm1, %v776_v3, %v778_v61  ;;  %v995_v29 = vshrl.u32 %v4976_v46, 16 }
 0x11d   : > { %1551 = vrot.lane.b32.xlu1 %v5043_v18, %s3921_s4  ;;  %v1900_v42 = vsel %vm1866_vm9, %v1845_v7, %v1460_v40  ;;  %v1073_v51 = vrot.slane %v5066_v8, 1  ;;  %v1601_v39 = vsel %vm1591_vm4, %v6322_v35, %v4626_v1 }
 0x11e   : > { %1467 = vrot.lane.b32.xlu0 %v4884_v53, %s3920_s19  ;;  %v1955_v24 = vsel %vm1921_vm10, %v1900_v42, %v1515_v11  ;;  %v999_v3 = vshll.u32 %v5076_v58, 16  ;;  %v5122_v11 = vcombine.low %v5109_v44, %v5112_v25 }
 0x11f   : > { %v1188_v36 = vpop.permute.xlu1 %1187  ;;  %v1074_v7 = vsel %vm730_vm1, %v1071_v12, %v1073_v51  ;;  %v1656_v12 = vsel %vm1646_vm5, %v1601_v39, %v1217_v22 }
 0x120   : > { %v1570_v41 = vpop.permute.xlu0 %1569  ;;  %v5103_v17 = vrot.slane %v999_v3, 1  ;;  %v1627_v1 = vsel %vm1591_vm4, %v4374_v10, %v1188_v36 }
 0x121   : > { %v2010_v5 = vsel %vm6274_vm11, %v1955_v24, %v1570_v41  ;;  %1224 = vrot.lane.b32.xlu1 %v4811_v9, %s3916_s15  ;;  %v895_v9 = vshll.u32 %v5066_v8, 16  ;;  %v699_v41 = vshrl.u32 %v5014_v15, 16 }
 0x122   : > { %1522 = vrot.lane.b32.xlu0 %v5061_v31, %s3919_s18  ;;  %3642 = vmatmul.mubr.msk.bf16.gmra.mrb[8].mxu1 %vm6272_vm12, %v2010_v5 }
 0x123   : > { %v1243_v38 = vpop.permute.xlu1 %1242  ;;  %3645 = vmatprep.mubr.msk.bf16.mxu1 %vm6270_vm3, %v6317_v43  ;;  %v5096_v27 = vrot.slane %v895_v9, 1  ;;  %v701_v22 = vor.u32 %v699_v41, %v5049_v4 }
 0x124   : > { %v1272_v6 = vpop.permute.xlu0 %1271 }
 0x125   : > { %1195 = vrot.lane.b32.xlu1 %v4831_v14, %s3914_s13  ;;  %v997_v14 = vor.u32 %v995_v29, %v4996_v0  ;;  %v898_v48 = vsel %vm502_vm0, %v893_v47, %v5096_v27  ;;  %v1099_v0 = vrot.slane %v5076_v58, 1  ;;  %v1711_v30 = vsel %vm1701_vm6, %v1656_v12, %v1272_v6  ;;  %v6323_v47 = vld [vmem:[#allocation9_spill] sm:$0xff] }
 0x126   : > { %1577 = vrot.lane.b32.xlu0 %v5083_v37, %s3921_s4 }
 0x127   : > { %v1298_v13 = vpop.permute.xlu1 %1297  ;;  %v1100_v24 = vsel %vm730_vm1, %v1097_v19, %v1099_v0 }
 0x128   : > { %v1327_v45 = vpop.permute.xlu0 %1326 }
 0x129   : > { %1250 = vrot.lane.b32.xlu1 %v4852_v52, %s3916_s15  ;;  %v1002_v52 = vsel %vm502_vm0, %v997_v14, %v5103_v17  ;;  %v1766_v29 = vsel %vm1756_vm7, %v1711_v30, %v1327_v45  ;;  %v754_v45 = vrot.slane %v6323_v47, 1 }
 0x12a   : > { %1279 = vrot.lane.b32.xlu0 %v4938_v23, %s3915_s14  ;;  %v703_v23 = vshll.u32 %v5122_v11, 16 }
 0x12b   : > { %v1353_v40 = vpop.permute.xlu1 %1352  ;;  %v5182_v41 = vsel %vm730_vm1, %v752_v54, %v754_v45 }
 0x12c   : > { %v1382_v2 = vpop.permute.xlu0 %1381  ;;  %v5152_v3 = vrot.slane %v703_v23, 1 }
 0x12d   : > { %1305 = vrot.lane.b32.xlu1 %v4976_v46, %s3915_s14  ;;  %v1682_v46 = vsel %vm1646_vm5, %v1627_v1, %v1243_v38  ;;  %v1821_v19 = vsel %vm1811_vm8, %v1766_v29, %v1382_v2 }
 0x12e   : > { %1334 = vrot.lane.b32.xlu0 %v898_v48, %s3918_s17  ;;  %v1737_v6 = vsel %vm1701_vm6, %v1682_v46, %v1298_v13 }
 0x12f   : > { %v1408_v62 = vpop.permute.xlu1 %1407  ;;  %v1792_v38 = vsel %vm1756_vm7, %v1737_v6, %v1353_v40  ;;  %v5169_v40 = vsel %vm502_vm0, %v701_v22, %v5152_v3 }
 0x130   : > { %v1436_v42 = vpop.permute.xlu0 %1435  ;;  %v1847_v2 = vsel %vm1811_vm8, %v1792_v38, %v1408_v62  ;;  %v3826_v62 = vld [vmem:[%s4024_s12 + $0x60] sm:$0xf] }
 0x131   : > { %1360 = vrot.lane.b32.xlu1 %v1002_v52, %s3918_s17  ;;  %v1876_v10 = vsel %vm1866_vm9, %v1821_v19, %v1436_v42  ;;  %v6324_v52 = vld [vmem:[#allocation11_spill] sm:$0xff]  ;;  %v3825_v42 = vld [vmem:[%s4024_s12 + $0x5c] sm:$0xf]  ;;  %v5212_v19 = vcombine.low %v5000_v16, %v5109_v44 }
 0x132   : > { %1389 = vrot.lane.b32.xlu0 %v1074_v7, %s3917_s16  ;;  %v780_v7 = vrot.slane %v5122_v11, 1  ;;  %v5174_v35 = vcombine.low %v3825_v42, %v3826_v62 }
 0x133   : > { %v1462_v5 = vpop.permute.xlu1 %1461  ;;  %v1007_v16 = vshll.u32 %v5212_v19, 16 }
 0x134   : > { %v1491_v9 = vpop.permute.xlu0 %1490  ;;  %v1902_v13 = vsel %vm1866_vm9, %v1847_v2, %v1462_v5  ;;  %v5197_v54 = vsel %vm730_vm1, %v778_v61, %v780_v7  ;;  %v899_v5 = vshrl.u32 %v5066_v8, 16  ;;  %v903_v30 = vshll.u32 %v5174_v35, 16  ;;  %v358_v2 = vld [vmem:[%s4024_s12 + $0xd0] sm:$0xf] }
 0x135   : > { %1415 = vrot.lane.b32.xlu1 %v1100_v24, %s3917_s16  ;;  %v1931_v14 = vsel %vm1921_vm10, %v1876_v10, %v1491_v9  ;;  %v1003_v10 = vshrl.u32 %v5076_v58, 16 }
 0x136   : > { %1443 = vrot.lane.b32.xlu0 %v4159_v32, %s3920_s19  ;;  %v901_v29 = vor.u32 %v899_v5, %v5096_v27  ;;  %v5208_v46 = vrot.slane %v903_v30, 1  ;;  %v1075_v27 = vrot.slane %v5174_v35, 1 }
 0x137   : > { %v1517_v36 = vpop.permute.xlu1 %1516  ;;  %v1005_v38 = vor.u32 %v1003_v10, %v5103_v17 }
 0x138   : > { %v1546_v48 = vpop.permute.xlu0 %1545  ;;  %v1957_v39 = vsel %vm1921_vm10, %v1902_v13, %v1517_v36  ;;  %v1603_v13 = vsel %vm1591_vm4, %v4086_v28, %v4624_v34 }
 0x139   : > { %v1986_v4 = vsel %vm6274_vm11, %v1931_v14, %v1546_v48  ;;  %1469 = vrot.lane.b32.xlu1 %v5014_v15, %s3920_s19  ;;  %v5232_v14 = vrot.slane %v1007_v16, 1 }
 0x13a   : > { %1498 = vrot.lane.b32.xlu0 %v6324_v52, %s3919_s18  ;;  %3594 = vmatmul.mubr.msk.bf16.gmra.mrb[16].mxu0 %vm6272_vm12, %v1986_v4  ;;  %v5236_v4 = vld [vmem:[%s4024_s12 + $0xd4] sm:$0xf]  ;;  %v1101_v52 = vrot.slane %v5212_v19, 1 }
 0x13b   : > { %v1572_v24 = vpop.permute.xlu1 %1571  ;;  %3597 = vmatprep.mubr.msk.bf16.mxu0 %vm6270_vm3, %v6317_v43  ;;  %v5250_v42 = vcombine.low %v358_v2, %v5236_v4 }
 0x13c   : > { %v2012_v23 = vsel %vm6274_vm11, %v1957_v39, %v1572_v24  ;;  %v1219_v12 = vpop.permute.xlu0 %1218  ;;  %v6325_v24 = vld [vmem:[#allocation10_spill] sm:$0xff]  ;;  %v1102_v30 = vsel %vm730_vm1, %v1099_v0, %v1101_v52 }
 0x13d   : > { %1524 = vrot.lane.b32.xlu1 %v5169_v40, %s3919_s18  ;;  %3646 = vmatmul.mubr.msk.bf16.gmra.mrb[12].mxu1 %vm6272_vm12, %v2012_v23  ;;  %v756_v23 = vrot.slane %v6325_v24, 1 }
 0x13e   : > { %1553 = vrot.lane.b32.xlu0 %v5182_v41, %s3921_s4  ;;  %3649 = vmatprep.mubr.msk.bf16.mxu1 %vm6270_vm3, %v6317_v43 }
 0x13f   : > { %v1274_v9 = vpop.permute.xlu1 %1273 }
 0x140   : > { %v1190_v1 = vpop.permute.xlu0 %1189 }
 0x141   : > { %1579 = vrot.lane.b32.xlu1 %v5197_v54, %s3921_s4  ;;  %v1629_v10 = vsel %vm1591_vm4, %v4404_v33, %v1190_v1 }
 0x142   : > { %1226 = vrot.lane.b32.xlu0 %v4946_v21, %s3916_s15  ;;  %v906_v21 = vsel %vm502_vm0, %v901_v29, %v5208_v46  ;;  %v711_v29 = vshll.u32 %v5250_v42, 16 }
 0x143   : > { %v1329_v61 = vpop.permute.xlu1 %1328 }
 0x144   : > { %v1245_v22 = vpop.permute.xlu0 %1244  ;;  %v5285_v33 = vrot.slane %v711_v29, 1 }
 0x145   : > { %1281 = vrot.lane.b32.xlu1 %v5066_v8, %s3915_s14  ;;  %v1684_v0 = vsel %vm1646_vm5, %v1629_v10, %v1245_v22 }
 0x146   : > { %1197 = vrot.lane.b32.xlu0 %v4933_v57, %s3914_s13  ;;  %v1076_v57 = vsel %vm730_vm1, %v1073_v51, %v1075_v27  ;;  %v1010_v51 = vsel %vm502_vm0, %v1005_v38, %v5232_v14 }
 0x147   : > { %v1384_v6 = vpop.permute.xlu1 %1383 }
 0x148   : > { %v1300_v44 = vpop.permute.xlu0 %1299 }
 0x149   : > { %1336 = vrot.lane.b32.xlu1 %v906_v21, %s3918_s17  ;;  %v1739_v1 = vsel %vm1701_vm6, %v1684_v0, %v1300_v44  ;;  %v5300_v44 = vrot.slane %v5250_v42, 1  ;;  %v5349_v0 = vld [vmem:[%s4889_s11 + $0x4] sm:$0xf] }
 0x14a   : > { %1252 = vrot.lane.b32.xlu0 %v4961_v50, %s3916_s15  ;;  %v1658_v50 = vsel %vm1646_vm5, %v1603_v13, %v1219_v12 }
 0x14b   : > { %v1438_v36 = vpop.permute.xlu1 %1437  ;;  %v1713_v8 = vsel %vm1701_vm6, %v1658_v50, %v1274_v9  ;;  %v707_v9 = vshrl.u32 %v5122_v11, 16  ;;  %v3827_v50 = vld [vmem:[%s4024_s12 + $0x64] sm:$0xf] }
 0x14c   : > { %v1355_v48 = vpop.permute.xlu0 %1354  ;;  %v1768_v28 = vsel %vm1756_vm7, %v1713_v8, %v1329_v61 }
 0x14d   : > { %1391 = vrot.lane.b32.xlu1 %v1076_v57, %s3917_s16  ;;  %v1823_v62 = vsel %vm1811_vm8, %v1768_v28, %v1384_v6  ;;  %v6326_v6 = vld [vmem:[#allocation13_spill] sm:$0xff]  ;;  %v709_v57 = vor.u32 %v707_v9, %v5152_v3  ;;  %v1794_v38 = vsel %vm1756_vm7, %v1739_v1, %v1355_v48  ;;  %v3828_v48 = vld [vmem:[%s4024_s12 + $0x68] sm:$0xf] }
 0x14e   : > { %1307 = vrot.lane.b32.xlu0 %v5076_v58, %s3915_s14  ;;  %v1878_v39 = vsel %vm1866_vm9, %v1823_v62, %v1438_v36  ;;  %v5279_v58 = vsel %vm730_vm1, %v754_v45, %v756_v23  ;;  %v5304_v8 = vcombine.low %v3827_v50, %v3828_v48  ;;  %v6328_v50 = vld [vmem:[#allocation7_spill] sm:$0xff] }
 0x14f   : > { %v1493_v17 = vpop.permute.xlu1 %1492  ;;  %v5297_v3 = vsel %vm502_vm0, %v709_v57, %v5285_v33 }
 0x150   : > { %v1410_v34 = vpop.permute.xlu0 %1409  ;;  %v1933_v12 = vsel %vm1921_vm10, %v1878_v39, %v1493_v17  ;;  %v5320_v39 = vsel %vm730_vm1, %v780_v7, %v5300_v44  ;;  %v1077_v10 = vrot.slane %v5304_v8, 1 }
 0x151   : > { %1445 = vrot.lane.b32.xlu1 %v6323_v47, %s3920_s19  ;;  %v1849_v45 = vsel %vm1811_vm8, %v1794_v38, %v1410_v34  ;;  %v5314_v34 = vcombine.low %v5112_v25, %v358_v2  ;;  %v1011_v25 = vshrl.u32 %v5212_v19, 16 }
 0x152   : > { %1362 = vrot.lane.b32.xlu0 %v1010_v51, %s3918_s17  ;;  %v1078_v38 = vsel %vm730_vm1, %v1075_v27, %v1077_v10 }
 0x153   : > { %v1548_v5 = vpop.permute.xlu1 %1547  ;;  %v1015_v7 = vshll.u32 %v5314_v34, 16 }
 0x154   : > { %v1988_v61 = vsel %vm6274_vm11, %v1933_v12, %v1548_v5  ;;  %v1464_v21 = vpop.permute.xlu0 %1463  ;;  %v907_v12 = vshrl.u32 %v5174_v35, 16  ;;  %v911_v5 = vshll.u32 %v5304_v8, 16 }
 0x155   : > { %1500 = vrot.lane.b32.xlu1 %v6326_v6, %s3919_s18  ;;  %3598 = vmatmul.mubr.msk.bf16.gmra.mrb[20].mxu0 %vm6272_vm12, %v1988_v61  ;;  %v1904_v22 = vsel %vm1866_vm9, %v1849_v45, %v1464_v21  ;;  %v5340_v61 = vrot.slane %v1015_v7, 1 }
 0x156   : > { %1417 = vrot.lane.b32.xlu0 %v1102_v30, %s3917_s16  ;;  %3601 = vmatprep.mubr.msk.bf16.mxu0 %vm6270_vm3, %v6317_v43  ;;  %v909_v30 = vor.u32 %v907_v12, %v5208_v46  ;;  %v5333_v9 = vrot.slane %v911_v5, 1  ;;  %v5346_v46 = vld [vmem:[%s4889_s11] sm:$0xf] }
 0x157   : > { %v1221_v16 = vpop.permute.xlu1 %1220  ;;  %v5359_v1 = vcombine.low %v5346_v46, %v5349_v0 }
 0x158   : > { %v1519_v36 = vpop.permute.xlu0 %1518  ;;  %v914_v6 = vsel %vm502_vm0, %v909_v30, %v5333_v9 }
 0x159   : > { %1555 = vrot.lane.b32.xlu1 %v5279_v58, %s3921_s4  ;;  %v1959_v17 = vsel %vm1921_vm10, %v1904_v22, %v1519_v36  ;;  %v6327_v22 = vld [vmem:[#allocation25_spill] sm:$0xff] }
 0x15a   : > { %1471 = vrot.lane.b32.xlu0 %v5122_v11, %s3920_s19  ;;  %v1605_v48 = vsel %vm1591_vm4, %v6328_v50, %v6327_v22  ;;  %v1143_v22 = vrot.slane %v5359_v1, 1  ;;  %v3830_v50 = vld [vmem:[%s4024_s12 + $0x70] sm:$0xf] }
 0x15b   : > { %v1192_v13 = vpop.permute.xlu1 %1191  ;;  %v1660_v27 = vsel %vm1646_vm5, %v1605_v48, %v1221_v16 }
 0x15c   : > { %v1574_v51 = vpop.permute.xlu0 %1573 }
 0x15d   : > { %v2014_v28 = vsel %vm6274_vm11, %v1959_v17, %v1574_v51  ;;  %1228 = vrot.lane.b32.xlu1 %v5043_v18, %s3916_s15  ;;  %v715_v51 = vshrl.u32 %v5250_v42, 16 }
 0x15e   : > { %1526 = vrot.lane.b32.xlu0 %v5297_v3, %s3919_s18  ;;  %3650 = vmatmul.mubr.msk.bf16.gmra.mrb[16].mxu1 %vm6272_vm12, %v2014_v28 }
 0x15f   : > { %v1247_v62 = vpop.permute.xlu1 %1246  ;;  %3653 = vmatprep.mubr.msk.bf16.mxu1 %vm6270_vm3, %v6317_v43  ;;  %v5389_v16 = vor.u32 %v715_v51, %v5285_v33 }
 0x160   : > { %v1276_v18 = vpop.permute.xlu0 %1275 }
 0x161   : > { %1199 = vrot.lane.b32.xlu1 %v5061_v31, %s3914_s13  ;;  %v1013_v31 = vor.u32 %v1011_v25, %v5232_v14  ;;  %v1103_v14 = vrot.slane %v5314_v34, 1  ;;  %v1715_v12 = vsel %vm1701_vm6, %v1660_v27, %v1276_v18  ;;  %v6329_v25 = vld [vmem:[#allocation20_spill] sm:$0xff]  ;;  %v6333_v27 = vrot.slane %v4187_v63, 1 }
 0x162   : > { %1581 = vrot.lane.b32.xlu0 %v5320_v39, %s3921_s4  ;;  %v1631_v7 = vsel %vm1591_vm4, %v6329_v25, %v1192_v13  ;;  %v1151_v25 = vsel %vm730_vm1, %v5300_v44, %v1143_v22 }
 0x163   : > { %v1302_v2 = vpop.permute.xlu1 %1301  ;;  %v1104_v17 = vsel %vm730_vm1, %v1101_v52, %v1103_v14 }
 0x164   : > { %v1331_v29 = vpop.permute.xlu0 %1330 }
 0x165   : > { %1254 = vrot.lane.b32.xlu1 %v5083_v37, %s3916_s15  ;;  %v1018_v37 = vsel %vm502_vm0, %v1013_v31, %v5340_v61  ;;  %v1770_v30 = vsel %vm1756_vm7, %v1715_v12, %v1331_v29 }
 0x166   : > { %1283 = vrot.lane.b32.xlu0 %v5174_v35, %s3915_s14  ;;  %v1039_v35 = vshll.u32 %v5359_v1, 16 }
 0x167   : > { %v1357_v21 = vpop.permute.xlu1 %1356 }
 0x168   : > { %v1386_v57 = vpop.permute.xlu0 %1385  ;;  %v5393_v18 = vrot.slane %v1039_v35, 1 }
 0x169   : > { %1309 = vrot.lane.b32.xlu1 %v5212_v19, %s3915_s14  ;;  %v1686_v19 = vsel %vm1646_vm5, %v1631_v7, %v1247_v62  ;;  %v1825_v52 = vsel %vm1811_vm8, %v1770_v30, %v1386_v57 }
 0x16a   : > { %1338 = vrot.lane.b32.xlu0 %v914_v6, %s3918_s17  ;;  %v1741_v13 = vsel %vm1701_vm6, %v1686_v19, %v1302_v2 }
 0x16b   : > { %v1412_v36 = vpop.permute.xlu1 %1411  ;;  %v1796_v6 = vsel %vm1756_vm7, %v1741_v13, %v1357_v21  ;;  %v1142_v21 = vsel %vm5398_vm14, %v5389_v16, %v5393_v18 }
 0x16c   : > { %v1440_v45 = vpop.permute.xlu0 %1439 }
 0x16d   : > { %1364 = vrot.lane.b32.xlu1 %v1018_v37, %s3918_s17  ;;  %v1880_v29 = vsel %vm1866_vm9, %v1825_v52, %v1440_v45  ;;  %v1851_v37 = vsel %vm1811_vm8, %v1796_v6, %v1412_v36  ;;  %v6332_v45 = vld [vmem:[#allocation12_spill] sm:$0xff]  ;;  %v3829_v36 = vld [vmem:[%s4024_s12 + $0x6c] sm:$0xf] }
 0x16e   : > { %1393 = vrot.lane.b32.xlu0 %v1078_v38, %s3917_s16  ;;  %v5419_v48 = vcombine.low %v3829_v36, %v3830_v50  ;;  %v5475_v36 = vld [vmem:[%s4889_s11 + $0x8] sm:$0xf]  ;;  %v363_v50 = vld [vmem:[%s4889_s11 + $0xc] sm:$0xf] }
 0x16f   : > { %v1466_v28 = vpop.permute.xlu1 %1465 }
 0x170   : > { %v1495_v5 = vpop.permute.xlu0 %1494  ;;  %v1906_v2 = vsel %vm1866_vm9, %v1851_v37, %v1466_v28  ;;  %v5427_v28 = vsel %vm730_vm1, %v756_v23, %v6333_v27  ;;  %v915_v23 = vshrl.u32 %v5304_v8, 16  ;;  %v919_v7 = vshll.u32 %v5419_v48, 16 }
 0x171   : > { %1419 = vrot.lane.b32.xlu1 %v1104_v17, %s3917_s16  ;;  %v1935_v33 = vsel %vm1921_vm10, %v1880_v29, %v1495_v5 }
 0x172   : > { %1447 = vrot.lane.b32.xlu0 %v6325_v24, %s3920_s19  ;;  %v917_v52 = vor.u32 %v915_v23, %v5333_v9  ;;  %v5448_v13 = vrot.slane %v919_v7, 1  ;;  %v1079_v9 = vrot.slane %v5419_v48, 1 }
 0x173   : > { %v1521_v31 = vpop.permute.xlu1 %1520 }
 0x174   : > { %v1550_v57 = vpop.permute.xlu0 %1549  ;;  %v1961_v17 = vsel %vm1921_vm10, %v1906_v2, %v1521_v31  ;;  %v5452_v31 = vcombine.low %v5236_v4, %v5236_v4 }
 0x175   : > { %v1990_v38 = vsel %vm6274_vm11, %v1935_v33, %v1550_v57  ;;  %1473 = vrot.lane.b32.xlu1 %v5250_v42, %s3920_s19  ;;  %v1019_v57 = vshrl.u32 %v5314_v34, 16 }
 0x176   : > { %1502 = vrot.lane.b32.xlu0 %v6332_v45, %s3919_s18  ;;  %3602 = vmatmul.mubr.msk.bf16.gmra.mrb[24].mxu0 %vm6272_vm12, %v1990_v38  ;;  %v1022_v4 = vshll.u32 %v5452_v31, 16 }
 0x177   : > { %v1576_v51 = vpop.permute.xlu1 %1575  ;;  %3605 = vmatprep.mubr.msk.bf16.mxu0 %vm6270_vm3, %v6317_v43  ;;  %v1021_v2 = vor.u32 %v1019_v57, %v5340_v61 }
 0x178   : > { %v2016_v12 = vsel %vm6274_vm11, %v1961_v17, %v1576_v51  ;;  %v1223_v5 = vpop.permute.xlu0 %1222  ;;  %v5472_v45 = vrot.slane %v1022_v4, 1  ;;  %v6334_v17 = vld [vmem:[#allocation24_spill] sm:$0xff] }
 0x179   : > { %1528 = vrot.lane.b32.xlu1 %v1142_v21, %s3919_s18  ;;  %3654 = vmatmul.mubr.msk.bf16.gmra.mrb[20].mxu1 %vm6272_vm12, %v2016_v12  ;;  %v6335_v51 = vld [vmem:[#allocation8_spill] sm:$0xff]  ;;  %v1105_v12 = vrot.slane %v5452_v31, 1 }
 0x17a   : > { %1557 = vrot.lane.b32.xlu0 %v5427_v28, %s3921_s4  ;;  %3657 = vmatprep.mubr.msk.bf16.mxu1 %vm6270_vm3, %v6317_v43  ;;  %v1607_v27 = vsel %vm1591_vm4, %v6335_v51, %v6334_v17 }
 0x17b   : > { %v1278_v30 = vpop.permute.xlu1 %1277  ;;  %v1106_v57 = vsel %vm730_vm1, %v1103_v14, %v1105_v12 }
 0x17c   : > { %v1194_v19 = vpop.permute.xlu0 %1193 }
 0x17d   : > { %1583 = vrot.lane.b32.xlu1 %v1151_v25, %s3921_s4  ;;  %v5490_v25 = vcombine.low %v5475_v36, %v363_v50 }
 0x17e   : > { %1230 = vrot.lane.b32.xlu0 %v5182_v41, %s3916_s15  ;;  %v922_v41 = vsel %vm502_vm0, %v917_v52, %v5448_v13 }
 0x17f   : > { %v1333_v29 = vpop.permute.xlu1 %1332 }
 0x180   : > { %v1249_v6 = vpop.permute.xlu0 %1248 }
 0x181   : > { %1285 = vrot.lane.b32.xlu1 %v5304_v8, %s3915_s14 }
 0x182   : > { %1201 = vrot.lane.b32.xlu0 %v5169_v40, %s3914_s13  ;;  %v1080_v40 = vsel %vm730_vm1, %v1077_v10, %v1079_v9  ;;  %v1025_v10 = vsel %vm502_vm0, %v1021_v2, %v5472_v45 }
 0x183   : > { %v1388_v33 = vpop.permute.xlu1 %1387 }
 0x184   : > { %v1304_v37 = vpop.permute.xlu0 %1303 }
 0x185   : > { %1340 = vrot.lane.b32.xlu1 %v922_v41, %s3918_s17 }
 0x186   : > { %1256 = vrot.lane.b32.xlu0 %v5197_v54, %s3916_s15  ;;  %v1662_v54 = vsel %vm1646_vm5, %v1607_v27, %v1223_v5 }
 0x187   : > { %v1442_v38 = vpop.permute.xlu1 %1441  ;;  %v1717_v8 = vsel %vm1701_vm6, %v1662_v54, %v1278_v30  ;;  %v6338_v54 = vld [vmem:[#allocation17_spill] sm:$0xff] }
 0x188   : > { %v1359_v21 = vpop.permute.xlu0 %1358  ;;  %v1772_v23 = vsel %vm1756_vm7, %v1717_v8, %v1333_v29  ;;  %v1036_v29 = vshrl.u32 %v5359_v1, 16 }
 0x189   : > { %1395 = vrot.lane.b32.xlu1 %v1080_v40, %s3917_s16  ;;  %v1827_v52 = vsel %vm1811_vm8, %v1772_v23, %v1388_v33  ;;  %v1047_v33 = vshll.u32 %v5490_v25, 16  ;;  %v6336_v40 = vld [vmem:[#allocation15_spill] sm:$0xff] }
 0x18a   : > { %1311 = vrot.lane.b32.xlu0 %v5314_v34, %s3915_s14  ;;  %v1882_v5 = vsel %vm1866_vm9, %v1827_v52, %v1442_v38  ;;  %v6337_v38 = vld [vmem:[#allocation23_spill] sm:$0xff]  ;;  %v1124_v50 = vor.u32 %v5393_v18, %v1036_v29 }
 0x18b   : > { %v1497_v61 = vpop.permute.xlu1 %1496  ;;  %v1633_v2 = vsel %vm1591_vm4, %v6337_v38, %v1194_v19  ;;  %v5521_v17 = vrot.slane %v1047_v33, 1  ;;  %v5564_v38 = vstv %s2366_s8 }
 0x18c   : > { %v1414_v7 = vpop.permute.xlu0 %1413  ;;  %v1937_v30 = vsel %vm1921_vm10, %v1882_v5, %v1497_v61  ;;  %v1688_v34 = vsel %vm1646_vm5, %v1633_v2, %v1249_v6  ;;  %v5570_v2 = vcombine.low %v5346_v46, %v5346_v46 }
 0x18d   : > { %1449 = vrot.lane.b32.xlu1 %v4187_v63, %s3920_s19  ;;  %v1743_v51 = vsel %vm1701_vm6, %v1688_v34, %v1304_v37  ;;  %v1126_v61 = vsel %vm502_vm0, %v1124_v50, %v5521_v17  ;;  %v1144_v37 = vrot.slane %v5490_v25, 1 }
 0x18e   : > { %1366 = vrot.lane.b32.xlu0 %v1025_v10, %s3918_s17  ;;  %v1798_v27 = vsel %vm1756_vm7, %v1743_v51, %v1359_v21  ;;  %v3831_v10 = vld [vmem:[%s4024_s12 + $0x74] sm:$0xf]  ;;  %v3832_v21 = vld [vmem:[%s4024_s12 + $0x78] sm:$0xf]  ;;  %v1038_v51 = vrot.slane %v1036_v29, 4  ;;  %s277_s12 = sand.u32 1, %s3896_s21  }
 0x18f   : > { %v1552_v41 = vpop.permute.xlu1 %1551  ;;  %v1853_v6 = vsel %vm1811_vm8, %v1798_v27, %v1414_v7  ;;  %v5538_v23 = vcombine.low %v3831_v10, %v3832_v21  ;;  %s3691_s28 = smul.u32 144, %s277_s12 }
 0x190   : > { %v1992_v4 = vsel %vm6274_vm11, %v1937_v30, %v1552_v41  ;;  %v1468_v63 = vpop.permute.xlu0 %1467  ;;  %v5551_v41 = vld [vmem:[%s6231_s3] ss:$0 sm:$0xff] }
 0x191   : > { %1504 = vrot.lane.b32.xlu1 %v6336_v40, %s3919_s18  ;;  %3606 = vmatmul.mubr.msk.bf16.gmra.mrb[28].mxu0 %vm6272_vm12, %v1992_v4  ;;  %v1908_v18 = vsel %vm1866_vm9, %v1853_v6, %v1468_v63  ;;  %v923_v4 = vshrl.u32 %v5419_v48, 16  ;;  %v1081_v29 = vrot.slane %v5538_v23, 1  ;;  %s5658_s30 = scalar_lea.vmem [#allocation3], %s3691_s28 }
 0x192   : > { %1421 = vrot.lane.b32.xlu0 %v1106_v57, %s3917_s16  ;;  %3609 = vmatprep.mubr.msk.bf16.mxu0 %vm6270_vm3, %v6317_v43  ;;  %v1145_v57 = vsel %vm730_vm1, %v1143_v22, %v1144_v37  ;;  %v1026_v22 = vshrl.u32 %v5452_v31, 16 }
 0x193   : > { %v5516_v14 = vpop.permute.xlu1 %1224 }
 0x194   : > { %v1523_v19 = vpop.permute.xlu0 %1522 }
 0x195   : > { %1559 = vrot.lane.b32.xlu1 %v6338_v54, %s3921_s4  ;;  %v1963_v52 = vsel %vm1921_vm10, %v1908_v18, %v1523_v19  ;;  %v1041_v19 = vrot.slane %v1039_v35, 5  ;;  %v822_v35 = vsel %vm820_vm15, %v5452_v31, %v5570_v2 }
 0x196   : > { %1475 = vrot.lane.b32.xlu0 %v5359_v1, %s3920_s19 }
 0x197   : > { %v5531_v8 = vpop.permute.xlu1 %1195 }
 0x198   : > { %v1578_v5 = vpop.permute.xlu0 %1577  ;;  %v1635_v31 = vsel %vm1591_vm4, %v4688_v49, %v5531_v8 }
 0x199   : > { %v2018_v7 = vsel %vm6274_vm11, %v1963_v52, %v1578_v5  ;;  %1232 = vrot.lane.b32.xlu1 %v5279_v58, %s3916_s15  ;;  %v927_v58 = vshll.u32 %v5538_v23, 16  ;;  %v5594_v5 = vor.u32 %v1041_v19, %v1038_v51  ;;  %v1082_v51 = vsel %vm730_vm1, %v1079_v9, %v1081_v29 }
 0x19a   : > { %1530 = vrot.lane.b32.xlu0 %v1126_v61, %s3919_s18  ;;  %3658 = vmatmul.mubr.msk.bf16.gmra.mrb[24].mxu1 %vm6272_vm12, %v2018_v7  ;;  %vm5600_vm12 = vmand %vm820_vm15, %vm1034_vm13  ;;  %v1108_v19 = vrot.slane %v5359_v1, 5  ;;  %vm3180_vm15 = vcmask 257024  }
 0x19b   : > { %v5546_v30 = vpop.permute.xlu1 %1250  ;;  %3661 = vmatprep.mubr.msk.bf16.mxu1 %vm6270_vm3, %v6317_v43  ;;  %v5580_v6 = vrot.slane %v927_v58, 1 }
 0x19c   : > { %v5562_v63 = vpop.permute.xlu0 %1279 }
 0x19d   : > { %v2151_v40 = vpop.f32.mrb[0].mxu0  ;;  %1203 = vrot.lane.b32.xlu1 %v5297_v3, %s3914_s13  ;;  %v925_v3 = vor.u32 %v923_v4, %v5448_v13  ;;  %v1028_v13 = vor.u32 %v1026_v22, %v5472_v45 }
 0x19e   : > { %v2152_v34 = vadd.f32 %v5551_v41, %v2151_v40  ;;  %v3579_v50 = vpop.f32.mrb[1].mxu0  ;;  %1585 = vrot.lane.b32.xlu0 %v1145_v57, %s3921_s4 }
 0x19f   : > { %v2154_v27 = vpop.f32.mrb[2].mxu0  ;;  %v5577_v54 = vpop.permute.xlu1 %1305  ;;  %v930_v57 = vsel %vm502_vm0, %v925_v3, %v5580_v6  ;;  %v1055_v50 = vsel %vm5600_vm12, %v1028_v13, %v5594_v5 }
 0x1a0   : > { %vm2367_vm2 = vcmp.ge.f32.partialorder %v2152_v34, 0.0  ;;  %v2422_v46 = vmul.f32 %v5564_v38, %v2152_v34  ;;  %v2155_v18 = vadd.f32 %v5551_v41, %v2154_v27  ;;  %v3580_v61 = vpop.f32.mrb[3].mxu0  ;;  %v1335_v10 = vpop.permute.xlu0 %1334  ;;  %v5619_v27 = vld [vmem:[%s4889_s11 + $0x10] sm:$0xff]  }
 0x1a1   : > { %1258 = vrot.lane.b32.xlu1 %v5320_v39, %s3916_s15 }
 0x1a2   : > { %v2476_v21 = vsel %vm2367_vm2, %v2152_v34, %v2422_v46  ;;  %vm2368_vm3 = vcmp.ge.f32.partialorder %v2155_v18, 0.0  ;;  %v2423_v52 = vmul.f32 %v5564_v38, %v2155_v18  ;;  %1287 = vrot.lane.b32.xlu0 %v5419_v48, %s3915_s14  ;;  %vm2710_vm2 = vsmask.f32 7440 }
 0x1a3   : > { %v3487_v7 = vpack.c.bf16 %v2476_v21, %v2476_v21  ;;  %v1361_v39 = vpop.permute.xlu1 %1360  ;;  %v6341_v21 = vld [vmem:[#allocation27_spill] sm:$0xff]  ;;  %vm5630_vm12 = vmor %vm1034_vm13, %vm2710_vm2  ;;  %vm6345_vm2 = vcmask 293888  }
 0x1a4   : > { %v2477_v4 = vsel %vm2368_vm3, %v2155_v18, %v2423_v52  ;;  %v1390_v58 = vpop.permute.xlu0 %1389  ;;  %vm6273_vm3 = vcmask 1042432   ;;  %v1609_v48 = vsel %vm1591_vm4, %v4130_v55, %v6341_v21  ;;  %v6344_v21 = vld [vmem:[#allocation14_spill] sm:$0xff] }
 0x1a5   : > { %v2713_v40 = vshrl.u32 %v3487_v7, 16  ;;  %v2716_v22 = vshll.u32 %v3487_v7, 16  ;;  %v5605_v34 = vpack.c.bf16 %v2477_v4, %v2477_v4  ;;  %1313 = vrot.lane.b32.xlu1 %v822_v35, %s3915_s14  ;;  %v1114_v52 = vsel %vm6273_vm3, %v1105_v12, %v1108_v19 }
 0x1a6   : > { %1342 = vrot.lane.b32.xlu0 %v930_v57, %s3918_s17  ;;  %v1044_v7 = vshrl.u32 %v5490_v25, 16  ;;  %v1129_v57 = vshll.u32 %v5619_v27, 16  ;;  %v1664_v55 = vsel %vm1646_vm5, %v1609_v48, %v5516_v14  ;;  %v1690_v14 = vsel %vm1646_vm5, %v1635_v31, %v5546_v30 }
 0x1a7   : > { %v2715_v3 = vrot.slane %v2713_v40, 4  ;;  %v2718_v46 = vrot.slane %v2716_v22, 5  ;;  %v2722_v18 = vshll.u32 %v5605_v34, 16  ;;  %v1416_v61 = vpop.permute.xlu1 %1415  ;;  %v1719_v22 = vsel %vm1701_vm6, %v1664_v55, %v5562_v63 }
 0x1a8   : > { %v1444_v35 = vpop.permute.xlu0 %1443  ;;  %v1127_v49 = vor.u32 %v5521_v17, %v1044_v7  ;;  %v5668_v8 = vrot.slane %v1129_v57, 1  ;;  %vm6346_vm3 = vmmov 0  }
 0x1a9   : > { %v2719_v13 = vor.u32 %v2718_v46, %v2715_v3  ;;  %1368 = vrot.lane.b32.xlu1 %v1055_v50, %s3918_s17  ;;  %v5644_v4 = vrot.slane %v2722_v18, 5 }
 0x1aa   : > { %1397 = vrot.lane.b32.xlu0 %v1082_v51, %s3917_s16  ;;  %v1774_v51 = vsel %vm1756_vm7, %v1719_v22, %v1335_v10  ;;  %v1745_v10 = vsel %vm1701_vm6, %v1690_v14, %v5577_v54  ;;  %v1132_v54 = vsel %vm502_vm0, %v1127_v49, %v5668_v8 }
 0x1ab   : > { %v2720_v45 = vrot.slane %v2719_v13, 4  ;;  %v1470_v40 = vpop.permute.xlu1 %1469  ;;  %v1829_v63 = vsel %vm1811_vm8, %v1774_v51, %v1390_v58  ;;  %v1800_v46 = vsel %vm1756_vm7, %v1745_v10, %v1361_v39  ;;  %v1146_v39 = vrot.slane %v5619_v27, 1 }
 0x1ac   : > { %v1499_v50 = vpop.permute.xlu0 %1498  ;;  %v1884_v30 = vsel %vm1866_vm9, %v1829_v63, %v1444_v35  ;;  %v1855_v13 = vsel %vm1811_vm8, %v1800_v46, %v1416_v61  ;;  %v2726_v35 = vshrl.u32 %v5605_v34, 16 }
 0x1ad   : > { %v2725_v12 = vsel %vm5630_vm12, %v2720_v45, %v5644_v4  ;;  %1423 = vrot.lane.b32.xlu1 %v1114_v52, %s3917_s16  ;;  %v1939_v18 = vsel %vm1921_vm10, %v1884_v30, %v1499_v50  ;;  %v1910_v17 = vsel %vm1866_vm9, %v1855_v13, %v1470_v40  ;;  %v723_v52 = vshll.u32 %v5570_v2, 16  ;;  %v6347_v50 = vld [vmem:[#allocation19_spill] sm:$0xff] }
 0x1ae   : > { %3181 = vst.msk [vmem:[%s5658_s30] sm:$0xf] %vm3180_vm15, %v2725_v12  ;;  %1451 = vrot.lane.b32.xlu0 %v4200_v20, %s3920_s19  ;;  %v931_v40 = vshrl.u32 %v5538_v23, 16  ;;  %v1147_v31 = vsel %vm730_vm1, %v1144_v37, %v1146_v39  ;;  %v2728_v12 = vrot.slane %v2726_v35, 4  ;;  %v784_v37 = vrot.slane %v5570_v2, 1 }
 0x1af   : > { %v1525_v3 = vpop.permute.xlu1 %1524  ;;  %v725_v63 = vrot.slane %v723_v52, 1 }
 0x1b0   : > { %v1554_v58 = vpop.permute.xlu0 %1553  ;;  %v1965_v61 = vsel %vm1921_vm10, %v1910_v17, %v1525_v3  ;;  %v933_v46 = vor.u32 %v931_v40, %v5580_v6 }
 0x1b1   : > { %v1994_v20 = vsel %vm6274_vm11, %v1939_v18, %v1554_v58  ;;  %1477 = vrot.lane.b32.xlu1 %v5490_v25, %s3920_s19  ;;  %v729_v35 = vsel %vm5398_vm14, %v5389_v16, %v725_v63  ;;  %v1046_v16 = vrot.slane %v1044_v7, 4 }
 0x1b2   : > { %1506 = vrot.lane.b32.xlu0 %v6344_v21, %s3919_s18  ;;  %3610 = vmatmul.mubr.msk.bf16.gmra.mrb[32].mxu0 %vm6345_vm2, %v1994_v20  ;;  %v2729_v20 = vor.u32 %v2728_v12, %v5644_v4  ;;  %v1049_v12 = vrot.slane %v1047_v33, 5  ;;  %v6349_v33 = vld [vmem:[#allocation16_spill] sm:$0xff] }
 0x1b3   : > { %v1580_v48 = vpop.permute.xlu1 %1579  ;;  %3613 = vmatprep.mubr.msk.bf16.mxu0 %vm6346_vm3, %v6317_v43 }
 0x1b4   : > { %v2020_v57 = vsel %vm6274_vm11, %v1965_v61, %v1580_v48  ;;  %v5692_v55 = vpop.permute.xlu0 %1226 }
 0x1b5   : > { %v2159_v45 = vpop.f32.mrb[4].mxu0  ;;  %1532 = vrot.lane.b32.xlu1 %v1132_v54, %s3919_s18  ;;  %3662 = vmatmul.mubr.msk.bf16.gmra.mrb[28].mxu1 %vm6345_vm2, %v2020_v57  ;;  %v788_v57 = vsel %vm730_vm1, %v5300_v44, %v784_v37  ;;  %v6350_v37 = vrot.slane %v6349_v33, 1 }
 0x1b6   : > { %v2160_v34 = vadd.f32 %v5551_v41, %v2159_v45  ;;  %v3583_v22 = vpop.f32.mrb[5].mxu0  ;;  %1561 = vrot.lane.b32.xlu0 %v6347_v50, %s3921_s4  ;;  %3665 = vmatprep.mubr.msk.bf16.mxu1 %vm6346_vm3, %v6317_v43 }
 0x1b7   : > { %v2162_v51 = vpop.f32.mrb[6].mxu0  ;;  %v5707_v14 = vpop.permute.xlu1 %1281 }
 0x1b8   : > { %vm2369_vm2 = vcmp.ge.f32.partialorder %v2160_v34, 0.0  ;;  %v2424_v49 = vmul.f32 %v5564_v38, %v2160_v34  ;;  %v3584_v10 = vpop.f32.mrb[7].mxu0  ;;  %v5710_v30 = vpop.permute.xlu0 %1197  ;;  %v2163_v62 = vadd.f32 %v5551_v41, %v2162_v51 }
 0x1b9   : > { %v2263_v3 = vpop.f32.mrb[0].mxu1  ;;  %1587 = vrot.lane.b32.xlu1 %v1147_v31, %s3921_s4 }
 0x1ba   : > { %v2478_v18 = vsel %vm2369_vm2, %v2160_v34, %v2424_v49  ;;  %v2264_v58 = vadd.f32 %v5551_v41, %v2263_v3  ;;  %v3635_v13 = vpop.f32.mrb[1].mxu1  ;;  %1234 = vrot.lane.b32.xlu0 %v5427_v28, %s3916_s15  ;;  %v6348_v28 = vld [vmem:[#allocation18_spill] sm:$0xff]  ;;  %v2730_v34 = vrot.slane %v2729_v20, 4  ;;  %v3392_v49 = vcombine.low %v5349_v0, %v5475_v36 }
 0x1bb   : > { %v3489_v17 = vpack.c.bf16 %v2478_v18, %v2478_v18  ;;  %v2266_v21 = vpop.f32.mrb[2].mxu1  ;;  %v1337_v54 = vpop.permute.xlu1 %1336  ;;  %v938_v4 = vsel %vm502_vm0, %v933_v46, %v6348_v28  ;;  %v2425_v10 = vmul.f32 %v5564_v38, %v2163_v62  ;;  %v1084_v18 = vsel %vm730_vm1, %v1081_v29, %v6350_v37  ;;  %v3820_v28 = vld [vmem:[%s4889_s11 + $0x18] ss:$0 sps:$4 sm:$0xff]   ;;  %s3924_s11 = smov [#allocation3]  }
 0x1bc   : > { %vm2395_vm11 = vcmp.ge.f32.partialorder %v2264_v58, 0.0  ;;  %v2450_v6 = vmul.f32 %v5564_v38, %v2264_v58  ;;  %v2267_v2 = vadd.f32 %v5551_v41, %v2266_v21  ;;  %v3636_v61 = vpop.f32.mrb[3].mxu1  ;;  %v5724_v48 = vpop.permute.xlu0 %1252  ;;  %v1050_v0 = vor.u32 %v1049_v12, %v1046_v16  ;;  %v6351_v21 = vld [vmem:[#allocation26_spill] sm:$0xff]  ;;  %s3838_s8 = sshll.u32 %s3924_s11, 4  ;;  %s3839_s8 = int_to_ptr.vmem [resolvable:$false] %s3838_s8 }
 0x1bd   : > { %v2732_v52 = vshll.u32 %v3489_v17, 16  ;;  %1289 = vrot.lane.b32.xlu1 %v5538_v23, %s3915_s14  ;;  %vm6353_vm2 = vcmask 261120   ;;  %v1148_v1 = vrot.slane %v3820_v28, 1  ;;  %s3840_s9 = scalar_lea.vmem %s3839_s8, 4608 }
 0x1be   : > { %v2504_v45 = vsel %vm2395_vm11, %v2264_v58, %v2450_v6  ;;  %vm2396_vm14 = vcmp.ge.f32.partialorder %v2267_v2, 0.0  ;;  %v2451_v40 = vmul.f32 %v5564_v38, %v2267_v2  ;;  %1205 = vrot.lane.b32.xlu0 %v729_v35, %s3914_s13  ;;  %vm2370_vm11 = vcmp.ge.f32.partialorder %v2163_v62, 0.0 }
 0x1bf   : > { %v2734_v22 = vrot.slane %v2732_v52, 5  ;;  %v3515_v50 = vpack.c.bf16 %v2504_v45, %v2504_v45  ;;  %v1392_v31 = vpop.permute.xlu1 %1391  ;;  %v1611_v35 = vsel %vm1591_vm4, %v4135_v59, %v6351_v21  ;;  %v2479_v6 = vsel %vm2370_vm11, %v2163_v62, %v2425_v10 }
 0x1c0   : > { %v2505_v44 = vsel %vm2396_vm14, %v2267_v2, %v2451_v40  ;;  %v1308_v63 = vpop.permute.xlu0 %1307  ;;  %v1666_v23 = vsel %vm1646_vm5, %v1611_v35, %v5692_v55  ;;  %v1051_v52 = vsel %vm1034_vm13, %v5594_v5, %v1050_v0  ;;  %v1109_v59 = vrot.slane %v5490_v25, 5 }
 0x1c1   : > { %v2735_v7 = vsel %vm5630_vm12, %v2730_v34, %v2734_v22  ;;  %v2938_v51 = vshll.u32 %v3515_v50, 16  ;;  %1344 = vrot.lane.b32.xlu1 %v938_v4, %s3918_s17  ;;  %v2942_v3 = vshrl.u32 %v3515_v50, 16  ;;  %v3516_v46 = vpack.c.bf16 %v2505_v44, %v2505_v44  ;;  %v6354_v44 = vld [vmem:[#allocation21_spill] sm:$0xff] }
 0x1c2   : > { %3182 = vst.msk [vmem:[%s5658_s30 + $0x4] sm:$0xf] %vm3180_vm15, %v2735_v7  ;;  %1260 = vrot.lane.b32.xlu0 %v788_v57, %s3916_s15  ;;  %v1721_v2 = vsel %vm1701_vm6, %v1666_v23, %v5707_v14  ;;  %v3490_v62 = vpack.c.bf16 %v2479_v6, %v2479_v6  ;;  %vm6352_vm13 = vcmask 1042432   ;;  %v1133_v34 = vshrl.u32 %v5619_v27, 16 }
 0x1c3   : > { %v5753_v58 = vrot.slane %v2938_v51, 5  ;;  %v1446_v13 = vpop.permute.xlu1 %1445  ;;  %v2944_v36 = vrot.slane %v2942_v3, 4  ;;  %v2948_v20 = vshll.u32 %v3516_v46, 16  ;;  %v1776_v55 = vsel %vm1756_vm7, %v1721_v2, %v1337_v54 }
 0x1c4   : > { %v1363_v17 = vpop.permute.xlu0 %1362  ;;  %v1831_v45 = vsel %vm1811_vm8, %v1776_v55, %v1392_v31  ;;  %v1110_v54 = vsel %vm6352_vm13, %v1108_v19, %v1109_v59  ;;  %v1137_v22 = vshll.u32 %v3820_v28, 16  ;;  %v2737_v31 = vshrl.u32 %v3490_v62, 16  ;;  %vm6357_vm13 = vmmov %vm6353_vm2 }
 0x1c5   : > { %1399 = vrot.lane.b32.xlu1 %v1084_v18, %s3917_s16  ;;  %v2945_v29 = vor.u32 %v2944_v36, %v5753_v58  ;;  %v2950_v57 = vrot.slane %v2948_v20, 5  ;;  %v1886_v40 = vsel %vm1866_vm9, %v1831_v45, %v1446_v13  ;;  %v2740_v12 = vshll.u32 %v3490_v62, 16  ;;  %v6356_v18 = vld [vmem:[#allocation22_spill] sm:$0xff] }
 0x1c6   : > { %1315 = vrot.lane.b32.xlu0 %v3392_v49, %s3915_s14  ;;  %vm6355_vm14 = vcmask 293888   ;;  %v1637_v7 = vsel %vm1591_vm4, %v4779_v56, %v5710_v30  ;;  %v1135_v49 = vor.u32 %v1133_v34, %v5668_v8  ;;  %v1139_v10 = vrot.slane %v1137_v22, 1 }
 0x1c7   : > { %v1501_v61 = vpop.permute.xlu1 %1500  ;;  %v2946_v4 = vrot.slane %v2945_v29, 4  ;;  %v1692_v19 = vsel %vm1646_vm5, %v1637_v7, %v5724_v48  ;;  %v2739_v33 = vrot.slane %v2737_v31, 4  ;;  %v2742_v37 = vrot.slane %v2740_v12, 5 }
 0x1c8   : > { %v1418_v16 = vpop.permute.xlu0 %1417  ;;  %v1941_v25 = vsel %vm1921_vm10, %v1886_v40, %v1501_v61  ;;  %v1747_v3 = vsel %vm1701_vm6, %v1692_v19, %v1308_v63  ;;  %v1149_v8 = vsel %vm730_vm1, %v1146_v39, %v1148_v1 }
 0x1c9   : > { %1453 = vrot.lane.b32.xlu1 %v4210_v26, %s3920_s19  ;;  %v2951_v14 = vsel %vm5630_vm12, %v2946_v4, %v2950_v57  ;;  %v1802_v56 = vsel %vm1756_vm7, %v1747_v3, %v1363_v17  ;;  %v1140_v17 = vsel %vm502_vm0, %v1135_v49, %v1139_v10  ;;  %v2743_v2 = vor.u32 %v2742_v37, %v2739_v33  ;;  %vm6358_vm0 = vmmov %vm6355_vm14 }
 0x1ca   : > { %1370 = vrot.lane.b32.xlu0 %v1051_v52, %s3918_s17  ;;  %3200 = vst.msk [vmem:[%s5658_s30 + $0x4c] sm:$0xf] %vm3180_vm15, %v2951_v14  ;;  %v1857_v13 = vsel %vm1811_vm8, %v1802_v56, %v1418_v16  ;;  %s3234_s17 = sshll.u32 %s5658_s30, 4  ;;  %s6173_s17 = int_to_ptr.vmem [resolvable:$true] %s3234_s17 }
 0x1cb   : > { %v1556_v5 = vpop.permute.xlu1 %1555  ;;  %v2744_v34 = vrot.slane %v2743_v2, 4  ;;  %s3834_s10 = scalar_lea.vmem %s6173_s17, 2304  ;;  %p3841_p1 = scmp.lt.s32.totalorder %s6173_s17, %s3839_s8 }
 0x1cc   : > { %v1996_v26 = vsel %vm6353_vm2, %v1941_v25, %v1556_v5  ;;  %v1472_v50 = vpop.permute.xlu0 %1471  ;;  %p3835_p12 = scmp.ne.s32.totalorder %s6173_s17, %s3834_s10  ;;  %p3842_p2 = scmp.lt.s32.totalorder %s3840_s9, %s3834_s10 }
 0x1cd   : > { %1508 = vrot.lane.b32.xlu1 %v6354_v44, %s3919_s18  ;;  %3614 = vmatmul.mubr.msk.bf16.gmra.mrb[36].mxu0 %vm6355_vm14, %v1996_v26  ;;  %v1912_v63 = vsel %vm1866_vm9, %v1857_v13, %v1472_v50 }
 0x1ce   : > { %1425 = vrot.lane.b32.xlu0 %v1110_v54, %s3917_s16  ;;  %3617 = vmatprep.mubr.msk.bf16.mxu0 %vm6346_vm3, %v6317_v43  ;;  %s3694_s16 = smul.u32 2304, %s3904_s23  ;;  %p3836_p13 = pnand %p3835_p12, %p3999_p4 }
 0x1cf   : > { %v5796_v51 = vpop.permute.xlu1 %1228  ;;  %p3843_p3 = por %p3842_p2, %p3841_p1 }
 0x1d0   : > { %v1527_v46 = vpop.permute.xlu0 %1526  ;;  %s6171_s23 = scalar_lea.hbm %s6233_s5, %s3694_s16  ;;  %p3837_p0 = pneg %p3836_p13 }
 0x1d1   : > { %v2167_v30 = vpop.f32.mrb[8].mxu0  ;;  %1563 = vrot.lane.b32.xlu1 %v6356_v18, %s3921_s4  ;;  %v1967_v21 = vsel %vm1921_vm10, %v1912_v63, %v1527_v46 }
 0x1d2   : > { %v2168_v48 = vadd.f32 %v5551_v41, %v2167_v30  ;;  %v3587_v0 = vpop.f32.mrb[9].mxu0  ;;  %1479 = vrot.lane.b32.xlu0 %v5619_v27, %s3920_s19  ;;  %p3844_p5 = pnand %p3843_p3, %p3837_p0 }
 0x1d3   : > { %v2170_v36 = vpop.f32.mrb[10].mxu0  ;;  %v5811_v20 = vpop.permute.xlu1 %1199 }
 0x1d4   : > { %vm2371_vm11 = vcmp.ge.f32.partialorder %v2168_v48, 0.0  ;;  %v2426_v35 = vmul.f32 %v5564_v38, %v2168_v48  ;;  %v2171_v23 = vadd.f32 %v5551_v41, %v2170_v36  ;;  %v3588_v6 = vpop.f32.mrb[11].mxu0  ;;  %v1582_v29 = vpop.permute.xlu0 %1581 }
 0x1d5   : > { %v2022_v27 = vsel %vm6357_vm13, %v1967_v21, %v1582_v29  ;;  %v2271_v39 = vpop.f32.mrb[4].mxu1  ;;  %1589 = vrot.lane.b32.xlu1 %v1149_v8, %s3921_s4  ;;  %s6181_s4 = scalar_lea.sflag [#allocation4], %s277_s12 }
 0x1d6   : > { %v2480_v61 = vsel %vm2371_vm11, %v2168_v48, %v2426_v35  ;;  %vm2372_vm1 = vcmp.ge.f32.partialorder %v2171_v23, 0.0  ;;  %v2427_v52 = vmul.f32 %v5564_v38, %v2171_v23  ;;  %v2272_v59 = vadd.f32 %v5551_v41, %v2271_v39  ;;  %v3639_v28 = vpop.f32.mrb[5].mxu1  ;;  %1534 = vrot.lane.b32.xlu0 %v1140_v17, %s3919_s18  ;;  %3666 = vmatmul.mubr.msk.bf16.gmra.mrb[32].mxu1 %vm6358_vm0, %v2022_v27  ;;  %vm6360_vm11 = vmmov %vm6357_vm13 }
 0x1d7   : > { %v3491_v4 = vpack.c.bf16 %v2480_v61, %v2480_v61  ;;  %v2274_v57 = vpop.f32.mrb[6].mxu1  ;;  %v1255_v55 = vpop.permute.xlu1 %1254  ;;  %3669 = vmatprep.mubr.msk.bf16.mxu1 %vm6346_vm3, %v6317_v43  ;;  %vm6361_vm13 = vmmov %vm6358_vm0 }
 0x1d8   : > { %v2481_v16 = vsel %vm2372_vm1, %v2171_v23, %v2427_v52  ;;  %vm2397_vm2 = vcmp.ge.f32.partialorder %v2272_v59, 0.0  ;;  %v2452_v62 = vmul.f32 %v5564_v38, %v2272_v59  ;;  %v2275_v45 = vadd.f32 %v5551_v41, %v2274_v57  ;;  %v3640_v14 = vpop.f32.mrb[7].mxu1  ;;  %v1284_v40 = vpop.permute.xlu0 %1283  ;;  %v6359_v23 = vld [vmem:[#allocation29_spill] sm:$0xff]  ;;  %vm6362_vm0 = vmmov %vm6360_vm11 }
 0x1d9   : > { %v2746_v25 = vshll.u32 %v3491_v4, 16  ;;  %v2750_v5 = vshrl.u32 %v3491_v4, 16  ;;  %v3492_v54 = vpack.c.bf16 %v2481_v16, %v2481_v16  ;;  %v1613_v6 = vsel %vm1591_vm4, %v4137_v60, %v6359_v23 }
 0x1da   : > { %v2506_v22 = vsel %vm2397_vm2, %v2272_v59, %v2452_v62  ;;  %vm2398_vm14 = vcmp.ge.f32.partialorder %v2275_v45, 0.0  ;;  %v2453_v26 = vmul.f32 %v5564_v38, %v2275_v45  ;;  %v1668_v2 = vsel %vm1646_vm5, %v1613_v6, %v5796_v51 }
 0x1db   : > { %v2748_v50 = vrot.slane %v2746_v25, 5  ;;  %v2752_v31 = vrot.slane %v2750_v5, 4  ;;  %v2756_v12 = vshll.u32 %v3492_v54, 16  ;;  %v3517_v44 = vpack.c.bf16 %v2506_v22, %v2506_v22  ;;  %v1310_v7 = vpop.permute.xlu1 %1309 }
 0x1dc   : > { %v2507_v1 = vsel %vm2398_vm14, %v2275_v45, %v2453_v26  ;;  %v1339_v19 = vpop.permute.xlu0 %1338  ;;  %v1723_v39 = vsel %vm1701_vm6, %v1668_v2, %v1284_v40  ;;  %v1639_v52 = vsel %vm1591_vm4, %v4884_v53, %v5811_v20  ;;  %vm6363_vm14 = vmmov %vm6361_vm13 }
 0x1dd   : > { %v2749_v49 = vsel %vm5630_vm12, %v2744_v34, %v2748_v50  ;;  %v2753_v10 = vor.u32 %v2752_v31, %v2748_v50  ;;  %v2953_v3 = vshrl.u32 %v3517_v44, 16  ;;  %v2956_v46 = vshll.u32 %v3517_v44, 16 }
 0x1de   : > { %3183 = vst.msk [vmem:[%s5658_s30 + $0x8] sm:$0xf] %vm3180_vm15, %v2749_v49  ;;  %v5832_v33 = vpack.c.bf16 %v2507_v1, %v2507_v1  ;;  %v2758_v56 = vrot.slane %v2756_v12, 5  ;;  %v1778_v59 = vsel %vm1756_vm7, %v1723_v39, %v1339_v19  ;;  %v1694_v60 = vsel %vm1646_vm5, %v1639_v52, %v1255_v55 }
 0x1df   : > { %v2754_v37 = vrot.slane %v2753_v10, 4  ;;  %v2955_v30 = vrot.slane %v2953_v3, 4  ;;  %v1365_v18 = vpop.permute.xlu1 %1364  ;;  %v2958_v13 = vrot.slane %v2956_v46, 5  ;;  %v1749_v4 = vsel %vm1701_vm6, %v1694_v60, %v1310_v7 }
 0x1e0   : > { %v2962_v48 = vshll.u32 %v5832_v33, 16  ;;  %v1394_v0 = vpop.permute.xlu0 %1393  ;;  %v1804_v16 = vsel %vm1756_vm7, %v1749_v4, %v1365_v18  ;;  %v2966_v10 = vshrl.u32 %v5832_v33, 16 }
 0x1e1   : > { %v2759_v8 = vsel %vm5630_vm12, %v2754_v37, %v2758_v56  ;;  %v2959_v63 = vor.u32 %v2958_v13, %v2955_v30  ;;  %v1833_v28 = vsel %vm1811_vm8, %v1778_v59, %v1394_v0 }
 0x1e2   : > { %3184 = vst.msk [vmem:[%s5658_s30 + $0xc] sm:$0xf] %vm3180_vm15, %v2759_v8  ;;  %v5839_v21 = vrot.slane %v2962_v48, 5 }
 0x1e3   : > { %v1420_v36 = vpop.permute.xlu1 %1419  ;;  %v2960_v17 = vrot.slane %v2959_v63, 4 }
 0x1e4   : > { %v1448_v35 = vpop.permute.xlu0 %1447  ;;  %v1859_v40 = vsel %vm1811_vm8, %v1804_v16, %v1420_v36 }
 0x1e5   : > { %v2965_v29 = vsel %vm5630_vm12, %v2960_v17, %v5839_v21  ;;  %v1888_v51 = vsel %vm1866_vm9, %v1833_v28, %v1448_v35  ;;  %v2968_v17 = vrot.slane %v2966_v10, 4 }
 0x1e6   : > { %3201 = vst.msk [vmem:[%s5658_s30 + $0x50] sm:$0xf] %vm3180_vm15, %v2965_v29 }
 0x1e7   : > { %v1474_v27 = vpop.permute.xlu1 %1473 }
 0x1e8   : > { %v1503_v61 = vpop.permute.xlu0 %1502  ;;  %v1914_v25 = vsel %vm1866_vm9, %v1859_v40, %v1474_v27 }
 0x1e9   : > { %v1943_v62 = vsel %vm1921_vm10, %v1888_v51, %v1503_v61  ;;  %v2969_v61 = vor.u32 %v2968_v17, %v5839_v21 }
 0x1eb   : > { %v1529_v57 = vpop.permute.xlu1 %1528  ;;  %v2970_v51 = vrot.slane %v2969_v61, 4 }
 0x1ec   : > { %v1558_v45 = vpop.permute.xlu0 %1557  ;;  %v2175_v14 = vpop.f32.mrb[12].mxu0  ;;  %v1969_v54 = vsel %vm1921_vm10, %v1914_v25, %v1529_v57 }
 0x1ed   : > { %v1998_v53 = vsel %vm6360_vm11, %v1943_v62, %v1558_v45  ;;  %v2176_v20 = vadd.f32 %v5551_v41, %v2175_v14  ;;  %v3591_v55 = vpop.f32.mrb[13].mxu0  ;;  %v6364_v45 = vld [vmem:[#allocation28_spill] sm:$0xff] }
 0x1ee   : > { %3618 = vmatmul.mubr.msk.bf16.gmra.mrb[40].mxu0 %vm6361_vm13, %v1998_v53  ;;  %v2178_v5 = vpop.f32.mrb[14].mxu0  ;;  %v1615_v14 = vsel %vm1591_vm4, %v4159_v32, %v6364_v45 }
 0x1ef   : > { %vm2373_vm1 = vcmp.ge.f32.partialorder %v2176_v20, 0.0  ;;  %v2428_v34 = vmul.f32 %v5564_v38, %v2176_v20  ;;  %v2179_v22 = vadd.f32 %v5551_v41, %v2178_v5  ;;  %v1584_v26 = vpop.permute.xlu1 %1583  ;;  %v3592_v50 = vpop.f32.mrb[15].mxu0  ;;  %3621 = vmatprep.mubr.msk.bf16.mxu0 %vm6346_vm3, %v6317_v43 }
 0x1f0   : > { %v2024_v31 = vsel %vm6362_vm0, %v1969_v54, %v1584_v26  ;;  %v1231_v12 = vpop.permute.xlu0 %1230 }
 0x1f1   : > { %v2482_v44 = vsel %vm2373_vm1, %v2176_v20, %v2428_v34  ;;  %vm2374_vm2 = vcmp.ge.f32.partialorder %v2179_v22, 0.0  ;;  %v2429_v7 = vmul.f32 %v5564_v38, %v2179_v22  ;;  %3670 = vmatmul.mubr.msk.bf16.gmra.mrb[36].mxu1 %vm6363_vm14, %v2024_v31  ;;  %v1670_v21 = vsel %vm1646_vm5, %v1615_v14, %v1231_v12  ;;  %vm6365_vm1 = vmmov %vm6362_vm0 }
 0x1f2   : > { %v3493_v1 = vpack.c.bf16 %v2482_v44, %v2482_v44  ;;  %3673 = vmatprep.mubr.msk.bf16.mxu1 %vm6346_vm3, %v6317_v43  ;;  %vm6366_vm0 = vmmov %vm6363_vm14 }
 0x1f3   : > { %v2483_v19 = vsel %vm2374_vm2, %v2179_v22, %v2429_v7  ;;  %v1286_v49 = vpop.permute.xlu1 %1285  ;;  %vm6367_vm14 = vmmov %vm6365_vm1 }
 0x1f4   : > { %v2761_v3 = vshrl.u32 %v3493_v1, 16  ;;  %v2764_v46 = vshll.u32 %v3493_v1, 16  ;;  %v3494_v37 = vpack.c.bf16 %v2483_v19, %v2483_v19  ;;  %v1202_v56 = vpop.permute.xlu0 %1201  ;;  %v1725_v53 = vsel %vm1701_vm6, %v1670_v21, %v1286_v49 }
 0x1f5   : > { %v2279_v30 = vpop.f32.mrb[8].mxu1  ;;  %v1641_v12 = vsel %vm1591_vm4, %v5014_v15, %v1202_v56 }
 0x1f6   : > { %v2763_v18 = vrot.slane %v2761_v3, 4  ;;  %v2766_v13 = vrot.slane %v2764_v46, 5  ;;  %v2770_v48 = vshll.u32 %v3494_v37, 16  ;;  %v3643_v0 = vpop.f32.mrb[9].mxu1  ;;  %v2280_v8 = vadd.f32 %v5551_v41, %v2279_v30 }
 0x1f7   : > { %v2282_v63 = vpop.f32.mrb[10].mxu1  ;;  %v1341_v36 = vpop.permute.xlu1 %1340  ;;  %v2774_v44 = vshrl.u32 %v3494_v37, 16 }
 0x1f8   : > { %v2767_v35 = vor.u32 %v2766_v13, %v2763_v18  ;;  %v3644_v23 = vpop.f32.mrb[11].mxu1  ;;  %v1257_v6 = vpop.permute.xlu0 %1256  ;;  %vm2399_vm11 = vcmp.ge.f32.partialorder %v2280_v8, 0.0  ;;  %v2454_v33 = vmul.f32 %v5564_v38, %v2280_v8  ;;  %v5880_v2 = vrot.slane %v2770_v48, 5 }
 0x1f9   : > { %v2283_v16 = vadd.f32 %v5551_v41, %v2282_v63  ;;  %v1780_v25 = vsel %vm1756_vm7, %v1725_v53, %v1341_v36  ;;  %v1696_v1 = vsel %vm1646_vm5, %v1641_v12, %v1257_v6  ;;  %v2776_v56 = vrot.slane %v2774_v44, 4 }
 0x1fa   : > { %v2768_v29 = vrot.slane %v2767_v35, 4  ;;  %v2508_v27 = vsel %vm2399_vm11, %v2280_v8, %v2454_v33  ;;  %vm6368_vm11 = vmmov %vm6366_vm0 }
 0x1fb   : > { %v1396_v39 = vpop.permute.xlu1 %1395  ;;  %v3519_v59 = vpack.c.bf16 %v2508_v27, %v2508_v27  ;;  %v2455_v55 = vmul.f32 %v5564_v38, %v2283_v16  ;;  %vm2400_vm13 = vcmp.ge.f32.partialorder %v2283_v16, 0.0 }
 0x1fc   : > { %v2773_v52 = vsel %vm5630_vm12, %v2768_v29, %v5880_v2  ;;  %v1312_v60 = vpop.permute.xlu0 %1311  ;;  %v1835_v54 = vsel %vm1811_vm8, %v1780_v25, %v1396_v39  ;;  %v2777_v39 = vor.u32 %v2776_v56, %v5880_v2 }
 0x1fd   : > { %3185 = vst.msk [vmem:[%s5658_s30 + $0x10] sm:$0xf] %vm3180_vm15, %v2773_v52  ;;  %v2972_v28 = vshll.u32 %v3519_v59, 16  ;;  %v2509_v26 = vsel %vm2400_vm13, %v2283_v16, %v2455_v55  ;;  %v1751_v49 = vsel %vm1701_vm6, %v1696_v1, %v1312_v60 }
 0x1fe   : > { %v3520_v7 = vpack.c.bf16 %v2509_v26, %v2509_v26  ;;  %v2778_v21 = vrot.slane %v2777_v39, 4 }
 0x1ff   : > { %v1450_v4 = vpop.permute.xlu1 %1449  ;;  %v2974_v57 = vrot.slane %v2972_v28, 5 }
 0x200   : > { %v1367_v62 = vpop.permute.xlu0 %1366  ;;  %v1890_v32 = vsel %vm1866_vm9, %v1835_v54, %v1450_v4  ;;  %v2977_v13 = vshrl.u32 %v3520_v7, 16  ;;  %v2980_v48 = vshll.u32 %v3520_v7, 16 }
 0x201   : > { %v2975_v40 = vsel %vm5630_vm12, %v2970_v51, %v2974_v57  ;;  %v1806_v3 = vsel %vm1756_vm7, %v1751_v49, %v1367_v62 }
 0x202   : > { %3202 = vst.msk [vmem:[%s5658_s30 + $0x54] sm:$0xf] %vm3180_vm15, %v2975_v40  ;;  %v2979_v61 = vrot.slane %v2977_v13, 4  ;;  %v2982_v52 = vrot.slane %v2980_v48, 5  ;;  %v6369_v13 = vld [vmem:[#allocation31_spill] sm:$0xff] }
 0x203   : > { %v1505_v20 = vpop.permute.xlu1 %1504  ;;  %v1617_v48 = vsel %vm1591_vm4, %v6323_v47, %v6369_v13 }
 0x204   : > { %v1422_v5 = vpop.permute.xlu0 %1421  ;;  %v1945_v34 = vsel %vm1921_vm10, %v1890_v32, %v1505_v20  ;;  %v2983_v40 = vor.u32 %v2982_v52, %v2979_v61 }
 0x205   : > { %v1861_v30 = vsel %vm1811_vm8, %v1806_v3, %v1422_v5 }
 0x207   : > { %v1560_v22 = vpop.permute.xlu1 %1559 }
 0x208   : > { %v2000_v50 = vsel %vm6365_vm1, %v1945_v34, %v1560_v22  ;;  %v1476_v31 = vpop.permute.xlu0 %1475 }
 0x209   : > { %3622 = vmatmul.mubr.msk.bf16.gmra.mrb[44].mxu0 %vm6366_vm0, %v2000_v50  ;;  %v1916_v37 = vsel %vm1866_vm9, %v1861_v30, %v1476_v31  ;;  %v2984_v50 = vrot.slane %v2983_v40, 4 }
 0x20a   : > { %3625 = vmatprep.mubr.msk.bf16.mxu0 %vm6346_vm3, %v6317_v43 }
 0x20b   : > { %v5910_v19 = vpop.permute.xlu1 %1232 }
 0x20c   : > { %v1531_v10 = vpop.permute.xlu0 %1530 }
 0x20d   : > { %v2183_v46 = vpop.f32.mrb[16].mxu0  ;;  %v1971_v63 = vsel %vm1921_vm10, %v1916_v37, %v1531_v10 }
 0x20e   : > { %v2184_v18 = vadd.f32 %v5551_v41, %v2183_v46  ;;  %v3595_v15 = vpop.f32.mrb[17].mxu0 }
 0x20f   : > { %v2186_v0 = vpop.f32.mrb[18].mxu0  ;;  %v5917_v8 = vpop.permute.xlu1 %1203 }
 0x210   : > { %vm2375_vm2 = vcmp.ge.f32.partialorder %v2184_v18, 0.0  ;;  %v2430_v36 = vmul.f32 %v5564_v38, %v2184_v18  ;;  %v3596_v17 = vpop.f32.mrb[19].mxu0  ;;  %v1586_v35 = vpop.permute.xlu0 %1585  ;;  %v2187_v45 = vadd.f32 %v5551_v41, %v2186_v0  ;;  %v1672_v0 = vsel %vm1646_vm5, %v1617_v48, %v5910_v19 }
 0x211   : > { %v2026_v23 = vsel %vm6367_vm14, %v1971_v63, %v1586_v35  ;;  %v2287_v6 = vpop.f32.mrb[12].mxu1 }
 0x212   : > { %v2484_v33 = vsel %vm2375_vm2, %v2184_v18, %v2430_v36  ;;  %v2288_v29 = vadd.f32 %v5551_v41, %v2287_v6  ;;  %v3647_v27 = vpop.f32.mrb[13].mxu1  ;;  %3674 = vmatmul.mubr.msk.bf16.gmra.mrb[40].mxu1 %vm6368_vm11, %v2026_v23  ;;  %v2431_v32 = vmul.f32 %v5564_v38, %v2187_v45  ;;  %vm2376_vm0 = vcmp.ge.f32.partialorder %v2187_v45, 0.0  ;;  %vm6370_vm2 = vmmov %vm6367_vm14 }
 0x213   : > { %v3495_v59 = vpack.c.bf16 %v2484_v33, %v2484_v33  ;;  %v2290_v60 = vpop.f32.mrb[14].mxu1  ;;  %v1259_v28 = vpop.permute.xlu1 %1258  ;;  %3677 = vmatprep.mubr.msk.bf16.mxu1 %vm6346_vm3, %v6317_v43  ;;  %v1643_v6 = vsel %vm1591_vm4, %v5122_v11, %v5917_v8  ;;  %vm6371_vm14 = vmmov %vm6368_vm11 }
 0x214   : > { %vm2401_vm13 = vcmp.ge.f32.partialorder %v2288_v29, 0.0  ;;  %v2456_v4 = vmul.f32 %v5564_v38, %v2288_v29  ;;  %v2291_v51 = vadd.f32 %v5551_v41, %v2290_v60  ;;  %v3648_v57 = vpop.f32.mrb[15].mxu1  ;;  %v1288_v16 = vpop.permute.xlu0 %1287  ;;  %v2485_v49 = vsel %vm2376_vm0, %v2187_v45, %v2431_v32  ;;  %vm6373_vm0 = vmmov %vm6371_vm14 }
 0x215   : > { %v2780_v62 = vshll.u32 %v3495_v59, 16  ;;  %v3496_v30 = vpack.c.bf16 %v2485_v49, %v2485_v49  ;;  %v1727_v17 = vsel %vm1701_vm6, %v1672_v0, %v1288_v16  ;;  %v1698_v33 = vsel %vm1646_vm5, %v1643_v6, %v1259_v28  ;;  %v5978_v49 = vld [vmem:[%s6231_s3] ss:$0 sm:$0xff] }
 0x216   : > { %v2510_v2 = vsel %vm2401_vm13, %v2288_v29, %v2456_v4  ;;  %vm2402_vm1 = vcmp.ge.f32.partialorder %v2291_v51, 0.0  ;;  %v2457_v14 = vmul.f32 %v5564_v38, %v2291_v51  ;;  %vm6372_vm13 = vmmov %vm6370_vm2 }
 0x217   : > { %v2782_v53 = vrot.slane %v2780_v62, 5  ;;  %v3521_v20 = vpack.c.bf16 %v2510_v2, %v2510_v2  ;;  %v1314_v55 = vpop.permute.xlu1 %1313  ;;  %v2785_v36 = vshrl.u32 %v3496_v30, 16  ;;  %v2788_v23 = vshll.u32 %v3496_v30, 16 }
 0x218   : > { %v2511_v25 = vsel %vm2402_vm1, %v2291_v51, %v2457_v14  ;;  %v1343_v5 = vpop.permute.xlu0 %1342  ;;  %v1753_v19 = vsel %vm1701_vm6, %v1698_v33, %v1314_v55 }
 0x219   : > { %v2783_v54 = vsel %vm5630_vm12, %v2778_v21, %v2782_v53  ;;  %v2986_v34 = vshll.u32 %v3521_v20, 16  ;;  %v2990_v22 = vshrl.u32 %v3521_v20, 16  ;;  %v3522_v26 = vpack.c.bf16 %v2511_v25, %v2511_v25 }
 0x21a   : > { %3186 = vst.msk [vmem:[%s5658_s30 + $0x14] sm:$0xf] %vm3180_vm15, %v2783_v54  ;;  %v1782_v47 = vsel %vm1756_vm7, %v1727_v17, %v1343_v5  ;;  %v2787_v61 = vrot.slane %v2785_v36, 4  ;;  %v2790_v51 = vrot.slane %v2788_v23, 5 }
 0x21b   : > { %v2988_v31 = vrot.slane %v2986_v34, 5  ;;  %v1369_v12 = vpop.permute.xlu1 %1368  ;;  %v2992_v44 = vrot.slane %v2990_v22, 4  ;;  %v2996_v7 = vshll.u32 %v3522_v26, 16 }
 0x21c   : > { %v1398_v1 = vpop.permute.xlu0 %1397  ;;  %v1808_v52 = vsel %vm1756_vm7, %v1753_v19, %v1369_v12  ;;  %v2791_v55 = vor.u32 %v2790_v51, %v2787_v61 }
 0x21d   : > { %v2989_v10 = vsel %vm5630_vm12, %v2984_v50, %v2988_v31  ;;  %v2993_v3 = vor.u32 %v2992_v44, %v2988_v31  ;;  %v2998_v15 = vrot.slane %v2996_v7, 5  ;;  %v1837_v29 = vsel %vm1811_vm8, %v1782_v47, %v1398_v1 }
 0x21e   : > { %3203 = vst.msk [vmem:[%s5658_s30 + $0x58] sm:$0xf] %vm3180_vm15, %v2989_v10  ;;  %v2792_v31 = vrot.slane %v2791_v55, 4 }
 0x21f   : > { %v1424_v46 = vpop.permute.xlu1 %1423  ;;  %v2994_v18 = vrot.slane %v2993_v3, 4 }
 0x220   : > { %v1452_v56 = vpop.permute.xlu0 %1451  ;;  %v1863_v11 = vsel %vm1811_vm8, %v1808_v52, %v1424_v46 }
 0x221   : > { %v2999_v37 = vsel %vm5630_vm12, %v2994_v18, %v2998_v15  ;;  %v1892_v27 = vsel %vm1866_vm9, %v1837_v29, %v1452_v56 }
 0x222   : > { %3204 = vst.msk [vmem:[%s5658_s30 + $0x5c] sm:$0xf] %vm3180_vm15, %v2999_v37 }
 0x223   : > { %v1478_v63 = vpop.permute.xlu1 %1477 }
 0x224   : > { %v1507_v35 = vpop.permute.xlu0 %1506  ;;  %v1918_v16 = vsel %vm1866_vm9, %v1863_v11, %v1478_v63 }
 0x225   : > { %v1947_v59 = vsel %vm1921_vm10, %v1892_v27, %v1507_v35 }
 0x227   : > { %v1533_v39 = vpop.permute.xlu1 %1532 }
 0x228   : > { %v1562_v60 = vpop.permute.xlu0 %1561  ;;  %v2191_v4 = vpop.f32.mrb[20].mxu0  ;;  %v1973_v45 = vsel %vm1921_vm10, %v1918_v16, %v1533_v39 }
 0x229   : > { %v2002_v8 = vsel %vm6370_vm2, %v1947_v59, %v1562_v60  ;;  %v2192_v28 = vadd.f32 %v5551_v41, %v2191_v4  ;;  %v3599_v57 = vpop.f32.mrb[21].mxu0  ;;  %v6374_v60 = vld [vmem:[#allocation30_spill] sm:$0xff] }
 0x22a   : > { %3626 = vmatmul.mubr.msk.bf16.gmra.mrb[48].mxu0 %vm6371_vm14, %v2002_v8  ;;  %v2194_v62 = vpop.f32.mrb[22].mxu0  ;;  %v1619_v4 = vsel %vm1591_vm4, %v6325_v24, %v6374_v60  ;;  %vm6375_vm14 = vmmov %vm6372_vm13 }
 0x22b   : > { %vm2377_vm11 = vcmp.ge.f32.partialorder %v2192_v28, 0.0  ;;  %v2432_v2 = vmul.f32 %v5564_v38, %v2192_v28  ;;  %v2195_v14 = vadd.f32 %v5551_v41, %v2194_v62  ;;  %v1588_v21 = vpop.permute.xlu1 %1587  ;;  %v3600_v40 = vpop.f32.mrb[23].mxu0  ;;  %3629 = vmatprep.mubr.msk.bf16.mxu0 %vm6346_vm3, %v6317_v43 }
 0x22c   : > { %v2028_v53 = vsel %vm6372_vm13, %v1973_v45, %v1588_v21  ;;  %v1235_v20 = vpop.permute.xlu0 %1234 }
 0x22d   : > { %v2486_v25 = vsel %vm2377_vm11, %v2192_v28, %v2432_v2  ;;  %vm2378_vm1 = vcmp.ge.f32.partialorder %v2195_v14, 0.0  ;;  %v2433_v5 = vmul.f32 %v5564_v38, %v2195_v14  ;;  %3678 = vmatmul.mubr.msk.bf16.gmra.mrb[44].mxu1 %vm6373_vm0, %v2028_v53  ;;  %v1674_v51 = vsel %vm1646_vm5, %v1619_v4, %v1235_v20  ;;  %vm6376_vm11 = vmmov %vm6373_vm0 }
 0x22e   : > { %v3497_v54 = vpack.c.bf16 %v2486_v25, %v2486_v25  ;;  %3681 = vmatprep.mubr.msk.bf16.mxu1 %vm6346_vm3, %v6317_v43 }
 0x22f   : > { %v2487_v41 = vsel %vm2378_vm1, %v2195_v14, %v2433_v5  ;;  %v1290_v32 = vpop.permute.xlu1 %1289 }
 0x230   : > { %v2794_v34 = vshll.u32 %v3497_v54, 16  ;;  %v2798_v22 = vshrl.u32 %v3497_v54, 16  ;;  %v3498_v26 = vpack.c.bf16 %v2487_v41, %v2487_v41  ;;  %v1206_v50 = vpop.permute.xlu0 %1205  ;;  %v1729_v8 = vsel %vm1701_vm6, %v1674_v51, %v1290_v32 }
 0x231   : > { %v2295_v12 = vpop.f32.mrb[16].mxu1  ;;  %v1645_v24 = vsel %vm1591_vm4, %v5250_v42, %v1206_v50  ;;  %vm6377_vm4 = vmmov %vm6372_vm13 }
 0x232   : > { %v2796_v44 = vrot.slane %v2794_v34, 5  ;;  %v2800_v7 = vrot.slane %v2798_v22, 4  ;;  %v2804_v1 = vshll.u32 %v3498_v26, 16  ;;  %v2296_v10 = vadd.f32 %v5978_v49, %v2295_v12  ;;  %v3651_v43 = vpop.f32.mrb[17].mxu1 }
 0x233   : > { %v2298_v3 = vpop.f32.mrb[18].mxu1  ;;  %v1345_v46 = vpop.permute.xlu1 %1344 }
 0x234   : > { %v2797_v30 = vsel %vm5630_vm12, %v2792_v31, %v2796_v44  ;;  %v2801_v18 = vor.u32 %v2800_v7, %v2796_v44  ;;  %vm2403_vm3 = vcmp.ge.f32.partialorder %v2296_v10, 0.0  ;;  %v3652_v15 = vpop.f32.mrb[19].mxu1  ;;  %v1261_v56 = vpop.permute.xlu0 %1260  ;;  %v2458_v13 = vmul.f32 %v5564_v38, %v2296_v10 }
 0x235   : > { %3187 = vst.msk [vmem:[%s5658_s30 + $0x18] sm:$0xf] %vm3180_vm15, %v2797_v30  ;;  %v2299_v48 = vadd.f32 %v5978_v49, %v2298_v3  ;;  %v2806_v0 = vrot.slane %v2804_v1, 5  ;;  %v1784_v62 = vsel %vm1756_vm7, %v1729_v8, %v1345_v46  ;;  %v1700_v20 = vsel %vm1646_vm5, %v1645_v24, %v1261_v56  ;;  %vm6378_vm5 = vmmov %vm6373_vm0 }
 0x236   : > { %v2802_v37 = vrot.slane %v2801_v18, 4  ;;  %v2512_v63 = vsel %vm2403_vm3, %v2296_v10, %v2458_v13 }
 0x237   : > { %vm2404_vm2 = vcmp.ge.f32.partialorder %v2299_v48, 0.0  ;;  %v2459_v36 = vmul.f32 %v5564_v38, %v2299_v48  ;;  %v1400_v17 = vpop.permute.xlu1 %1399  ;;  %v3523_v23 = vpack.c.bf16 %v2512_v63, %v2512_v63 }
 0x238   : > { %v2807_v35 = vsel %vm5630_vm12, %v2802_v37, %v2806_v0  ;;  %v1316_v6 = vpop.permute.xlu0 %1315  ;;  %v1839_v2 = vsel %vm1811_vm8, %v1784_v62, %v1400_v17 }
 0x239   : > { %3188 = vst.msk [vmem:[%s5658_s30 + $0x1c] sm:$0xf] %vm3180_vm15, %v2807_v35  ;;  %v2513_v47 = vsel %vm2404_vm2, %v2299_v48, %v2459_v36  ;;  %v3001_v33 = vshrl.u32 %v3523_v23, 16  ;;  %v3004_v29 = vshll.u32 %v3523_v23, 16  ;;  %v1755_v5 = vsel %vm1701_vm6, %v1700_v20, %v1316_v6 }
 0x23a   : > { %v3524_v19 = vpack.c.bf16 %v2513_v47, %v2513_v47 }
 0x23b   : > { %v1454_v27 = vpop.permute.xlu1 %1453  ;;  %v3003_v39 = vrot.slane %v3001_v33, 4  ;;  %v3006_v61 = vrot.slane %v3004_v29, 5 }
 0x23c   : > { %v3010_v52 = vshll.u32 %v3524_v19, 16  ;;  %v1371_v59 = vpop.permute.xlu0 %1370  ;;  %v1894_v21 = vsel %vm1866_vm9, %v1839_v2, %v1454_v27  ;;  %v3014_v50 = vshrl.u32 %v3524_v19, 16 }
 0x23d   : > { %v3007_v11 = vor.u32 %v3006_v61, %v3003_v39  ;;  %v1810_v54 = vsel %vm1756_vm7, %v1755_v5, %v1371_v59 }
 0x23e   : > { %v3012_v16 = vrot.slane %v3010_v52, 5  ;;  %v3016_v18 = vrot.slane %v3014_v50, 4 }
 0x23f   : > { %v1509_v28 = vpop.permute.xlu1 %1508  ;;  %v3008_v57 = vrot.slane %v3007_v11, 4 }
 0x240   : > { %v1426_v45 = vpop.permute.xlu0 %1425  ;;  %v1949_v40 = vsel %vm1921_vm10, %v1894_v21, %v1509_v28  ;;  %v3017_v6 = vor.u32 %v3016_v18, %v3012_v16 }
 0x241   : > { %v3013_v14 = vsel %vm5630_vm12, %v3008_v57, %v3012_v16  ;;  %v1865_v41 = vsel %vm1811_vm8, %v1810_v54, %v1426_v45 }
 0x242   : > { %3205 = vst.msk [vmem:[%s5658_s30 + $0x60] sm:$0xf] %vm3180_vm15, %v3013_v14  ;;  %v3018_v61 = vrot.slane %v3017_v6, 4 }
 0x243   : > { %v1564_v53 = vpop.permute.xlu1 %1563 }
 0x244   : > { %v2004_v55 = vsel %vm6375_vm14, %v1949_v40, %v1564_v53  ;;  %v1480_v25 = vpop.permute.xlu0 %1479 }
 0x245   : > { %3630 = vmatmul.mubr.msk.bf16.gmra.mrb[52].mxu0 %vm6376_vm11, %v2004_v55  ;;  %v1920_v42 = vsel %vm1866_vm9, %v1865_v41, %v1480_v25 }
 0x247   : > { %v1590_v32 = vpop.permute.xlu1 %1589 }
 0x248   : > { %v1535_v34 = vpop.permute.xlu0 %1534 }
 0x249   : > { %v1975_v22 = vsel %vm1921_vm10, %v1920_v42, %v1535_v34  ;;  %v2199_v26 = vpop.f32.mrb[24].mxu0 }
 0x24a   : > { %v2030_v31 = vsel %vm6377_vm4, %v1975_v22, %v1590_v32  ;;  %v2200_v12 = vadd.f32 %v5978_v49, %v2199_v26  ;;  %v3603_v44 = vpop.f32.mrb[25].mxu0 }
 0x24b   : > { %v2202_v7 = vpop.f32.mrb[26].mxu0  ;;  %3682 = vmatmul.mubr.msk.bf16.gmra.mrb[48].mxu1 %vm6378_vm5, %v2030_v31 }
 0x24c   : > { %vm2379_vm6 = vcmp.ge.f32.partialorder %v2200_v12, 0.0  ;;  %v2434_v1 = vmul.f32 %v5564_v38, %v2200_v12  ;;  %v2203_v10 = vadd.f32 %v5978_v49, %v2202_v7  ;;  %v3604_v43 = vpop.f32.mrb[27].mxu0  ;;  %v2303_v3 = vpop.f32.mrb[20].mxu1 }
 0x24d   : > { %v2304_v46 = vadd.f32 %v5978_v49, %v2303_v3  ;;  %v3655_v30 = vpop.f32.mrb[21].mxu1 }
 0x24e   : > { %v2488_v15 = vsel %vm2379_vm6, %v2200_v12, %v2434_v1  ;;  %vm2380_vm7 = vcmp.ge.f32.partialorder %v2203_v10, 0.0  ;;  %v2435_v56 = vmul.f32 %v5564_v38, %v2203_v10  ;;  %v2306_v13 = vpop.f32.mrb[22].mxu1 }
 0x24f   : > { %v3499_v48 = vpack.c.bf16 %v2488_v15, %v2488_v15  ;;  %vm2405_vm8 = vcmp.ge.f32.partialorder %v2304_v46, 0.0  ;;  %v2460_v37 = vmul.f32 %v5564_v38, %v2304_v46  ;;  %v3656_v0 = vpop.f32.mrb[23].mxu1  ;;  %v2307_v11 = vadd.f32 %v5978_v49, %v2306_v13 }
 0x250   : > { %v2489_v63 = vsel %vm2380_vm7, %v2203_v10, %v2435_v56 }
 0x251   : > { %v2809_v36 = vshrl.u32 %v3499_v48, 16  ;;  %v2812_v17 = vshll.u32 %v3499_v48, 16  ;;  %v3500_v35 = vpack.c.bf16 %v2489_v63, %v2489_v63  ;;  %v2514_v23 = vsel %vm2405_vm8, %v2304_v46, %v2460_v37 }
 0x252   : > { %v3525_v47 = vpack.c.bf16 %v2514_v23, %v2514_v23  ;;  %v2461_v8 = vmul.f32 %v5564_v38, %v2307_v11  ;;  %vm2406_vm9 = vcmp.ge.f32.partialorder %v2307_v11, 0.0 }
 0x253   : > { %v2811_v33 = vrot.slane %v2809_v36, 4  ;;  %v2814_v29 = vrot.slane %v2812_v17, 5  ;;  %v2818_v19 = vshll.u32 %v3500_v35, 16  ;;  %v2822_v28 = vshrl.u32 %v3500_v35, 16 }
 0x254   : > { %v3020_v27 = vshll.u32 %v3525_v47, 16  ;;  %v2515_v57 = vsel %vm2406_vm9, %v2307_v11, %v2461_v8 }
 0x255   : > { %v2815_v39 = vor.u32 %v2814_v29, %v2811_v33  ;;  %v2820_v60 = vrot.slane %v2818_v19, 5  ;;  %v2824_v62 = vrot.slane %v2822_v28, 4  ;;  %v3526_v14 = vpack.c.bf16 %v2515_v57, %v2515_v57 }
 0x256   : > { %v3022_v52 = vrot.slane %v3020_v27, 5 }
 0x257   : > { %v2816_v59 = vrot.slane %v2815_v39, 4  ;;  %v2825_v53 = vor.u32 %v2824_v62, %v2820_v60  ;;  %v3025_v55 = vshrl.u32 %v3526_v14, 16  ;;  %v3028_v25 = vshll.u32 %v3526_v14, 16 }
 0x258   : > { %v3023_v4 = vsel %vm5630_vm12, %v3018_v61, %v3022_v52 }
 0x259   : > { %v2821_v51 = vsel %vm5630_vm12, %v2816_v59, %v2820_v60  ;;  %3206 = vst.msk [vmem:[%s5658_s30 + $0x64] sm:$0xf] %vm3180_vm15, %v3023_v4  ;;  %v2826_v41 = vrot.slane %v2825_v53, 4  ;;  %v3027_v42 = vrot.slane %v3025_v55, 4  ;;  %v3030_v34 = vrot.slane %v3028_v25, 5 }
 0x25a   : > { %3189 = vst.msk [vmem:[%s5658_s30 + $0x20] sm:$0xf] %vm3180_vm15, %v2821_v51 }
 0x25b   : > { %v3031_v10 = vor.u32 %v3030_v34, %v3027_v42 }
 0x25d   : > { %v3032_v48 = vrot.slane %v3031_v10, 4 }
 0x264   : > { %v2207_v16 = vpop.f32.mrb[28].mxu0 }
 0x265   : > { %v2208_v45 = vadd.f32 %v5978_v49, %v2207_v16  ;;  %v3607_v2 = vpop.f32.mrb[29].mxu0 }
 0x266   : > { %v2210_v21 = vpop.f32.mrb[30].mxu0 }
 0x267   : > { %vm2381_vm10 = vcmp.ge.f32.partialorder %v2208_v45, 0.0  ;;  %v2436_v24 = vmul.f32 %v5564_v38, %v2208_v45  ;;  %v3608_v40 = vpop.f32.mrb[31].mxu0  ;;  %v2211_v43 = vadd.f32 %v5978_v49, %v2210_v21 }
 0x269   : > { %v2490_v20 = vsel %vm2381_vm10, %v2208_v45, %v2436_v24  ;;  %v2437_v37 = vmul.f32 %v5564_v38, %v2211_v43  ;;  %vm2382_vm0 = vcmp.ge.f32.partialorder %v2211_v43, 0.0 }
 0x26a   : > { %v3501_v5 = vpack.c.bf16 %v2490_v20, %v2490_v20 }
 0x26b   : > { %v2491_v23 = vsel %vm2382_vm0, %v2211_v43, %v2437_v37 }
 0x26c   : > { %v2828_v54 = vshll.u32 %v3501_v5, 16  ;;  %v3502_v33 = vpack.c.bf16 %v2491_v23, %v2491_v23 }
 0x26d   : > { %v2311_v32 = vpop.f32.mrb[24].mxu1 }
 0x26e   : > { %v2830_v22 = vrot.slane %v2828_v54, 5  ;;  %v2312_v26 = vadd.f32 %v5978_v49, %v2311_v32  ;;  %v3659_v50 = vpop.f32.mrb[25].mxu1  ;;  %v2833_v19 = vshrl.u32 %v3502_v33, 16  ;;  %v2836_v27 = vshll.u32 %v3502_v33, 16 }
 0x26f   : > { %v2314_v31 = vpop.f32.mrb[26].mxu1 }
 0x270   : > { %v2831_v12 = vsel %vm5630_vm12, %v2826_v41, %v2830_v22  ;;  %vm2407_vm13 = vcmp.ge.f32.partialorder %v2312_v26, 0.0  ;;  %v3660_v44 = vpop.f32.mrb[27].mxu1  ;;  %v2462_v7 = vmul.f32 %v5564_v38, %v2312_v26  ;;  %v2315_v1 = vadd.f32 %v5978_v49, %v2314_v31 }
 0x271   : > { %3190 = vst.msk [vmem:[%s5658_s30 + $0x24] sm:$0xf] %vm3180_vm15, %v2831_v12  ;;  %v2835_v61 = vrot.slane %v2833_v19, 4  ;;  %v2838_v52 = vrot.slane %v2836_v27, 5 }
 0x272   : > { %v2516_v3 = vsel %vm2407_vm13, %v2312_v26, %v2462_v7  ;;  %vm2408_vm1 = vcmp.ge.f32.partialorder %v2315_v1, 0.0  ;;  %v2463_v46 = vmul.f32 %v5564_v38, %v2315_v1 }
 0x273   : > { %v3527_v30 = vpack.c.bf16 %v2516_v3, %v2516_v3  ;;  %v2839_v62 = vor.u32 %v2838_v52, %v2835_v61 }
 0x274   : > { %v2517_v18 = vsel %vm2408_vm1, %v2315_v1, %v2463_v46 }
 0x275   : > { %v3034_v15 = vshll.u32 %v3527_v30, 16  ;;  %v3038_v56 = vshrl.u32 %v3527_v30, 16  ;;  %v3528_v13 = vpack.c.bf16 %v2517_v18, %v2517_v18  ;;  %v2840_v42 = vrot.slane %v2839_v62, 4 }
 0x277   : > { %v3036_v0 = vrot.slane %v3034_v15, 5  ;;  %v3040_v63 = vrot.slane %v3038_v56, 4  ;;  %v3044_v36 = vshll.u32 %v3528_v13, 16 }
 0x279   : > { %v3037_v17 = vsel %vm5630_vm12, %v3032_v48, %v3036_v0  ;;  %v3041_v35 = vor.u32 %v3040_v63, %v3036_v0  ;;  %v3046_v47 = vrot.slane %v3044_v36, 5 }
 0x27a   : > { %3207 = vst.msk [vmem:[%s5658_s30 + $0x68] sm:$0xf] %vm3180_vm15, %v3037_v17 }
 0x27b   : > { %v3042_v6 = vrot.slane %v3041_v35, 4 }
 0x27d   : > { %v3047_v29 = vsel %vm5630_vm12, %v3042_v6, %v3046_v47 }
 0x27e   : > { %3208 = vst.msk [vmem:[%s5658_s30 + $0x6c] sm:$0xf] %vm3180_vm15, %v3047_v29 }
 0x285   : > { %v2215_v39 = vpop.f32.mrb[32].mxu0 }
 0x286   : > { %v2216_v59 = vadd.f32 %v5978_v49, %v2215_v39  ;;  %v3611_v60 = vpop.f32.mrb[33].mxu0 }
 0x287   : > { %v2218_v4 = vpop.f32.mrb[34].mxu0 }
 0x288   : > { %vm2383_vm3 = vcmp.ge.f32.partialorder %v2216_v59, 0.0  ;;  %v2438_v51 = vmul.f32 %v5564_v38, %v2216_v59  ;;  %v2219_v11 = vadd.f32 %v5978_v49, %v2218_v4  ;;  %v3612_v8 = vpop.f32.mrb[35].mxu0  ;;  %v2319_v28 = vpop.f32.mrb[28].mxu1 }
 0x289   : > { %v2320_v57 = vadd.f32 %v5978_v49, %v2319_v28  ;;  %v3663_v16 = vpop.f32.mrb[29].mxu1 }
 0x28a   : > { %v2492_v45 = vsel %vm2383_vm3, %v2216_v59, %v2438_v51  ;;  %vm2384_vm2 = vcmp.ge.f32.partialorder %v2219_v11, 0.0  ;;  %v2439_v2 = vmul.f32 %v5564_v38, %v2219_v11  ;;  %v2322_v14 = vpop.f32.mrb[30].mxu1 }
 0x28b   : > { %v3503_v21 = vpack.c.bf16 %v2492_v45, %v2492_v45  ;;  %vm2409_vm14 = vcmp.ge.f32.partialorder %v2320_v57, 0.0  ;;  %v2464_v24 = vmul.f32 %v5564_v38, %v2320_v57  ;;  %v2323_v40 = vadd.f32 %v5978_v49, %v2322_v14  ;;  %v3664_v53 = vpop.f32.mrb[31].mxu1 }
 0x28c   : > { %v2493_v20 = vsel %vm2384_vm2, %v2219_v11, %v2439_v2 }
 0x28d   : > { %v2842_v55 = vshll.u32 %v3503_v21, 16  ;;  %v2846_v25 = vshrl.u32 %v3503_v21, 16  ;;  %v3504_v5 = vpack.c.bf16 %v2493_v20, %v2493_v20  ;;  %v2518_v54 = vsel %vm2409_vm14, %v2320_v57, %v2464_v24 }
 0x28e   : > { %v3529_v41 = vpack.c.bf16 %v2518_v54, %v2518_v54  ;;  %vm2410_vm11 = vcmp.ge.f32.partialorder %v2323_v40, 0.0  ;;  %v2465_v32 = vmul.f32 %v5564_v38, %v2323_v40 }
 0x28f   : > { %v2844_v34 = vrot.slane %v2842_v55, 5  ;;  %v2848_v22 = vrot.slane %v2846_v25, 4  ;;  %v2852_v26 = vshll.u32 %v3504_v5, 16 }
 0x290   : > { %v3049_v50 = vshrl.u32 %v3529_v41, 16  ;;  %v3052_v31 = vshll.u32 %v3529_v41, 16  ;;  %v2519_v12 = vsel %vm2410_vm11, %v2323_v40, %v2465_v32 }
 0x291   : > { %v2845_v44 = vsel %vm5630_vm12, %v2840_v42, %v2844_v34  ;;  %v2849_v7 = vor.u32 %v2848_v22, %v2844_v34  ;;  %v3530_v1 = vpack.c.bf16 %v2519_v12, %v2519_v12  ;;  %v2854_v46 = vrot.slane %v2852_v26, 5 }
 0x292   : > { %3191 = vst.msk [vmem:[%s5658_s30 + $0x28] sm:$0xf] %vm3180_vm15, %v2845_v44  ;;  %v3051_v10 = vrot.slane %v3049_v50, 4  ;;  %v3054_v43 = vrot.slane %v3052_v31, 5 }
 0x293   : > { %v2850_v3 = vrot.slane %v2849_v7, 4  ;;  %v3058_v30 = vshll.u32 %v3530_v1, 16  ;;  %v3062_v19 = vshrl.u32 %v3530_v1, 16 }
 0x294   : > { %v3055_v18 = vor.u32 %v3054_v43, %v3051_v10 }
 0x295   : > { %v2855_v15 = vsel %vm5630_vm12, %v2850_v3, %v2854_v46  ;;  %v3060_v13 = vrot.slane %v3058_v30, 5  ;;  %v3064_v28 = vrot.slane %v3062_v19, 4 }
 0x296   : > { %3192 = vst.msk [vmem:[%s5658_s30 + $0x2c] sm:$0xf] %vm3180_vm15, %v2855_v15  ;;  %v3056_v56 = vrot.slane %v3055_v18, 4 }
 0x297   : > { %v3065_v21 = vor.u32 %v3064_v28, %v3060_v13 }
 0x298   : > { %v3061_v48 = vsel %vm5630_vm12, %v3056_v56, %v3060_v13 }
 0x299   : > { %3209 = vst.msk [vmem:[%s5658_s30 + $0x70] sm:$0xf] %vm3180_vm15, %v3061_v48  ;;  %v3066_v55 = vrot.slane %v3065_v21, 4 }
 0x2a0   : > { %v2223_v37 = vpop.f32.mrb[36].mxu0 }
 0x2a1   : > { %v2224_v0 = vadd.f32 %v5978_v49, %v2223_v37  ;;  %v3615_v63 = vpop.f32.mrb[37].mxu0 }
 0x2a2   : > { %v2226_v36 = vpop.f32.mrb[38].mxu0 }
 0x2a3   : > { %vm2385_vm4 = vcmp.ge.f32.partialorder %v2224_v0, 0.0  ;;  %v2440_v17 = vmul.f32 %v5564_v38, %v2224_v0  ;;  %v2227_v35 = vadd.f32 %v5978_v49, %v2226_v36  ;;  %v3616_v23 = vpop.f32.mrb[39].mxu0 }
 0x2a5   : > { %v2494_v6 = vsel %vm2385_vm4, %v2224_v0, %v2440_v17  ;;  %vm2386_vm5 = vcmp.ge.f32.partialorder %v2227_v35, 0.0  ;;  %v2441_v47 = vmul.f32 %v5564_v38, %v2227_v35 }
 0x2a6   : > { %v3505_v33 = vpack.c.bf16 %v2494_v6, %v2494_v6 }
 0x2a7   : > { %v2495_v29 = vsel %vm2386_vm5, %v2227_v35, %v2441_v47 }
 0x2a8   : > { %v2857_v27 = vshrl.u32 %v3505_v33, 16  ;;  %v2860_v39 = vshll.u32 %v3505_v33, 16  ;;  %v3506_v61 = vpack.c.bf16 %v2495_v29, %v2495_v29 }
 0x2a9   : > { %v2327_v52 = vpop.f32.mrb[32].mxu1 }
 0x2aa   : > { %v2859_v59 = vrot.slane %v2857_v27, 4  ;;  %v2862_v60 = vrot.slane %v2860_v39, 5  ;;  %v2866_v4 = vshll.u32 %v3506_v61, 16  ;;  %v3667_v51 = vpop.f32.mrb[33].mxu1  ;;  %v2328_v11 = vadd.f32 %v5978_v49, %v2327_v52 }
 0x2ab   : > { %v2330_v8 = vpop.f32.mrb[34].mxu1  ;;  %v2870_v32 = vshrl.u32 %v3506_v61, 16 }
 0x2ac   : > { %v2863_v57 = vor.u32 %v2862_v60, %v2859_v59  ;;  %v3668_v16 = vpop.f32.mrb[35].mxu1  ;;  %vm2411_vm6 = vcmp.ge.f32.partialorder %v2328_v11, 0.0  ;;  %v2466_v62 = vmul.f32 %v5564_v38, %v2328_v11  ;;  %v2868_v2 = vrot.slane %v2866_v4, 5 }
 0x2ad   : > { %v2331_v20 = vadd.f32 %v5978_v49, %v2330_v8  ;;  %v2872_v22 = vrot.slane %v2870_v32, 4 }
 0x2ae   : > { %v2864_v45 = vrot.slane %v2863_v57, 4  ;;  %v2520_v14 = vsel %vm2411_vm6, %v2328_v11, %v2466_v62 }
 0x2af   : > { %v3531_v40 = vpack.c.bf16 %v2520_v14, %v2520_v14  ;;  %v2467_v54 = vmul.f32 %v5564_v38, %v2331_v20  ;;  %vm2412_vm7 = vcmp.ge.f32.partialorder %v2331_v20, 0.0  ;;  %v2873_v46 = vor.u32 %v2872_v22, %v2868_v2 }
 0x2b0   : > { %v2869_v24 = vsel %vm5630_vm12, %v2864_v45, %v2868_v2 }
 0x2b1   : > { %3193 = vst.msk [vmem:[%s5658_s30 + $0x30] sm:$0xf] %vm3180_vm15, %v2869_v24  ;;  %v3068_v53 = vshll.u32 %v3531_v40, 16  ;;  %v2521_v41 = vsel %vm2412_vm7, %v2331_v20, %v2467_v54  ;;  %v2874_v47 = vrot.slane %v2873_v46, 4 }
 0x2b2   : > { %v3532_v42 = vpack.c.bf16 %v2521_v41, %v2521_v41 }
 0x2b3   : > { %v3070_v25 = vrot.slane %v3068_v53, 5 }
 0x2b4   : > { %v3073_v26 = vshrl.u32 %v3532_v42, 16  ;;  %v3076_v50 = vshll.u32 %v3532_v42, 16 }
 0x2b5   : > { %v3071_v5 = vsel %vm5630_vm12, %v3066_v55, %v3070_v25 }
 0x2b6   : > { %3210 = vst.msk [vmem:[%s5658_s30 + $0x74] sm:$0xf] %vm3180_vm15, %v3071_v5  ;;  %v3075_v30 = vrot.slane %v3073_v26, 4  ;;  %v3078_v18 = vrot.slane %v3076_v50, 5 }
 0x2b8   : > { %v3079_v17 = vor.u32 %v3078_v18, %v3075_v30 }
 0x2ba   : > { %v3080_v52 = vrot.slane %v3079_v17, 4 }
 0x2c1   : > { %v2231_v34 = vpop.f32.mrb[40].mxu0 }
 0x2c2   : > { %v2232_v31 = vadd.f32 %v5978_v49, %v2231_v34  ;;  %v3619_v12 = vpop.f32.mrb[41].mxu0 }
 0x2c3   : > { %v2234_v44 = vpop.f32.mrb[42].mxu0 }
 0x2c4   : > { %vm2387_vm8 = vcmp.ge.f32.partialorder %v2232_v31, 0.0  ;;  %v2442_v7 = vmul.f32 %v5564_v38, %v2232_v31  ;;  %v3620_v1 = vpop.f32.mrb[43].mxu0  ;;  %v2335_v10 = vpop.f32.mrb[36].mxu1  ;;  %v2235_v35 = vadd.f32 %v5978_v49, %v2234_v44 }
 0x2c5   : > { %v2336_v43 = vadd.f32 %v5978_v49, %v2335_v10  ;;  %v3671_v3 = vpop.f32.mrb[37].mxu1 }
 0x2c6   : > { %v2496_v15 = vsel %vm2387_vm8, %v2232_v31, %v2442_v7  ;;  %v2338_v56 = vpop.f32.mrb[38].mxu1  ;;  %v2443_v59 = vmul.f32 %v5564_v38, %v2235_v35  ;;  %vm2388_vm13 = vcmp.ge.f32.partialorder %v2235_v35, 0.0 }
 0x2c7   : > { %v3507_v13 = vpack.c.bf16 %v2496_v15, %v2496_v15  ;;  %vm2413_vm9 = vcmp.ge.f32.partialorder %v2336_v43, 0.0  ;;  %v2468_v48 = vmul.f32 %v5564_v38, %v2336_v43  ;;  %v2339_v37 = vadd.f32 %v5978_v49, %v2338_v56  ;;  %v3672_v0 = vpop.f32.mrb[39].mxu1 }
 0x2c8   : > { %v2497_v28 = vsel %vm2388_vm13, %v2235_v35, %v2443_v59 }
 0x2c9   : > { %v2876_v63 = vshll.u32 %v3507_v13, 16  ;;  %v2522_v36 = vsel %vm2413_vm9, %v2336_v43, %v2468_v48  ;;  %vm2414_vm10 = vcmp.ge.f32.partialorder %v2339_v37, 0.0  ;;  %v2469_v6 = vmul.f32 %v5564_v38, %v2339_v37 }
 0x2ca   : > { %v3533_v23 = vpack.c.bf16 %v2522_v36, %v2522_v36  ;;  %v3508_v45 = vpack.c.bf16 %v2497_v28, %v2497_v28 }
 0x2cb   : > { %v2878_v33 = vrot.slane %v2876_v63, 5  ;;  %v2523_v27 = vsel %vm2414_vm10, %v2339_v37, %v2469_v6 }
 0x2cc   : > { %v3082_v29 = vshll.u32 %v3533_v23, 16  ;;  %v3086_v19 = vshrl.u32 %v3533_v23, 16  ;;  %v3534_v61 = vpack.c.bf16 %v2523_v27, %v2523_v27  ;;  %v2881_v2 = vshrl.u32 %v3508_v45, 16 }
 0x2cd   : > { %v2879_v39 = vsel %vm5630_vm12, %v2874_v47, %v2878_v33  ;;  %v2884_v14 = vshll.u32 %v3508_v45, 16 }
 0x2ce   : > { %3194 = vst.msk [vmem:[%s5658_s30 + $0x34] sm:$0xf] %vm3180_vm15, %v2879_v39  ;;  %v3084_v60 = vrot.slane %v3082_v29, 5  ;;  %v3088_v4 = vrot.slane %v3086_v19, 4  ;;  %v3092_v51 = vshll.u32 %v3534_v61, 16  ;;  %v2883_v24 = vrot.slane %v2881_v2, 4 }
 0x2cf   : > { %v2886_v40 = vrot.slane %v2884_v14, 5 }
 0x2d0   : > { %v3085_v11 = vsel %vm5630_vm12, %v3080_v52, %v3084_v60  ;;  %v3089_v8 = vor.u32 %v3088_v4, %v3084_v60  ;;  %v3094_v16 = vrot.slane %v3092_v51, 5 }
 0x2d1   : > { %3211 = vst.msk [vmem:[%s5658_s30 + $0x78] sm:$0xf] %vm3180_vm15, %v3085_v11  ;;  %v2887_v41 = vor.u32 %v2886_v40, %v2883_v24 }
 0x2d2   : > { %v3090_v57 = vrot.slane %v3089_v8, 4 }
 0x2d3   : > { %v2888_v12 = vrot.slane %v2887_v41, 4 }
 0x2d4   : > { %v3095_v62 = vsel %vm5630_vm12, %v3090_v57, %v3094_v16 }
 0x2d5   : > { %3212 = vst.msk [vmem:[%s5658_s30 + $0x7c] sm:$0xf] %vm3180_vm15, %v3095_v62 }
 0x2dc   : > { %v2239_v21 = vpop.f32.mrb[44].mxu0 }
 0x2dd   : > { %v2240_v53 = vadd.f32 %v5978_v49, %v2239_v21  ;;  %v3623_v20 = vpop.f32.mrb[45].mxu0 }
 0x2de   : > { %v2242_v55 = vpop.f32.mrb[46].mxu0 }
 0x2df   : > { %vm2389_vm1 = vcmp.ge.f32.partialorder %v2240_v53, 0.0  ;;  %v2444_v25 = vmul.f32 %v5564_v38, %v2240_v53  ;;  %v2243_v5 = vadd.f32 %v5978_v49, %v2242_v55  ;;  %v3624_v54 = vpop.f32.mrb[47].mxu0 }
 0x2e1   : > { %v2498_v32 = vsel %vm2389_vm1, %v2240_v53, %v2444_v25  ;;  %vm2390_vm0 = vcmp.ge.f32.partialorder %v2243_v5, 0.0  ;;  %v2445_v42 = vmul.f32 %v5564_v38, %v2243_v5 }
 0x2e2   : > { %v3509_v34 = vpack.c.bf16 %v2498_v32, %v2498_v32 }
 0x2e3   : > { %v2499_v22 = vsel %vm2390_vm0, %v2243_v5, %v2445_v42 }
 0x2e4   : > { %v2890_v26 = vshll.u32 %v3509_v34, 16  ;;  %v2894_v50 = vshrl.u32 %v3509_v34, 16  ;;  %v3510_v31 = vpack.c.bf16 %v2499_v22, %v2499_v22 }
 0x2e5   : > { %v2343_v44 = vpop.f32.mrb[40].mxu1 }
 0x2e6   : > { %v2892_v7 = vrot.slane %v2890_v26, 5  ;;  %v2896_v1 = vrot.slane %v2894_v50, 4  ;;  %v2900_v10 = vshll.u32 %v3510_v31, 16  ;;  %v2344_v43 = vadd.f32 %v5978_v49, %v2343_v44  ;;  %v3675_v3 = vpop.f32.mrb[41].mxu1 }
 0x2e7   : > { %v2346_v46 = vpop.f32.mrb[42].mxu1 }
 0x2e8   : > { %v2893_v30 = vsel %vm5630_vm12, %v2888_v12, %v2892_v7  ;;  %v2897_v18 = vor.u32 %v2896_v1, %v2892_v7  ;;  %vm2415_vm3 = vcmp.ge.f32.partialorder %v2344_v43, 0.0  ;;  %v3676_v15 = vpop.f32.mrb[43].mxu1  ;;  %v2470_v56 = vmul.f32 %v5564_v38, %v2344_v43 }
 0x2e9   : > { %3195 = vst.msk [vmem:[%s5658_s30 + $0x38] sm:$0xf] %vm3180_vm15, %v2893_v30  ;;  %v2347_v13 = vadd.f32 %v5978_v49, %v2346_v46  ;;  %v2902_v37 = vrot.slane %v2900_v10, 5 }
 0x2ea   : > { %v2898_v48 = vrot.slane %v2897_v18, 4  ;;  %v2524_v0 = vsel %vm2415_vm3, %v2344_v43, %v2470_v56 }
 0x2eb   : > { %vm2416_vm2 = vcmp.ge.f32.partialorder %v2347_v13, 0.0  ;;  %v2471_v63 = vmul.f32 %v5564_v38, %v2347_v13  ;;  %v3535_v17 = vpack.c.bf16 %v2524_v0, %v2524_v0 }
 0x2ec   : > { %v2903_v36 = vsel %vm5630_vm12, %v2898_v48, %v2902_v37 }
 0x2ed   : > { %3196 = vst.msk [vmem:[%s5658_s30 + $0x3c] sm:$0xf] %vm3180_vm15, %v2903_v36  ;;  %v2525_v35 = vsel %vm2416_vm2, %v2347_v13, %v2471_v63  ;;  %v3097_v23 = vshrl.u32 %v3535_v17, 16  ;;  %v3100_v6 = vshll.u32 %v3535_v17, 16 }
 0x2ee   : > { %v3536_v47 = vpack.c.bf16 %v2525_v35, %v2525_v35 }
 0x2ef   : > { %v3099_v33 = vrot.slane %v3097_v23, 4  ;;  %v3102_v29 = vrot.slane %v3100_v6, 5 }
 0x2f0   : > { %v3106_v19 = vshll.u32 %v3536_v47, 16  ;;  %v3110_v60 = vshrl.u32 %v3536_v47, 16 }
 0x2f1   : > { %v3103_v27 = vor.u32 %v3102_v29, %v3099_v33 }
 0x2f2   : > { %v3108_v61 = vrot.slane %v3106_v19, 5  ;;  %v3112_v2 = vrot.slane %v3110_v60, 4 }
 0x2f3   : > { %v3104_v39 = vrot.slane %v3103_v27, 4 }
 0x2f4   : > { %v3113_v32 = vor.u32 %v3112_v2, %v3108_v61 }
 0x2f5   : > { %v3109_v52 = vsel %vm5630_vm12, %v3104_v39, %v3108_v61 }
 0x2f6   : > { %3213 = vst.msk [vmem:[%s5658_s30 + $0x80] sm:$0xf] %vm3180_vm15, %v3109_v52  ;;  %v3114_v12 = vrot.slane %v3113_v32, 4 }
 0x2fd   : > { %v2247_v59 = vpop.f32.mrb[48].mxu0 }
 0x2fe   : > { %v2248_v4 = vadd.f32 %v5978_v49, %v2247_v59  ;;  %v3627_v51 = vpop.f32.mrb[49].mxu0 }
 0x2ff   : > { %v2250_v11 = vpop.f32.mrb[50].mxu0 }
 0x300   : > { %vm2391_vm14 = vcmp.ge.f32.partialorder %v2248_v4, 0.0  ;;  %v2446_v8 = vmul.f32 %v5564_v38, %v2248_v4  ;;  %v2251_v28 = vadd.f32 %v5978_v49, %v2250_v11  ;;  %v3628_v57 = vpop.f32.mrb[51].mxu0  ;;  %v2351_v16 = vpop.f32.mrb[44].mxu1 }
 0x301   : > { %v2352_v62 = vadd.f32 %v5978_v49, %v2351_v16  ;;  %v3679_v45 = vpop.f32.mrb[45].mxu1 }
 0x302   : > { %v2500_v14 = vsel %vm2391_vm14, %v2248_v4, %v2446_v8  ;;  %vm2392_vm11 = vcmp.ge.f32.partialorder %v2251_v28, 0.0  ;;  %v2447_v21 = vmul.f32 %v5564_v38, %v2251_v28  ;;  %v2354_v24 = vpop.f32.mrb[46].mxu1 }
 0x303   : > { %v3511_v40 = vpack.c.bf16 %v2500_v14, %v2500_v14  ;;  %vm2417_vm4 = vcmp.ge.f32.partialorder %v2352_v62, 0.0  ;;  %v2472_v53 = vmul.f32 %v5564_v38, %v2352_v62  ;;  %v3680_v20 = vpop.f32.mrb[47].mxu1  ;;  %v2355_v10 = vadd.f32 %v5978_v49, %v2354_v24 }
 0x304   : > { %v2501_v55 = vsel %vm2392_vm11, %v2251_v28, %v2447_v21 }
 0x305   : > { %v2905_v25 = vshrl.u32 %v3511_v40, 16  ;;  %v2908_v5 = vshll.u32 %v3511_v40, 16  ;;  %v3512_v54 = vpack.c.bf16 %v2501_v55, %v2501_v55  ;;  %v2526_v41 = vsel %vm2417_vm4, %v2352_v62, %v2472_v53 }
 0x306   : > { %v3537_v42 = vpack.c.bf16 %v2526_v41, %v2526_v41  ;;  %v2473_v46 = vmul.f32 %v5564_v38, %v2355_v10  ;;  %vm2418_vm5 = vcmp.ge.f32.partialorder %v2355_v10, 0.0 }
 0x307   : > { %v2907_v34 = vrot.slane %v2905_v25, 4  ;;  %v2910_v22 = vrot.slane %v2908_v5, 5  ;;  %v2914_v26 = vshll.u32 %v3512_v54, 16  ;;  %v2918_v18 = vshrl.u32 %v3512_v54, 16 }
 0x308   : > { %v3116_v50 = vshll.u32 %v3537_v42, 16  ;;  %v2527_v30 = vsel %vm2418_vm5, %v2355_v10, %v2473_v46 }
 0x309   : > { %v2911_v31 = vor.u32 %v2910_v22, %v2907_v34  ;;  %v2916_v1 = vrot.slane %v2914_v26, 5  ;;  %v3538_v15 = vpack.c.bf16 %v2527_v30, %v2527_v30  ;;  %v2920_v37 = vrot.slane %v2918_v18, 4 }
 0x30a   : > { %v3118_v44 = vrot.slane %v3116_v50, 5 }
 0x30b   : > { %v2912_v7 = vrot.slane %v2911_v31, 4  ;;  %v3121_v0 = vshrl.u32 %v3538_v15, 16  ;;  %v3124_v36 = vshll.u32 %v3538_v15, 16  ;;  %v2921_v33 = vor.u32 %v2920_v37, %v2916_v1 }
 0x30c   : > { %v3119_v43 = vsel %vm5630_vm12, %v3114_v12, %v3118_v44 }
 0x30d   : > { %v2917_v3 = vsel %vm5630_vm12, %v2912_v7, %v2916_v1  ;;  %3214 = vst.msk [vmem:[%s5658_s30 + $0x84] sm:$0xf] %vm3180_vm15, %v3119_v43  ;;  %v3123_v27 = vrot.slane %v3121_v0, 4  ;;  %v3126_v39 = vrot.slane %v3124_v36, 5  ;;  %v2922_v57 = vrot.slane %v2921_v33, 4 }
 0x30e   : > { %3197 = vst.msk [vmem:[%s5658_s30 + $0x40] sm:$0xf] %vm3180_vm15, %v2917_v3 }
 0x30f   : > { %v3127_v2 = vor.u32 %v3126_v39, %v3123_v27 }
 0x311   : > { %v3128_v41 = vrot.slane %v3127_v2, 4 }
 0x318   : > { %v2255_v56 = vpop.f32.mrb[52].mxu0 }
 0x319   : > { %v2256_v13 = vadd.f32 %v5978_v49, %v2255_v56  ;;  %v3631_v48 = vpop.f32.mrb[53].mxu0 }
 0x31a   : > { %v2258_v63 = vpop.f32.mrb[54].mxu0 }
 0x31b   : > { %vm2393_vm6 = vcmp.ge.f32.partialorder %v2256_v13, 0.0  ;;  %v2448_v17 = vmul.f32 %v5564_v38, %v2256_v13  ;;  %v2259_v35 = vadd.f32 %v5978_v49, %v2258_v63  ;;  %v3632_v23 = vpop.f32.mrb[55].mxu0 }
 0x31d   : > { %v2502_v6 = vsel %vm2393_vm6, %v2256_v13, %v2448_v17  ;;  %vm2394_vm7 = vcmp.ge.f32.partialorder %v2259_v35, 0.0  ;;  %v2449_v47 = vmul.f32 %v5564_v38, %v2259_v35 }
 0x31e   : > { %v3513_v29 = vpack.c.bf16 %v2502_v6, %v2502_v6  ;;  %v2359_v19 = vpop.f32.mrb[48].mxu1 }
 0x31f   : > { %v2503_v61 = vsel %vm2394_vm7, %v2259_v35, %v2449_v47  ;;  %v2360_v52 = vadd.f32 %v5978_v49, %v2359_v19  ;;  %v3683_v59 = vpop.f32.mrb[49].mxu1 }
 0x320   : > { %v2924_v60 = vshll.u32 %v3513_v29, 16  ;;  %v3514_v4 = vpack.c.bf16 %v2503_v61, %v2503_v61  ;;  %v2362_v51 = vpop.f32.mrb[50].mxu1 }
 0x321   : > { %vm2419_vm8 = vcmp.ge.f32.partialorder %v2360_v52, 0.0  ;;  %v2474_v11 = vmul.f32 %v5564_v38, %v2360_v52  ;;  %v2363_v8 = vadd.f32 %v5978_v49, %v2362_v51  ;;  %v3684_v28 = vpop.f32.mrb[51].mxu1 }
 0x322   : > { %v2926_v16 = vrot.slane %v2924_v60, 5  ;;  %v2929_v62 = vshrl.u32 %v3514_v4, 16  ;;  %v2932_v45 = vshll.u32 %v3514_v4, 16 }
 0x323   : > { %v2528_v14 = vsel %vm2419_vm8, %v2360_v52, %v2474_v11  ;;  %vm2420_vm9 = vcmp.ge.f32.partialorder %v2363_v8, 0.0  ;;  %v2475_v21 = vmul.f32 %v5564_v38, %v2363_v8 }
 0x324   : > { %v2927_v24 = vsel %vm5630_vm12, %v2922_v57, %v2926_v16  ;;  %v2931_v40 = vrot.slane %v2929_v62, 4  ;;  %v2934_v53 = vrot.slane %v2932_v45, 5  ;;  %v3539_v20 = vpack.c.bf16 %v2528_v14, %v2528_v14 }
 0x325   : > { %3198 = vst.msk [vmem:[%s5658_s30 + $0x44] sm:$0xf] %vm3180_vm15, %v2927_v24  ;;  %v2529_v49 = vsel %vm2420_vm9, %v2363_v8, %v2475_v21 }
 0x326   : > { %v2935_v55 = vor.u32 %v2934_v53, %v2931_v40  ;;  %v3130_v25 = vshll.u32 %v3539_v20, 16  ;;  %v3134_v5 = vshrl.u32 %v3539_v20, 16  ;;  %v3540_v54 = vpack.c.bf16 %v2529_v49, %v2529_v49 }
 0x328   : > { %v2936_v32 = vrot.slane %v2935_v55, 4  ;;  %v3132_v38 = vrot.slane %v3130_v25, 5  ;;  %v3136_v42 = vrot.slane %v3134_v5, 4  ;;  %v3140_v34 = vshll.u32 %v3540_v54, 16 }
 0x32a   : > { %v2941_v22 = vsel %vm5630_vm12, %v2936_v32, %v5753_v58  ;;  %v3133_v26 = vsel %vm5630_vm12, %v3128_v41, %v3132_v38  ;;  %v3137_v50 = vor.u32 %v3136_v42, %v3132_v38  ;;  %v3142_v12 = vrot.slane %v3140_v34, 5 }
 0x32b   : > { %3199 = vst.msk [vmem:[%s5658_s30 + $0x48] sm:$0xf] %vm3180_vm15, %v2941_v22  ;;  %3215 = vst.msk [vmem:[%s5658_s30 + $0x88] sm:$0xf] %vm3180_vm15, %v3133_v26 }
 0x32c   : > { %v3138_v31 = vrot.slane %v3137_v50, 4 }
 0x32e   : > { %v3143_v58 = vsel %vm5630_vm12, %v3138_v31, %v3142_v12 }
 0x32f   : > { %3216 = vst.msk [vmem:[%s5658_s30 + $0x8c] sm:$0xf] %vm3180_vm15, %v3143_v58 }
 0x330   : > { %3847 = shalt.err (!%p3844_p5)
}
 0x331   : > { %s3848_s26 = scalar_lea.hbm %s6171_s23, 2304  ;;  %s3852_s30 = scalar_lea.hbm %s6233_s5, 4608 }
 0x332   : > { %p3849_p6 = scmp.ne.s32.totalorder %s6171_s23, %s3848_s26  ;;  %p3853_p10 = scmp.lt.u32.totalorder %s6171_s23, %s6233_s5 }
 0x333   : > { %p3854_p11 = scmp.lt.u32.totalorder %s3852_s30, %s3848_s26  ;;  %p3856_p13 = scmp.lt.u32.totalorder %s3848_s26, %s6171_s23 }
 0x334   : > { %p3850_p7 = pnand %p3849_p6, %p3999_p4 }
 0x335   : > { %p3855_p12 = por %p3854_p11, %p3853_p10 }
 0x336   : > { %p3851_p9 = pneg %p3850_p7 }
 0x337   : > { %p3857_p0 = por %p3856_p13, %p3855_p12 }
 0x339   : > { %p3858_p1 = pnand %p3857_p0, %p3851_p9 }
 0x33b   : > { %3861 = shalt.err (!%p3858_p1)
}
 0x33c   : > { %s3925_s16 = smov 64  }
 0x33d   : > { %3695 = dma.vmem_to_hbm [thread:$0]  (%p3999_p4), %s6173_s17, 2304, %s6171_s23, %s6181_s4, %s3925_s16, %s3925_s16, %s3914_s13  }
 0x33e PF: > { %p3702_p2 = scmp.ge.s32.totalorder %s3912_s25, 2  ;;  %s3249_s18 = sand.u32 1, %s3892_s20  }
 0x33f   : > { %s3250_s19 = scalar_lea.sflag [#allocation4], %s3249_s18 }
 0x340   : > { %p3698_p3 = pnand %p3702_p2, %p4006_p8 }
 0x342   : > { %3887 = dma.done.wait (!%p3698_p3), %s3250_s19, 2304  }
 0x343   : > { %3889 = vsyncadd (!%p3698_p3), %s3250_s19, 4294964992  ;;  %s19_s25 = sadd.s32 1, %s3912_s25   ;;  %s6379_s20 = smov %s3896_s21 }
 0x344   : > { %p16_p5 = scmp.ge.s32.totalorder %s19_s25, 4   ;;  %s6380_s21 = smov %s3900_s22 }
 0x345   : > { %s6381_s22 = smov %s4012_s7  ;;  %s6382_s23 = smov %s3908_s24 }
 0x346   : > { %s6383_s24 = smov %s6385_s27  ;;  %18 = sbr.rel (!%p16_p5) target bundleno = 6 (0x6), region = 78 }
 0x34d   :  { %3255 = vsyncpa [#allocation4], 1 }
 0x34e   :  { %3257 = vsyncpa [#allocation4 + $0x1], 1 }

</bundles_post_ra>
